<compile_context>
chip_gen: v7x
topology: tpu7x:2x2x1
jax: 0.10.0
libtpu: 0.0.40
codegen_flags: <defaults>
</compile_context>

<pallas_src>
import functools

import jax
import jax.numpy as jnp
from jax.experimental import pallas as pl
from jax.experimental.pallas import tpu as pltpu


LANES = 128                      # lane width: channel / Kd padding target
_VMEM_LIMIT = 32 * 1024 * 1024   # bytes; safe on v7x (64 MiB physical); raise for big batches on v5e/v6e


def _round_up(x, m):
    return (x + m - 1) // m * m


# ----------------------------- Pallas kernels ------------------------------ #

def _conv_pool_kernel(p_ref, w_ref, b_ref, o_ref, *, kp):
    # p_ref: (KP, bm, Kd) bf16 patches per pool tap, w_ref: (Kd, C) bf16,
    # b_ref: (1, C) f32, o_ref: (bm, C) bf16.  GEMM per tap -> running max ->
    # +bias -> ReLU (bias/ReLU commute with the window max).
    w = w_ref[...]
    acc = jnp.dot(p_ref[0], w, preferred_element_type=jnp.float32)
    for t in range(1, kp):
        acc = jnp.maximum(
            acc, jnp.dot(p_ref[t], w, preferred_element_type=jnp.float32))
    o_ref[...] = jnp.maximum(acc + b_ref[...], 0.0).astype(o_ref.dtype)


def _conv_stats_kernel(p_ref, w_ref, c_ref, s_ref):
    # BN pass 1: conv tile (no bias) + per-tile partial (sum, sumsq) over rows.
    # p_ref: (bm, Kd) bf16, w_ref: (Kd, C) bf16, c_ref: (bm, C) bf16,
    # s_ref: (1, 2, C) f32 partial stats for THIS grid step ("parallel"-safe).
    acc = jnp.dot(p_ref[...], w_ref[...], preferred_element_type=jnp.float32)
    c_ref[...] = acc.astype(c_ref.dtype)
    stats = jnp.concatenate(
        [jnp.sum(acc, axis=0, keepdims=True),
         jnp.sum(acc * acc, axis=0, keepdims=True)], axis=0)       # (2, C)
    s_ref[...] = stats[None]


def _bn_pool_kernel(x_ref, sc_ref, sh_ref, o_ref, *, kp):
    # BN pass 2: y = max_t(x_t * scale + shift); ReLU.  kp=1 -> plain BN+ReLU.
    # Normalization is applied per tap BEFORE the max (scale may be negative).
    sc = sc_ref[...]
    sh = sh_ref[...]
    y = x_ref[0].astype(jnp.float32) * sc + sh
    for t in range(1, kp):
        y = jnp.maximum(y, x_ref[t].astype(jnp.float32) * sc + sh)
    o_ref[...] = jnp.maximum(y, 0.0).astype(o_ref.dtype)


# ------------------------------- glue / wrappers ---------------------------- #

def _pool_patches(x, kh, kw, pad, ph, pw):
    # im2col grouped by pooling tap.
    # x: (N, H, W, C) -> (ph*pw, N*Hp*Wp, kh*kw*C) where row (n, hp, wp) of tap
    # (di, dj) is the conv patch at conv-output position (ph*hp+di, pw*wp+dj).
    # Last-axis ordering matches w.reshape(kh*kw*C, Cout) for HWIO weights.
    N, H, W, C = x.shape
    xp = jnp.pad(x, ((0, 0), (pad, pad), (pad, pad), (0, 0)))
    Ho = H + 2 * pad - kh + 1
    Wo = W + 2 * pad - kw + 1
    Hp, Wp = Ho // ph, Wo // pw
    taps = []
    for di in range(ph):
        for dj in range(pw):
            els = [xp[:, di + ki: di + ki + ph * Hp: ph,
                      dj + kj: dj + kj + pw * Wp: pw, :]
                   for ki in range(kh) for kj in range(kw)]
            taps.append(jnp.concatenate(els, axis=-1)
                        .reshape(N * Hp * Wp, kh * kw * C))
    return jnp.stack(taps, axis=0), (N, Hp, Wp)


def _pad_gemm(p, w2d, block_m):
    # Pad patches/weights: M -> multiple of bm (bm multiple of 16 for bf16
    # sublane packing), Kd -> multiple of 128 lanes; cast operands to bf16.
    KP, M, Kd = p.shape
    Kdp = _round_up(Kd, LANES)
    bm = min(block_m, _round_up(M, 16))
    Mp = _round_up(M, bm)
    p = jnp.pad(p, ((0, 0), (0, Mp - M), (0, Kdp - Kd))).astype(jnp.bfloat16)
    w2d = jnp.pad(w2d, ((0, Kdp - Kd), (0, 0))).astype(jnp.bfloat16)
    return p, w2d, M, Mp, bm, Kdp


def conv_block(x, w, b, *, pad, pool=(1, 1), block_m=256):
    # Conv(kh,kw,stride1,pad) + bias + ReLU [+ MaxPool(pool)] as one GEMM kernel.
    KH, KW, Cin, Cp = w.shape
    ph, pw = pool
    p, (N, Hp, Wp) = _pool_patches(x, KH, KW, pad, ph, pw)
    Kd = KH * KW * Cin
    p, wk, M, Mp, bm, Kdp = _pad_gemm(p, w.reshape(Kd, Cp), block_m)
    KP = ph * pw
    out = pl.pallas_call(
        functools.partial(_conv_pool_kernel, kp=KP),
        out_shape=jax.ShapeDtypeStruct((Mp, Cp), jnp.bfloat16),
        grid_spec=pltpu.PrefetchScalarGridSpec(
            num_scalar_prefetch=0,
            grid=(Mp // bm,),
            in_specs=[pl.BlockSpec((KP, bm, Kdp), lambda i: (0, i, 0)),
                      pl.BlockSpec((Kdp, Cp), lambda i: (0, 0)),
                      pl.BlockSpec((1, Cp), lambda i: (0, 0))],
            out_specs=pl.BlockSpec((bm, Cp), lambda i: (i, 0)),
        ),
        compiler_params=pltpu.CompilerParams(
            dimension_semantics=("parallel",),
            vmem_limit_bytes=_VMEM_LIMIT),
        cost_estimate=pl.CostEstimate(
            flops=2 * KP * Mp * Kdp * Cp,
            transcendentals=0,
            bytes_accessed=2 * KP * Mp * Kdp + 2 * Kdp * Cp + 2 * Mp * Cp),
    )(p, wk, b.reshape(1, Cp).astype(jnp.float32))
    return out[:M].reshape(N, Hp, Wp, Cp)


def conv_bn_block(x, w, gamma, beta, *, pad, pool=(1, 1), eps=1e-5, block_m=256):
    # Conv(no bias) + BatchNorm(train-mode batch stats) + ReLU [+ MaxPool(pool)].
    KH, KW, Cin, Cp = w.shape
    # ---- pass 1: tiled conv -> bf16 conv buffer + per-tile partial stats ----
    p, (N, Ho, Wo) = _pool_patches(x, KH, KW, pad, 1, 1)
    Kd = KH * KW * Cin
    p, wk, M, Mp, bm, Kdp = _pad_gemm(p, w.reshape(Kd, Cp), block_m)
    p = p[0]                                        # (Mp, Kdp)
    G = Mp // bm
    conv, parts = pl.pallas_call(
        _conv_stats_kernel,
        out_shape=(jax.ShapeDtypeStruct((Mp, Cp), jnp.bfloat16),
                   jax.ShapeDtypeStruct((G, 2, Cp), jnp.float32)),
        grid_spec=pltpu.PrefetchScalarGridSpec(
            num_scalar_prefetch=0,
            grid=(G,),
            in_specs=[pl.BlockSpec((bm, Kdp), lambda i: (i, 0)),
                      pl.BlockSpec((Kdp, Cp), lambda i: (0, 0))],
            out_specs=(pl.BlockSpec((bm, Cp), lambda i: (i, 0)),
                       pl.BlockSpec((1, 2, Cp), lambda i: (i, 0, 0))),
        ),
        compiler_params=pltpu.CompilerParams(
            dimension_semantics=("parallel",),   # per-tile partials -> megacore-safe
            vmem_limit_bytes=_VMEM_LIMIT),
        cost_estimate=pl.CostEstimate(
            flops=2 * Mp * Kdp * Cp,
            transcendentals=0,
            bytes_accessed=2 * Mp * Kdp + 2 * Kdp * Cp + 2 * Mp * Cp),
    )(p, wk)

    # ---- tiny reduction + fold into per-channel scale/shift (plain JAX) -----
    # Padded rows of the patch matrix are exact zeros (and the conv has no
    # bias), so they contribute nothing; divide by the true count M = N*Ho*Wo.
    stats = jnp.sum(parts, axis=0)                               # (2, Cp)
    mean = stats[0] / M
    var = jnp.maximum(stats[1] / M - mean * mean, 0.0)           # biased variance
    inv = jax.lax.rsqrt(var + eps)
    scale = (gamma * inv).reshape(1, Cp).astype(jnp.float32)
    shift = (beta - mean * gamma * inv).reshape(1, Cp).astype(jnp.float32)

    # ---- pass 2: normalize (+ optional pool) + ReLU --------------------------
    cbuf = conv[:M].reshape(N, Ho, Wo, Cp)
    ph, pw = pool
    Hp, Wp = Ho // ph, Wo // pw
    taps = jnp.stack(
        [cbuf[:, di: di + ph * Hp: ph, dj: dj + pw * Wp: pw, :]
            .reshape(N * Hp * Wp, Cp)
         for di in range(ph) for dj in range(pw)], axis=0)       # (KP, M2, Cp)
    KP, M2, _ = taps.shape
    bm2 = min(block_m, _round_up(M2, 16))
    Mp2 = _round_up(M2, bm2)
    taps = jnp.pad(taps, ((0, 0), (0, Mp2 - M2), (0, 0)))
    out = pl.pallas_call(
        functools.partial(_bn_pool_kernel, kp=KP),
        out_shape=jax.ShapeDtypeStruct((Mp2, Cp), jnp.bfloat16),
        grid_spec=pltpu.PrefetchScalarGridSpec(
            num_scalar_prefetch=0,
            grid=(Mp2 // bm2,),
            in_specs=[pl.BlockSpec((KP, bm2, Cp), lambda i: (0, i, 0)),
                      pl.BlockSpec((1, Cp), lambda i: (0, 0)),
                      pl.BlockSpec((1, Cp), lambda i: (0, 0))],
            out_specs=pl.BlockSpec((bm2, Cp), lambda i: (i, 0)),
        ),
        compiler_params=pltpu.CompilerParams(
            dimension_semantics=("parallel",),
            vmem_limit_bytes=_VMEM_LIMIT),
    )(taps, scale, shift)
    return out[:M2].reshape(N, Hp, Wp, Cp)


# ------------------------------- params -------------------------------------- #

def init_params(key, input_channel, output_channel=64):
    # PyTorch-shaped (HWIO) parameters, random init (the spec only defines shapes).
    oc = [output_channel // 8, output_channel // 4, output_channel // 2, output_channel]
    ks = jax.random.split(key, 16)

    def cw(k, kh, kw, cin, cout):
        return jax.random.normal(k, (kh, kw, cin, cout), jnp.float32) * 0.05

    def cb(k, cout):
        return jax.random.normal(k, (cout,), jnp.float32) * 0.05

    return {
        "w0": cw(ks[0], 3, 3, input_channel, oc[0]), "b0": cb(ks[1], oc[0]),
        "w1": cw(ks[2], 3, 3, oc[0], oc[1]),         "b1": cb(ks[3], oc[1]),
        "w2": cw(ks[4], 3, 3, oc[1], oc[2]),         "b2": cb(ks[5], oc[2]),
        "w3": cw(ks[6], 3, 3, oc[2], oc[2]),         "b3": cb(ks[7], oc[2]),
        "w4": cw(ks[8], 3, 3, oc[2], oc[3]),
        "g4": 1.0 + 0.05 * jax.random.normal(ks[9], (oc[3],), jnp.float32),
        "be4": 0.05 * jax.random.normal(ks[10], (oc[3],), jnp.float32),
        "w5": cw(ks[11], 3, 3, oc[3], oc[3]),
        "g5": 1.0 + 0.05 * jax.random.normal(ks[12], (oc[3],), jnp.float32),
        "be5": 0.05 * jax.random.normal(ks[13], (oc[3],), jnp.float32),
        "w6": cw(ks[14], 2, 2, oc[3], oc[3]),        "b6": cb(ks[15], oc[3]),
    }


def prepare_params(params):
    # Zero-pad Cout (and Cin for layers fed by lane-padded activations) to 128,
    # cast conv weights to bf16 ONCE.  Padded channels stay exactly zero through
    # conv / bias / BN / ReLU / pool, so the forward output is unchanged.
    def pw(w, pad_cin):
        kh, kw, cin, cout = w.shape
        cinp = LANES if pad_cin else cin
        out = jnp.zeros((kh, kw, cinp, LANES), jnp.float32)
        out = out.at[:, :, :cin, :cout].set(w)
        return out.astype(jnp.bfloat16)

    def pv(v):
        out = jnp.zeros((LANES,), jnp.float32)
        return out.at[: v.shape[0]].set(v)

    return {
        "w0": pw(params["w0"], False), "b0": pv(params["b0"]),
        "w1": pw(params["w1"], True),  "b1": pv(params["b1"]),
        "w2": pw(params["w2"], True),  "b2": pv(params["b2"]),
        "w3": pw(params["w3"], True),  "b3": pv(params["b3"]),
        "w4": pw(params["w4"], True),  "g4": pv(params["g4"]), "be4": pv(params["be4"]),
        "w5": pw(params["w5"], True),  "g5": pv(params["g5"]), "be5": pv(params["be5"]),
        "w6": pw(params["w6"], True),  "b6": pv(params["b6"]),
    }


# ------------------------------- model -------------------------------------- #

@functools.partial(jax.jit, static_argnames=("out_channels",))
def vgg_feature_extractor(x_nchw, pparams, *, out_channels):
    # NCHW (PyTorch) -> NHWC (internal; channels carried lane-padded to 128)
    x = jnp.transpose(x_nchw, (0, 2, 3, 1))

    x = conv_block(x, pparams["w0"], pparams["b0"], pad=1, pool=(2, 2))   # Conv+ReLU+Pool2x2
    x = conv_block(x, pparams["w1"], pparams["b1"], pad=1, pool=(2, 2))   # Conv+ReLU+Pool2x2
    x = conv_block(x, pparams["w2"], pparams["b2"], pad=1)                # Conv+ReLU
    x = conv_block(x, pparams["w3"], pparams["b3"], pad=1, pool=(2, 1))   # Conv+ReLU+Pool(2,1)
    x = conv_bn_block(x, pparams["w4"], pparams["g4"], pparams["be4"],
                      pad=1)                                              # Conv+BN+ReLU
    x = conv_bn_block(x, pparams["w5"], pparams["g5"], pparams["be5"],
                      pad=1, pool=(2, 1))                                 # Conv+BN+ReLU+Pool(2,1)
    x = conv_block(x, pparams["w6"], pparams["b6"], pad=0)                # Conv2x2+ReLU

    # Drop lane padding, NHWC -> NCHW, f32 to match PyTorch output convention.
    x = x[..., :out_channels].astype(jnp.float32)
    return jnp.transpose(x, (0, 3, 1, 2))


if __name__ == "__main__":
    key = jax.random.PRNGKey(0)
    kx, kp = jax.random.split(key)

    # Small shapes: batch=2, input_channel=3, H=32, W=16, output_channel=64.
    N, C_IN, H, W = 2, 3, 32, 16
    OUT_CH = 64
    x = jax.random.normal(kx, (N, C_IN, H, W), jnp.float32)
    params = init_params(kp, C_IN, OUT_CH)
    pparams = prepare_params(params)

    y = jax.block_until_ready(vgg_feature_extractor(x, pparams, out_channels=OUT_CH))

    # H: 32 -(pool2)-> 16 -(pool2)-> 8 -(pool(2,1))-> 4 -(pool(2,1))-> 2 -(conv2x2)-> 1
    # W: 16 -(pool2)->  8 -(pool2)-> 4 ------------> 4 ------------> 4 -(conv2x2)-> 3
    assert y.shape == (N, OUT_CH, 1, 3), y.shape
    assert bool(jnp.all(jnp.isfinite(y)))
    print("KERNEL_OK")
</pallas_src>

<mosaic_0001>
module attributes {stable_mosaic.version = 11 : i64} {
  func.func @_conv_pool_kernel(%arg0: i32, %arg1: memref<4x256x128xbf16, #tpu.memory_space<vmem>>, %arg2: memref<128x128xbf16, #tpu.memory_space<vmem>>, %arg3: memref<1x128xf32, #tpu.memory_space<vmem>>, %arg4: memref<256x128xbf16, #tpu.memory_space<vmem>>) attributes {dimension_semantics = [#tpu.dimension_semantics<parallel>], iteration_bounds = array<i64: 1>, scalar_prefetch = 0 : i64, scratch_operands = 0 : i64, tpu.core_type = #tpu.core_type<tc>, window_params = [{transform_indices = @transform_0, window_bounds = array<i64: 4, 256, 128>}, {pipeline_mode = #tpu.pipeline_mode<synchronous>, transform_indices = @transform_1, window_bounds = array<i64: 128, 128>}, {pipeline_mode = #tpu.pipeline_mode<synchronous>, transform_indices = @transform_2, window_bounds = array<i64: 1, 128>}, {transform_indices = @transform_3, window_bounds = array<i64: 256, 128>}]} {
    %c0 = arith.constant 0 : index
    %c0_0 = arith.constant 0 : index
    %0 = vector.load %arg2[%c0, %c0_0] : memref<128x128xbf16, #tpu.memory_space<vmem>>, vector<128x128xbf16>
    %c0_1 = arith.constant 0 : index
    %c0_2 = arith.constant 0 : index
    %c0_3 = arith.constant 0 : index
    %1 = vector.load %arg1[%c0_1, %c0_2, %c0_3] : memref<4x256x128xbf16, #tpu.memory_space<vmem>>, vector<1x256x128xbf16>
    %2 = vector.shape_cast %1 : vector<1x256x128xbf16> to vector<256x128xbf16>
    %cst = arith.constant dense<0.000000e+00> : vector<256x128xf32>
    %3 = tpu.matmul %2, %0, %cst {dimension_numbers = #tpu.dot_dimension_numbers<[1], [0], [0], [1], [0, 0, 1, 1], [], []>} : vector<256x128xbf16>, vector<128x128xbf16>, vector<256x128xf32> -> vector<256x128xf32>
    %c1 = arith.constant 1 : index
    %c0_4 = arith.constant 0 : index
    %c0_5 = arith.constant 0 : index
    %4 = vector.load %arg1[%c1, %c0_4, %c0_5] : memref<4x256x128xbf16, #tpu.memory_space<vmem>>, vector<1x256x128xbf16>
    %5 = vector.shape_cast %4 : vector<1x256x128xbf16> to vector<256x128xbf16>
    %cst_6 = arith.constant dense<0.000000e+00> : vector<256x128xf32>
    %6 = tpu.matmul %5, %0, %cst_6 {dimension_numbers = #tpu.dot_dimension_numbers<[1], [0], [0], [1], [0, 0, 1, 1], [], []>} : vector<256x128xbf16>, vector<128x128xbf16>, vector<256x128xf32> -> vector<256x128xf32>
    %7 = arith.maximumf %3, %6 : vector<256x128xf32>
    %c2 = arith.constant 2 : index
    %c0_7 = arith.constant 0 : index
    %c0_8 = arith.constant 0 : index
    %8 = vector.load %arg1[%c2, %c0_7, %c0_8] : memref<4x256x128xbf16, #tpu.memory_space<vmem>>, vector<1x256x128xbf16>
    %9 = vector.shape_cast %8 : vector<1x256x128xbf16> to vector<256x128xbf16>
    %cst_9 = arith.constant dense<0.000000e+00> : vector<256x128xf32>
    %10 = tpu.matmul %9, %0, %cst_9 {dimension_numbers = #tpu.dot_dimension_numbers<[1], [0], [0], [1], [0, 0, 1, 1], [], []>} : vector<256x128xbf16>, vector<128x128xbf16>, vector<256x128xf32> -> vector<256x128xf32>
    %11 = arith.maximumf %7, %10 : vector<256x128xf32>
    %c3 = arith.constant 3 : index
    %c0_10 = arith.constant 0 : index
    %c0_11 = arith.constant 0 : index
    %12 = vector.load %arg1[%c3, %c0_10, %c0_11] : memref<4x256x128xbf16, #tpu.memory_space<vmem>>, vector<1x256x128xbf16>
    %13 = vector.shape_cast %12 : vector<1x256x128xbf16> to vector<256x128xbf16>
    %cst_12 = arith.constant dense<0.000000e+00> : vector<256x128xf32>
    %14 = tpu.matmul %13, %0, %cst_12 {dimension_numbers = #tpu.dot_dimension_numbers<[1], [0], [0], [1], [0, 0, 1, 1], [], []>} : vector<256x128xbf16>, vector<128x128xbf16>, vector<256x128xf32> -> vector<256x128xf32>
    %15 = arith.maximumf %11, %14 : vector<256x128xf32>
    %c0_13 = arith.constant 0 : index
    %c0_14 = arith.constant 0 : index
    %16 = vector.load %arg3[%c0_13, %c0_14] : memref<1x128xf32, #tpu.memory_space<vmem>>, vector<1x128xf32>
    %17 = vector.broadcast %16 : vector<1x128xf32> to vector<256x128xf32>
    %18 = arith.addf %15, %17 : vector<256x128xf32>
    %cst_15 = arith.constant 0.000000e+00 : f32
    %19 = vector.broadcast %cst_15 : f32 to vector<256x128xf32>
    %20 = arith.maximumf %18, %19 : vector<256x128xf32>
    %21 = arith.truncf %20 : vector<256x128xf32> to vector<256x128xbf16>
    %c0_16 = arith.constant 0 : index
    %c0_17 = arith.constant 0 : index
    %22 = vector.load %arg4[%c0_16, %c0_17] : memref<256x128xbf16, #tpu.memory_space<vmem>>, vector<256x128xbf16>
    tpu.vector_store %arg4[%c0_16, %c0_17], %21 {strides = array<i32>} : memref<256x128xbf16, #tpu.memory_space<vmem>>, vector<256x128xbf16>,
    return
  }
  func.func @transform_0(%arg0: i32) -> (i32, i32, i32) {
    %c0_i32 = arith.constant 0 : i32
    %c0_i32_0 = arith.constant 0 : i32
    %c0_i32_1 = arith.constant 0 : i32
    return %c0_i32, %arg0, %c0_i32_0 : i32, i32, i32
  }
  func.func @transform_1(%arg0: i32) -> (i32, i32) {
    %c0_i32 = arith.constant 0 : i32
    %c0_i32_0 = arith.constant 0 : i32
    %c0_i32_1 = arith.constant 0 : i32
    return %c0_i32, %c0_i32_0 : i32, i32
  }
  func.func @transform_2(%arg0: i32) -> (i32, i32) {
    %c0_i32 = arith.constant 0 : i32
    %c0_i32_0 = arith.constant 0 : i32
    %c0_i32_1 = arith.constant 0 : i32
    return %c0_i32, %c0_i32_0 : i32, i32
  }
  func.func @transform_3(%arg0: i32) -> (i32, i32) {
    %c0_i32 = arith.constant 0 : i32
    %c0_i32_0 = arith.constant 0 : i32
    return %arg0, %c0_i32 : i32, i32
  }
}

module attributes {stable_mosaic.version = 11 : i64} {
  func.func @_conv_pool_kernel(%arg0: i32, %arg1: memref<4x64x1152xbf16, #tpu.memory_space<vmem>>, %arg2: memref<1152x128xbf16, #tpu.memory_space<vmem>>, %arg3: memref<1x128xf32, #tpu.memory_space<vmem>>, %arg4: memref<64x128xbf16, #tpu.memory_space<vmem>>) attributes {dimension_semantics = [#tpu.dimension_semantics<parallel>], iteration_bounds = array<i64: 1>, scalar_prefetch = 0 : i64, scratch_operands = 0 : i64, tpu.core_type = #tpu.core_type<tc>, window_params = [{transform_indices = @transform_0, window_bounds = array<i64: 4, 64, 1152>}, {pipeline_mode = #tpu.pipeline_mode<synchronous>, transform_indices = @transform_1, window_bounds = array<i64: 1152, 128>}, {pipeline_mode = #tpu.pipeline_mode<synchronous>, transform_indices = @transform_2, window_bounds = array<i64: 1, 128>}, {transform_indices = @transform_3, window_bounds = array<i64: 64, 128>}]} {
    %c0 = arith.constant 0 : index
    %c0_0 = arith.constant 0 : index
    %0 = vector.load %arg2[%c0, %c0_0] : memref<1152x128xbf16, #tpu.memory_space<vmem>>, vector<1152x128xbf16>
    %c0_1 = arith.constant 0 : index
    %c0_2 = arith.constant 0 : index
    %c0_3 = arith.constant 0 : index
    %1 = vector.load %arg1[%c0_1, %c0_2, %c0_3] : memref<4x64x1152xbf16, #tpu.memory_space<vmem>>, vector<1x64x1152xbf16>
    %2 = vector.shape_cast %1 : vector<1x64x1152xbf16> to vector<64x1152xbf16>
    %cst = arith.constant dense<0.000000e+00> : vector<64x128xf32>
    %3 = tpu.matmul %2, %0, %cst {dimension_numbers = #tpu.dot_dimension_numbers<[1], [0], [0], [1], [0, 0, 1, 1], [], []>} : vector<64x1152xbf16>, vector<1152x128xbf16>, vector<64x128xf32> -> vector<64x128xf32>
    %c1 = arith.constant 1 : index
    %c0_4 = arith.constant 0 : index
    %c0_5 = arith.constant 0 : index
    %4 = vector.load %arg1[%c1, %c0_4, %c0_5] : memref<4x64x1152xbf16, #tpu.memory_space<vmem>>, vector<1x64x1152xbf16>
    %5 = vector.shape_cast %4 : vector<1x64x1152xbf16> to vector<64x1152xbf16>
    %cst_6 = arith.constant dense<0.000000e+00> : vector<64x128xf32>
    %6 = tpu.matmul %5, %0, %cst_6 {dimension_numbers = #tpu.dot_dimension_numbers<[1], [0], [0], [1], [0, 0, 1, 1], [], []>} : vector<64x1152xbf16>, vector<1152x128xbf16>, vector<64x128xf32> -> vector<64x128xf32>
    %7 = arith.maximumf %3, %6 : vector<64x128xf32>
    %c2 = arith.constant 2 : index
    %c0_7 = arith.constant 0 : index
    %c0_8 = arith.constant 0 : index
    %8 = vector.load %arg1[%c2, %c0_7, %c0_8] : memref<4x64x1152xbf16, #tpu.memory_space<vmem>>, vector<1x64x1152xbf16>
    %9 = vector.shape_cast %8 : vector<1x64x1152xbf16> to vector<64x1152xbf16>
    %cst_9 = arith.constant dense<0.000000e+00> : vector<64x128xf32>
    %10 = tpu.matmul %9, %0, %cst_9 {dimension_numbers = #tpu.dot_dimension_numbers<[1], [0], [0], [1], [0, 0, 1, 1], [], []>} : vector<64x1152xbf16>, vector<1152x128xbf16>, vector<64x128xf32> -> vector<64x128xf32>
    %11 = arith.maximumf %7, %10 : vector<64x128xf32>
    %c3 = arith.constant 3 : index
    %c0_10 = arith.constant 0 : index
    %c0_11 = arith.constant 0 : index
    %12 = vector.load %arg1[%c3, %c0_10, %c0_11] : memref<4x64x1152xbf16, #tpu.memory_space<vmem>>, vector<1x64x1152xbf16>
    %13 = vector.shape_cast %12 : vector<1x64x1152xbf16> to vector<64x1152xbf16>
    %cst_12 = arith.constant dense<0.000000e+00> : vector<64x128xf32>
    %14 = tpu.matmul %13, %0, %cst_12 {dimension_numbers = #tpu.dot_dimension_numbers<[1], [0], [0], [1], [0, 0, 1, 1], [], []>} : vector<64x1152xbf16>, vector<1152x128xbf16>, vector<64x128xf32> -> vector<64x128xf32>
    %15 = arith.maximumf %11, %14 : vector<64x128xf32>
    %c0_13 = arith.constant 0 : index
    %c0_14 = arith.constant 0 : index
    %16 = vector.load %arg3[%c0_13, %c0_14] : memref<1x128xf32, #tpu.memory_space<vmem>>, vector<1x128xf32>
    %17 = vector.broadcast %16 : vector<1x128xf32> to vector<64x128xf32>
    %18 = arith.addf %15, %17 : vector<64x128xf32>
    %cst_15 = arith.constant 0.000000e+00 : f32
    %19 = vector.broadcast %cst_15 : f32 to vector<64x128xf32>
    %20 = arith.maximumf %18, %19 : vector<64x128xf32>
    %21 = arith.truncf %20 : vector<64x128xf32> to vector<64x128xbf16>
    %c0_16 = arith.constant 0 : index
    %c0_17 = arith.constant 0 : index
    %22 = vector.load %arg4[%c0_16, %c0_17] : memref<64x128xbf16, #tpu.memory_space<vmem>>, vector<64x128xbf16>
    tpu.vector_store %arg4[%c0_16, %c0_17], %21 {strides = array<i32>} : memref<64x128xbf16, #tpu.memory_space<vmem>>, vector<64x128xbf16>,
    return
  }
  func.func @transform_0(%arg0: i32) -> (i32, i32, i32) {
    %c0_i32 = arith.constant 0 : i32
    %c0_i32_0 = arith.constant 0 : i32
    %c0_i32_1 = arith.constant 0 : i32
    return %c0_i32, %arg0, %c0_i32_0 : i32, i32, i32
  }
  func.func @transform_1(%arg0: i32) -> (i32, i32) {
    %c0_i32 = arith.constant 0 : i32
    %c0_i32_0 = arith.constant 0 : i32
    %c0_i32_1 = arith.constant 0 : i32
    return %c0_i32, %c0_i32_0 : i32, i32
  }
  func.func @transform_2(%arg0: i32) -> (i32, i32) {
    %c0_i32 = arith.constant 0 : i32
    %c0_i32_0 = arith.constant 0 : i32
    %c0_i32_1 = arith.constant 0 : i32
    return %c0_i32, %c0_i32_0 : i32, i32
  }
  func.func @transform_3(%arg0: i32) -> (i32, i32) {
    %c0_i32 = arith.constant 0 : i32
    %c0_i32_0 = arith.constant 0 : i32
    return %arg0, %c0_i32 : i32, i32
  }
}

module attributes {stable_mosaic.version = 11 : i64} {
  func.func @_conv_pool_kernel(%arg0: i32, %arg1: memref<1x64x1152xbf16, #tpu.memory_space<vmem>>, %arg2: memref<1152x128xbf16, #tpu.memory_space<vmem>>, %arg3: memref<1x128xf32, #tpu.memory_space<vmem>>, %arg4: memref<64x128xbf16, #tpu.memory_space<vmem>>) attributes {dimension_semantics = [#tpu.dimension_semantics<parallel>], iteration_bounds = array<i64: 1>, scalar_prefetch = 0 : i64, scratch_operands = 0 : i64, tpu.core_type = #tpu.core_type<tc>, window_params = [{transform_indices = @transform_0, window_bounds = array<i64: 1, 64, 1152>}, {pipeline_mode = #tpu.pipeline_mode<synchronous>, transform_indices = @transform_1, window_bounds = array<i64: 1152, 128>}, {pipeline_mode = #tpu.pipeline_mode<synchronous>, transform_indices = @transform_2, window_bounds = array<i64: 1, 128>}, {transform_indices = @transform_3, window_bounds = array<i64: 64, 128>}]} {
    %c0 = arith.constant 0 : index
    %c0_0 = arith.constant 0 : index
    %0 = vector.load %arg2[%c0, %c0_0] : memref<1152x128xbf16, #tpu.memory_space<vmem>>, vector<1152x128xbf16>
    %c0_1 = arith.constant 0 : index
    %c0_2 = arith.constant 0 : index
    %c0_3 = arith.constant 0 : index
    %1 = vector.load %arg1[%c0_1, %c0_2, %c0_3] : memref<1x64x1152xbf16, #tpu.memory_space<vmem>>, vector<1x64x1152xbf16>
    %2 = vector.shape_cast %1 : vector<1x64x1152xbf16> to vector<64x1152xbf16>
    %cst = arith.constant dense<0.000000e+00> : vector<64x128xf32>
    %3 = tpu.matmul %2, %0, %cst {dimension_numbers = #tpu.dot_dimension_numbers<[1], [0], [0], [1], [0, 0, 1, 1], [], []>} : vector<64x1152xbf16>, vector<1152x128xbf16>, vector<64x128xf32> -> vector<64x128xf32>
    %c0_4 = arith.constant 0 : index
    %c0_5 = arith.constant 0 : index
    %4 = vector.load %arg3[%c0_4, %c0_5] : memref<1x128xf32, #tpu.memory_space<vmem>>, vector<1x128xf32>
    %5 = vector.broadcast %4 : vector<1x128xf32> to vector<64x128xf32>
    %6 = arith.addf %3, %5 : vector<64x128xf32>
    %cst_6 = arith.constant 0.000000e+00 : f32
    %7 = vector.broadcast %cst_6 : f32 to vector<64x128xf32>
    %8 = arith.maximumf %6, %7 : vector<64x128xf32>
    %9 = arith.truncf %8 : vector<64x128xf32> to vector<64x128xbf16>
    %c0_7 = arith.constant 0 : index
    %c0_8 = arith.constant 0 : index
    %10 = vector.load %arg4[%c0_7, %c0_8] : memref<64x128xbf16, #tpu.memory_space<vmem>>, vector<64x128xbf16>
    tpu.vector_store %arg4[%c0_7, %c0_8], %9 {strides = array<i32>} : memref<64x128xbf16, #tpu.memory_space<vmem>>, vector<64x128xbf16>,
    return
  }
  func.func @transform_0(%arg0: i32) -> (i32, i32, i32) {
    %c0_i32 = arith.constant 0 : i32
    %c0_i32_0 = arith.constant 0 : i32
    %c0_i32_1 = arith.constant 0 : i32
    return %c0_i32, %arg0, %c0_i32_0 : i32, i32, i32
  }
  func.func @transform_1(%arg0: i32) -> (i32, i32) {
    %c0_i32 = arith.constant 0 : i32
    %c0_i32_0 = arith.constant 0 : i32
    %c0_i32_1 = arith.constant 0 : i32
    return %c0_i32, %c0_i32_0 : i32, i32
  }
  func.func @transform_2(%arg0: i32) -> (i32, i32) {
    %c0_i32 = arith.constant 0 : i32
    %c0_i32_0 = arith.constant 0 : i32
    %c0_i32_1 = arith.constant 0 : i32
    return %c0_i32, %c0_i32_0 : i32, i32
  }
  func.func @transform_3(%arg0: i32) -> (i32, i32) {
    %c0_i32 = arith.constant 0 : i32
    %c0_i32_0 = arith.constant 0 : i32
    return %arg0, %c0_i32 : i32, i32
  }
}

module attributes {stable_mosaic.version = 11 : i64} {
  func.func @_conv_pool_kernel(%arg0: i32, %arg1: memref<2x32x1152xbf16, #tpu.memory_space<vmem>>, %arg2: memref<1152x128xbf16, #tpu.memory_space<vmem>>, %arg3: memref<1x128xf32, #tpu.memory_space<vmem>>, %arg4: memref<32x128xbf16, #tpu.memory_space<vmem>>) attributes {dimension_semantics = [#tpu.dimension_semantics<parallel>], iteration_bounds = array<i64: 1>, scalar_prefetch = 0 : i64, scratch_operands = 0 : i64, tpu.core_type = #tpu.core_type<tc>, window_params = [{transform_indices = @transform_0, window_bounds = array<i64: 2, 32, 1152>}, {pipeline_mode = #tpu.pipeline_mode<synchronous>, transform_indices = @transform_1, window_bounds = array<i64: 1152, 128>}, {pipeline_mode = #tpu.pipeline_mode<synchronous>, transform_indices = @transform_2, window_bounds = array<i64: 1, 128>}, {transform_indices = @transform_3, window_bounds = array<i64: 32, 128>}]} {
    %c0 = arith.constant 0 : index
    %c0_0 = arith.constant 0 : index
    %0 = vector.load %arg2[%c0, %c0_0] : memref<1152x128xbf16, #tpu.memory_space<vmem>>, vector<1152x128xbf16>
    %c0_1 = arith.constant 0 : index
    %c0_2 = arith.constant 0 : index
    %c0_3 = arith.constant 0 : index
    %1 = vector.load %arg1[%c0_1, %c0_2, %c0_3] : memref<2x32x1152xbf16, #tpu.memory_space<vmem>>, vector<1x32x1152xbf16>
    %2 = vector.shape_cast %1 : vector<1x32x1152xbf16> to vector<32x1152xbf16>
    %cst = arith.constant dense<0.000000e+00> : vector<32x128xf32>
    %3 = tpu.matmul %2, %0, %cst {dimension_numbers = #tpu.dot_dimension_numbers<[1], [0], [0], [1], [0, 0, 1, 1], [], []>} : vector<32x1152xbf16>, vector<1152x128xbf16>, vector<32x128xf32> -> vector<32x128xf32>
    %c1 = arith.constant 1 : index
    %c0_4 = arith.constant 0 : index
    %c0_5 = arith.constant 0 : index
    %4 = vector.load %arg1[%c1, %c0_4, %c0_5] : memref<2x32x1152xbf16, #tpu.memory_space<vmem>>, vector<1x32x1152xbf16>
    %5 = vector.shape_cast %4 : vector<1x32x1152xbf16> to vector<32x1152xbf16>
    %cst_6 = arith.constant dense<0.000000e+00> : vector<32x128xf32>
    %6 = tpu.matmul %5, %0, %cst_6 {dimension_numbers = #tpu.dot_dimension_numbers<[1], [0], [0], [1], [0, 0, 1, 1], [], []>} : vector<32x1152xbf16>, vector<1152x128xbf16>, vector<32x128xf32> -> vector<32x128xf32>
    %7 = arith.maximumf %3, %6 : vector<32x128xf32>
    %c0_7 = arith.constant 0 : index
    %c0_8 = arith.constant 0 : index
    %8 = vector.load %arg3[%c0_7, %c0_8] : memref<1x128xf32, #tpu.memory_space<vmem>>, vector<1x128xf32>
    %9 = vector.broadcast %8 : vector<1x128xf32> to vector<32x128xf32>
    %10 = arith.addf %7, %9 : vector<32x128xf32>
    %cst_9 = arith.constant 0.000000e+00 : f32
    %11 = vector.broadcast %cst_9 : f32 to vector<32x128xf32>
    %12 = arith.maximumf %10, %11 : vector<32x128xf32>
    %13 = arith.truncf %12 : vector<32x128xf32> to vector<32x128xbf16>
    %c0_10 = arith.constant 0 : index
    %c0_11 = arith.constant 0 : index
    %14 = vector.load %arg4[%c0_10, %c0_11] : memref<32x128xbf16, #tpu.memory_space<vmem>>, vector<32x128xbf16>
    tpu.vector_store %arg4[%c0_10, %c0_11], %13 {strides = array<i32>} : memref<32x128xbf16, #tpu.memory_space<vmem>>, vector<32x128xbf16>,
    return
  }
  func.func @transform_0(%arg0: i32) -> (i32, i32, i32) {
    %c0_i32 = arith.constant 0 : i32
    %c0_i32_0 = arith.constant 0 : i32
    %c0_i32_1 = arith.constant 0 : i32
    return %c0_i32, %arg0, %c0_i32_0 : i32, i32, i32
  }
  func.func @transform_1(%arg0: i32) -> (i32, i32) {
    %c0_i32 = arith.constant 0 : i32
    %c0_i32_0 = arith.constant 0 : i32
    %c0_i32_1 = arith.constant 0 : i32
    return %c0_i32, %c0_i32_0 : i32, i32
  }
  func.func @transform_2(%arg0: i32) -> (i32, i32) {
    %c0_i32 = arith.constant 0 : i32
    %c0_i32_0 = arith.constant 0 : i32
    %c0_i32_1 = arith.constant 0 : i32
    return %c0_i32, %c0_i32_0 : i32, i32
  }
  func.func @transform_3(%arg0: i32) -> (i32, i32) {
    %c0_i32 = arith.constant 0 : i32
    %c0_i32_0 = arith.constant 0 : i32
    return %arg0, %c0_i32 : i32, i32
  }
}

module attributes {stable_mosaic.version = 11 : i64} {
  func.func @_conv_stats_kernel(%arg0: i32, %arg1: memref<32x1152xbf16, #tpu.memory_space<vmem>>, %arg2: memref<1152x128xbf16, #tpu.memory_space<vmem>>, %arg3: memref<32x128xbf16, #tpu.memory_space<vmem>>, %arg4: memref<1x2x128xf32, #tpu.memory_space<vmem>>) attributes {dimension_semantics = [#tpu.dimension_semantics<parallel>], iteration_bounds = array<i64: 1>, scalar_prefetch = 0 : i64, scratch_operands = 0 : i64, tpu.core_type = #tpu.core_type<tc>, window_params = [{transform_indices = @transform_0, window_bounds = array<i64: 32, 1152>}, {pipeline_mode = #tpu.pipeline_mode<synchronous>, transform_indices = @transform_1, window_bounds = array<i64: 1152, 128>}, {transform_indices = @transform_2, window_bounds = array<i64: 32, 128>}, {transform_indices = @transform_3, window_bounds = array<i64: 1, 2, 128>}]} {
    %c0 = arith.constant 0 : index
    %c0_0 = arith.constant 0 : index
    %0 = vector.load %arg1[%c0, %c0_0] : memref<32x1152xbf16, #tpu.memory_space<vmem>>, vector<32x1152xbf16>
    %c0_1 = arith.constant 0 : index
    %c0_2 = arith.constant 0 : index
    %1 = vector.load %arg2[%c0_1, %c0_2] : memref<1152x128xbf16, #tpu.memory_space<vmem>>, vector<1152x128xbf16>
    %cst = arith.constant dense<0.000000e+00> : vector<32x128xf32>
    %2 = tpu.matmul %0, %1, %cst {dimension_numbers = #tpu.dot_dimension_numbers<[1], [0], [0], [1], [0, 0, 1, 1], [], []>} : vector<32x1152xbf16>, vector<1152x128xbf16>, vector<32x128xf32> -> vector<32x128xf32>
    %3 = arith.truncf %2 : vector<32x128xf32> to vector<32x128xbf16>
    %c0_3 = arith.constant 0 : index
    %c0_4 = arith.constant 0 : index
    %4 = vector.load %arg3[%c0_3, %c0_4] : memref<32x128xbf16, #tpu.memory_space<vmem>>, vector<32x128xbf16>
    tpu.vector_store %arg3[%c0_3, %c0_4], %3 {strides = array<i32>} : memref<32x128xbf16, #tpu.memory_space<vmem>>, vector<32x128xbf16>,
    %cst_5 = arith.constant dense<0.000000e+00> : vector<128xf32>
    %5 = vector.multi_reduction <add>, %2, %cst_5 [0] : vector<32x128xf32> to vector<128xf32>
    %6 = vector.shape_cast %5 : vector<128xf32> to vector<1x128xf32>
    %7 = arith.mulf %2, %2 : vector<32x128xf32>
    %cst_6 = arith.constant dense<0.000000e+00> : vector<128xf32>
    %8 = vector.multi_reduction <add>, %7, %cst_6 [0] : vector<32x128xf32> to vector<128xf32>
    %9 = vector.shape_cast %8 : vector<128xf32> to vector<1x128xf32>
    %10 = tpu.concatenate %6, %9 in 0 : vector<1x128xf32>, vector<1x128xf32> -> vector<2x128xf32>
    %11 = vector.shape_cast %10 : vector<2x128xf32> to vector<1x2x128xf32>
    %c0_7 = arith.constant 0 : index
    %c0_8 = arith.constant 0 : index
    %c0_9 = arith.constant 0 : index
    %12 = vector.load %arg4[%c0_7, %c0_8, %c0_9] : memref<1x2x128xf32, #tpu.memory_space<vmem>>, vector<1x2x128xf32>
    tpu.vector_store %arg4[%c0_7, %c0_8, %c0_9], %11 {strides = array<i32>} : memref<1x2x128xf32, #tpu.memory_space<vmem>>, vector<1x2x128xf32>,
    return
  }
  func.func @transform_0(%arg0: i32) -> (i32, i32) {
    %c0_i32 = arith.constant 0 : i32
    %c0_i32_0 = arith.constant 0 : i32
    return %arg0, %c0_i32 : i32, i32
  }
  func.func @transform_1(%arg0: i32) -> (i32, i32) {
    %c0_i32 = arith.constant 0 : i32
    %c0_i32_0 = arith.constant 0 : i32
    %c0_i32_1 = arith.constant 0 : i32
    return %c0_i32, %c0_i32_0 : i32, i32
  }
  func.func @transform_2(%arg0: i32) -> (i32, i32) {
    %c0_i32 = arith.constant 0 : i32
    %c0_i32_0 = arith.constant 0 : i32
    return %arg0, %c0_i32 : i32, i32
  }
  func.func @transform_3(%arg0: i32) -> (i32, i32, i32) {
    %c0_i32 = arith.constant 0 : i32
    %c0_i32_0 = arith.constant 0 : i32
    %c0_i32_1 = arith.constant 0 : i32
    return %arg0, %c0_i32, %c0_i32_0 : i32, i32, i32
  }
}

module attributes {stable_mosaic.version = 11 : i64} {
  func.func @_bn_pool_kernel(%arg0: i32, %arg1: memref<1x32x128xbf16, #tpu.memory_space<vmem>>, %arg2: memref<1x128xf32, #tpu.memory_space<vmem>>, %arg3: memref<1x128xf32, #tpu.memory_space<vmem>>, %arg4: memref<32x128xbf16, #tpu.memory_space<vmem>>) attributes {dimension_semantics = [#tpu.dimension_semantics<parallel>], iteration_bounds = array<i64: 1>, scalar_prefetch = 0 : i64, scratch_operands = 0 : i64, tpu.core_type = #tpu.core_type<tc>, window_params = [{transform_indices = @transform_0, window_bounds = array<i64: 1, 32, 128>}, {pipeline_mode = #tpu.pipeline_mode<synchronous>, transform_indices = @transform_1, window_bounds = array<i64: 1, 128>}, {pipeline_mode = #tpu.pipeline_mode<synchronous>, transform_indices = @transform_2, window_bounds = array<i64: 1, 128>}, {transform_indices = @transform_3, window_bounds = array<i64: 32, 128>}]} {
    %c0 = arith.constant 0 : index
    %c0_0 = arith.constant 0 : index
    %0 = vector.load %arg2[%c0, %c0_0] : memref<1x128xf32, #tpu.memory_space<vmem>>, vector<1x128xf32>
    %c0_1 = arith.constant 0 : index
    %c0_2 = arith.constant 0 : index
    %1 = vector.load %arg3[%c0_1, %c0_2] : memref<1x128xf32, #tpu.memory_space<vmem>>, vector<1x128xf32>
    %c0_3 = arith.constant 0 : index
    %c0_4 = arith.constant 0 : index
    %c0_5 = arith.constant 0 : index
    %2 = vector.load %arg1[%c0_3, %c0_4, %c0_5] : memref<1x32x128xbf16, #tpu.memory_space<vmem>>, vector<1x32x128xbf16>
    %3 = vector.shape_cast %2 : vector<1x32x128xbf16> to vector<32x128xbf16>
    %4 = arith.extf %3 : vector<32x128xbf16> to vector<32x128xf32>
    %5 = vector.broadcast %0 : vector<1x128xf32> to vector<32x128xf32>
    %6 = arith.mulf %4, %5 : vector<32x128xf32>
    %7 = vector.broadcast %1 : vector<1x128xf32> to vector<32x128xf32>
    %8 = arith.addf %6, %7 : vector<32x128xf32>
    %cst = arith.constant 0.000000e+00 : f32
    %9 = vector.broadcast %cst : f32 to vector<32x128xf32>
    %10 = arith.maximumf %8, %9 : vector<32x128xf32>
    %11 = arith.truncf %10 : vector<32x128xf32> to vector<32x128xbf16>
    %c0_6 = arith.constant 0 : index
    %c0_7 = arith.constant 0 : index
    %12 = vector.load %arg4[%c0_6, %c0_7] : memref<32x128xbf16, #tpu.memory_space<vmem>>, vector<32x128xbf16>
    tpu.vector_store %arg4[%c0_6, %c0_7], %11 {strides = array<i32>} : memref<32x128xbf16, #tpu.memory_space<vmem>>, vector<32x128xbf16>,
    return
  }
  func.func @transform_0(%arg0: i32) -> (i32, i32, i32) {
    %c0_i32 = arith.constant 0 : i32
    %c0_i32_0 = arith.constant 0 : i32
    %c0_i32_1 = arith.constant 0 : i32
    return %c0_i32, %arg0, %c0_i32_0 : i32, i32, i32
  }
  func.func @transform_1(%arg0: i32) -> (i32, i32) {
    %c0_i32 = arith.constant 0 : i32
    %c0_i32_0 = arith.constant 0 : i32
    %c0_i32_1 = arith.constant 0 : i32
    return %c0_i32, %c0_i32_0 : i32, i32
  }
  func.func @transform_2(%arg0: i32) -> (i32, i32) {
    %c0_i32 = arith.constant 0 : i32
    %c0_i32_0 = arith.constant 0 : i32
    %c0_i32_1 = arith.constant 0 : i32
    return %c0_i32, %c0_i32_0 : i32, i32
  }
  func.func @transform_3(%arg0: i32) -> (i32, i32) {
    %c0_i32 = arith.constant 0 : i32
    %c0_i32_0 = arith.constant 0 : i32
    return %arg0, %c0_i32 : i32, i32
  }
}

module attributes {stable_mosaic.version = 11 : i64} {
  func.func @_bn_pool_kernel(%arg0: i32, %arg1: memref<2x16x128xbf16, #tpu.memory_space<vmem>>, %arg2: memref<1x128xf32, #tpu.memory_space<vmem>>, %arg3: memref<1x128xf32, #tpu.memory_space<vmem>>, %arg4: memref<16x128xbf16, #tpu.memory_space<vmem>>) attributes {dimension_semantics = [#tpu.dimension_semantics<parallel>], iteration_bounds = array<i64: 1>, scalar_prefetch = 0 : i64, scratch_operands = 0 : i64, tpu.core_type = #tpu.core_type<tc>, window_params = [{transform_indices = @transform_0, window_bounds = array<i64: 2, 16, 128>}, {pipeline_mode = #tpu.pipeline_mode<synchronous>, transform_indices = @transform_1, window_bounds = array<i64: 1, 128>}, {pipeline_mode = #tpu.pipeline_mode<synchronous>, transform_indices = @transform_2, window_bounds = array<i64: 1, 128>}, {transform_indices = @transform_3, window_bounds = array<i64: 16, 128>}]} {
    %c0 = arith.constant 0 : index
    %c0_0 = arith.constant 0 : index
    %0 = vector.load %arg2[%c0, %c0_0] : memref<1x128xf32, #tpu.memory_space<vmem>>, vector<1x128xf32>
    %c0_1 = arith.constant 0 : index
    %c0_2 = arith.constant 0 : index
    %1 = vector.load %arg3[%c0_1, %c0_2] : memref<1x128xf32, #tpu.memory_space<vmem>>, vector<1x128xf32>
    %c0_3 = arith.constant 0 : index
    %c0_4 = arith.constant 0 : index
    %c0_5 = arith.constant 0 : index
    %2 = vector.load %arg1[%c0_3, %c0_4, %c0_5] : memref<2x16x128xbf16, #tpu.memory_space<vmem>>, vector<1x16x128xbf16>
    %3 = vector.shape_cast %2 : vector<1x16x128xbf16> to vector<16x128xbf16>
    %4 = arith.extf %3 : vector<16x128xbf16> to vector<16x128xf32>
    %5 = vector.broadcast %0 : vector<1x128xf32> to vector<16x128xf32>
    %6 = arith.mulf %4, %5 : vector<16x128xf32>
    %7 = vector.broadcast %1 : vector<1x128xf32> to vector<16x128xf32>
    %8 = arith.addf %6, %7 : vector<16x128xf32>
    %c1 = arith.constant 1 : index
    %c0_6 = arith.constant 0 : index
    %c0_7 = arith.constant 0 : index
    %9 = vector.load %arg1[%c1, %c0_6, %c0_7] : memref<2x16x128xbf16, #tpu.memory_space<vmem>>, vector<1x16x128xbf16>
    %10 = vector.shape_cast %9 : vector<1x16x128xbf16> to vector<16x128xbf16>
    %11 = arith.extf %10 : vector<16x128xbf16> to vector<16x128xf32>
    %12 = vector.broadcast %0 : vector<1x128xf32> to vector<16x128xf32>
    %13 = arith.mulf %11, %12 : vector<16x128xf32>
    %14 = vector.broadcast %1 : vector<1x128xf32> to vector<16x128xf32>
    %15 = arith.addf %13, %14 : vector<16x128xf32>
    %16 = arith.maximumf %8, %15 : vector<16x128xf32>
    %cst = arith.constant 0.000000e+00 : f32
    %17 = vector.broadcast %cst : f32 to vector<16x128xf32>
    %18 = arith.maximumf %16, %17 : vector<16x128xf32>
    %19 = arith.truncf %18 : vector<16x128xf32> to vector<16x128xbf16>
    %c0_8 = arith.constant 0 : index
    %c0_9 = arith.constant 0 : index
    %20 = vector.load %arg4[%c0_8, %c0_9] : memref<16x128xbf16, #tpu.memory_space<vmem>>, vector<16x128xbf16>
    tpu.vector_store %arg4[%c0_8, %c0_9], %19 {strides = array<i32>} : memref<16x128xbf16, #tpu.memory_space<vmem>>, vector<16x128xbf16>,
    return
  }
  func.func @transform_0(%arg0: i32) -> (i32, i32, i32) {
    %c0_i32 = arith.constant 0 : i32
    %c0_i32_0 = arith.constant 0 : i32
    %c0_i32_1 = arith.constant 0 : i32
    return %c0_i32, %arg0, %c0_i32_0 : i32, i32, i32
  }
  func.func @transform_1(%arg0: i32) -> (i32, i32) {
    %c0_i32 = arith.constant 0 : i32
    %c0_i32_0 = arith.constant 0 : i32
    %c0_i32_1 = arith.constant 0 : i32
    return %c0_i32, %c0_i32_0 : i32, i32
  }
  func.func @transform_2(%arg0: i32) -> (i32, i32) {
    %c0_i32 = arith.constant 0 : i32
    %c0_i32_0 = arith.constant 0 : i32
    %c0_i32_1 = arith.constant 0 : i32
    return %c0_i32, %c0_i32_0 : i32, i32
  }
  func.func @transform_3(%arg0: i32) -> (i32, i32) {
    %c0_i32 = arith.constant 0 : i32
    %c0_i32_0 = arith.constant 0 : i32
    return %arg0, %c0_i32 : i32, i32
  }
}

module attributes {stable_mosaic.version = 11 : i64} {
  func.func @_conv_pool_kernel(%arg0: i32, %arg1: memref<1x16x512xbf16, #tpu.memory_space<vmem>>, %arg2: memref<512x128xbf16, #tpu.memory_space<vmem>>, %arg3: memref<1x128xf32, #tpu.memory_space<vmem>>, %arg4: memref<16x128xbf16, #tpu.memory_space<vmem>>) attributes {dimension_semantics = [#tpu.dimension_semantics<parallel>], iteration_bounds = array<i64: 1>, scalar_prefetch = 0 : i64, scratch_operands = 0 : i64, tpu.core_type = #tpu.core_type<tc>, window_params = [{transform_indices = @transform_0, window_bounds = array<i64: 1, 16, 512>}, {pipeline_mode = #tpu.pipeline_mode<synchronous>, transform_indices = @transform_1, window_bounds = array<i64: 512, 128>}, {pipeline_mode = #tpu.pipeline_mode<synchronous>, transform_indices = @transform_2, window_bounds = array<i64: 1, 128>}, {transform_indices = @transform_3, window_bounds = array<i64: 16, 128>}]} {
    %c0 = arith.constant 0 : index
    %c0_0 = arith.constant 0 : index
    %0 = vector.load %arg2[%c0, %c0_0] : memref<512x128xbf16, #tpu.memory_space<vmem>>, vector<512x128xbf16>
    %c0_1 = arith.constant 0 : index
    %c0_2 = arith.constant 0 : index
    %c0_3 = arith.constant 0 : index
    %1 = vector.load %arg1[%c0_1, %c0_2, %c0_3] : memref<1x16x512xbf16, #tpu.memory_space<vmem>>, vector<1x16x512xbf16>
    %2 = vector.shape_cast %1 : vector<1x16x512xbf16> to vector<16x512xbf16>
    %cst = arith.constant dense<0.000000e+00> : vector<16x128xf32>
    %3 = tpu.matmul %2, %0, %cst {dimension_numbers = #tpu.dot_dimension_numbers<[1], [0], [0], [1], [0, 0, 1, 1], [], []>} : vector<16x512xbf16>, vector<512x128xbf16>, vector<16x128xf32> -> vector<16x128xf32>
    %c0_4 = arith.constant 0 : index
    %c0_5 = arith.constant 0 : index
    %4 = vector.load %arg3[%c0_4, %c0_5] : memref<1x128xf32, #tpu.memory_space<vmem>>, vector<1x128xf32>
    %5 = vector.broadcast %4 : vector<1x128xf32> to vector<16x128xf32>
    %6 = arith.addf %3, %5 : vector<16x128xf32>
    %cst_6 = arith.constant 0.000000e+00 : f32
    %7 = vector.broadcast %cst_6 : f32 to vector<16x128xf32>
    %8 = arith.maximumf %6, %7 : vector<16x128xf32>
    %9 = arith.truncf %8 : vector<16x128xf32> to vector<16x128xbf16>
    %c0_7 = arith.constant 0 : index
    %c0_8 = arith.constant 0 : index
    %10 = vector.load %arg4[%c0_7, %c0_8] : memref<16x128xbf16, #tpu.memory_space<vmem>>, vector<16x128xbf16>
    tpu.vector_store %arg4[%c0_7, %c0_8], %9 {strides = array<i32>} : memref<16x128xbf16, #tpu.memory_space<vmem>>, vector<16x128xbf16>,
    return
  }
  func.func @transform_0(%arg0: i32) -> (i32, i32, i32) {
    %c0_i32 = arith.constant 0 : i32
    %c0_i32_0 = arith.constant 0 : i32
    %c0_i32_1 = arith.constant 0 : i32
    return %c0_i32, %arg0, %c0_i32_0 : i32, i32, i32
  }
  func.func @transform_1(%arg0: i32) -> (i32, i32) {
    %c0_i32 = arith.constant 0 : i32
    %c0_i32_0 = arith.constant 0 : i32
    %c0_i32_1 = arith.constant 0 : i32
    return %c0_i32, %c0_i32_0 : i32, i32
  }
  func.func @transform_2(%arg0: i32) -> (i32, i32) {
    %c0_i32 = arith.constant 0 : i32
    %c0_i32_0 = arith.constant 0 : i32
    %c0_i32_1 = arith.constant 0 : i32
    return %c0_i32, %c0_i32_0 : i32, i32
  }
  func.func @transform_3(%arg0: i32) -> (i32, i32) {
    %c0_i32 = arith.constant 0 : i32
    %c0_i32_0 = arith.constant 0 : i32
    return %arg0, %c0_i32 : i32, i32
  }
}

</mosaic_0001>

<bundles_post_ra>
// kernel: vgg_feature_extractor.9
= control target key start
LH: loop header
LB: loop body
LE: loop exit
PB: predicated region body
PF: predicated region fallthrough
CT: control target
= control target key end

     0   :  { %s2926_s1 = inlined_call_operand.vmem [shape: bf16[128,128], index: 1, kind: input, shape index: {}]   ;;  %s2927_s0 = inlined_call_operand.vmem [shape: bf16[4,256,128], index: 0, kind: input, shape index: {}]   ;;  %s2928_s2 = inlined_call_operand.vmem [shape: f32[1,128], index: 2, kind: input, shape index: {}]   ;;  %s2929_s3 = inlined_call_operand.vmem [shape: bf16[256,128], index: 3, kind: output, shape index: {}]  }
   0x1   :  { %v2185_v0 = vld [vmem:[%s2926_s1] sm:$0xff]   ;;  %v2186_v1 = vld [vmem:[%s2926_s1 + $0x8] sm:$0xff]   ;;  %v2286_v2 = vld [vmem:[%s2926_s1 + $0x10] sm:$0xff]  }
   0x2   :  { %1993 = vmatprep.subr.bf16.mxu0 %v2185_v0  ;;  %2041 = vmatprep.subr.bf16.mxu1 %v2185_v0  ;;  %v2291_v3 = vld [vmem:[%s2926_s1 + $0x18] sm:$0xff]   ;;  %v2193_v4 = vld [vmem:[%s2927_s0] sm:$0xff]   ;;  %v2317_v7 = vld [vmem:[%s2926_s1 + $0x28] sm:$0xff]  }
   0x3   :  { %1994 = vmatpush3.bf16.msra.mxu0 %v2185_v0  ;;  %2042 = vmatpush3.bf16.msra.mxu1 %v2185_v0  ;;  %v2194_v5 = vld [vmem:[%s2927_s0 + $0x80] sm:$0xff]   ;;  %v2326_v8 = vld [vmem:[%s2926_s1 + $0x30] sm:$0xff]   ;;  %v2335_v9 = vld [vmem:[%s2926_s1 + $0x38] sm:$0xff]  }
   0x4   :  { %1995 = vmatprep.subr.bf16.mxu0 %v2186_v1  ;;  %2043 = vmatprep.subr.bf16.mxu1 %v2186_v1  ;;  %v2308_v6 = vld [vmem:[%s2926_s1 + $0x20] sm:$0xff]   ;;  %v2195_v10 = vld [vmem:[%s2927_s0 + $0x8] sm:$0xff]   ;;  %v2197_v12 = vld [vmem:[%s2927_s0 + $0x10] sm:$0xff]  }
   0x5   :  { %2009 = vmatprep.mubr.bf16.mxu0 %v2193_v4  ;;  %2057 = vmatprep.mubr.bf16.mxu1 %v2194_v5  ;;  %v2196_v11 = vld [vmem:[%s2927_s0 + $0x88] sm:$0xff]   ;;  %v2198_v13 = vld [vmem:[%s2927_s0 + $0x90] sm:$0xff]   ;;  %v2199_v14 = vld [vmem:[%s2927_s0 + $0x18] sm:$0xff]  }
   0x6   :  { %v2200_v15 = vld [vmem:[%s2927_s0 + $0x98] sm:$0xff]   ;;  %v2201_v16 = vld [vmem:[%s2927_s0 + $0x20] sm:$0xff]   ;;  %v2203_v18 = vld [vmem:[%s2927_s0 + $0x28] sm:$0xff]  }
   0x7   :  { %1996 = vmatpush3.bf16.msra.mxu0 %v2186_v1  ;;  %2044 = vmatpush3.bf16.msra.mxu1 %v2186_v1  ;;  %v2202_v17 = vld [vmem:[%s2927_s0 + $0xa0] sm:$0xff]   ;;  %v2204_v19 = vld [vmem:[%s2927_s0 + $0xa8] sm:$0xff]   ;;  %v2205_v20 = vld [vmem:[%s2927_s0 + $0x30] sm:$0xff]  }
   0x8   :  { %1997 = vmatprep.subr.bf16.mxu0 %v2286_v2  ;;  %2045 = vmatprep.subr.bf16.mxu1 %v2286_v2  ;;  %v2206_v21 = vld [vmem:[%s2927_s0 + $0xb0] sm:$0xff]   ;;  %v2207_v22 = vld [vmem:[%s2927_s0 + $0x38] sm:$0xff]   ;;  %v2209_v24 = vld [vmem:[%s2927_s0 + $0x40] sm:$0xff]  }
   0x9   :  { %v2208_v23 = vld [vmem:[%s2927_s0 + $0xb8] sm:$0xff]   ;;  %v2210_v25 = vld [vmem:[%s2927_s0 + $0xc0] sm:$0xff]   ;;  %v2211_v26 = vld [vmem:[%s2927_s0 + $0x48] sm:$0xff]  }
   0xa   :  { %v2212_v27 = vld [vmem:[%s2927_s0 + $0xc8] sm:$0xff]   ;;  %v2213_v28 = vld [vmem:[%s2927_s0 + $0x50] sm:$0xff]   ;;  %v2215_v30 = vld [vmem:[%s2927_s0 + $0x58] sm:$0xff]  }
   0xb   :  { %1998 = vmatpush3.bf16.msra.mxu0 %v2286_v2  ;;  %2046 = vmatpush3.bf16.msra.mxu1 %v2286_v2  ;;  %v2214_v29 = vld [vmem:[%s2927_s0 + $0xd0] sm:$0xff]   ;;  %v2216_v31 = vld [vmem:[%s2927_s0 + $0xd8] sm:$0xff]   ;;  %v2217_v32 = vld [vmem:[%s2927_s0 + $0x60] sm:$0xff]  }
   0xc   :  { %1999 = vmatprep.subr.bf16.mxu0 %v2291_v3  ;;  %2047 = vmatprep.subr.bf16.mxu1 %v2291_v3  ;;  %v2218_v33 = vld [vmem:[%s2927_s0 + $0xe0] sm:$0xff]   ;;  %v2219_v34 = vld [vmem:[%s2927_s0 + $0x68] sm:$0xff]   ;;  %v2221_v36 = vld [vmem:[%s2927_s0 + $0x70] sm:$0xff]  }
   0xd   :  { %v2220_v35 = vld [vmem:[%s2927_s0 + $0xe8] sm:$0xff]   ;;  %v2222_v37 = vld [vmem:[%s2927_s0 + $0xf0] sm:$0xff]   ;;  %v2223_v38 = vld [vmem:[%s2927_s0 + $0x78] sm:$0xff]  }
   0xe   :  { %v2224_v39 = vld [vmem:[%s2927_s0 + $0xf8] sm:$0xff]   ;;  %v2225_v40 = vld [vmem:[%s2927_s0 + $0x100] sm:$0xff]   ;;  %v2227_v42 = vld [vmem:[%s2927_s0 + $0x108] sm:$0xff]  }
   0xf   :  { %2000 = vmatpush3.bf16.msra.mxu0 %v2291_v3  ;;  %2048 = vmatpush3.bf16.msra.mxu1 %v2291_v3  ;;  %v2226_v41 = vld [vmem:[%s2927_s0 + $0x180] sm:$0xff]   ;;  %v2228_v43 = vld [vmem:[%s2927_s0 + $0x188] sm:$0xff]   ;;  %v2229_v44 = vld [vmem:[%s2927_s0 + $0x110] sm:$0xff]  }
  0x10   :  { %2001 = vmatprep.subr.bf16.mxu0 %v2308_v6  ;;  %2049 = vmatprep.subr.bf16.mxu1 %v2308_v6  ;;  %v2230_v45 = vld [vmem:[%s2927_s0 + $0x190] sm:$0xff]   ;;  %v2231_v46 = vld [vmem:[%s2927_s0 + $0x118] sm:$0xff]   ;;  %v2233_v48 = vld [vmem:[%s2927_s0 + $0x120] sm:$0xff]  }
  0x11   :  { %v2232_v47 = vld [vmem:[%s2927_s0 + $0x198] sm:$0xff]   ;;  %v2234_v49 = vld [vmem:[%s2927_s0 + $0x1a0] sm:$0xff]   ;;  %v2235_v50 = vld [vmem:[%s2927_s0 + $0x128] sm:$0xff]  }
  0x12   :  { %v2236_v51 = vld [vmem:[%s2927_s0 + $0x1a8] sm:$0xff]   ;;  %v2237_v52 = vld [vmem:[%s2927_s0 + $0x130] sm:$0xff]   ;;  %v2239_v54 = vld [vmem:[%s2927_s0 + $0x138] sm:$0xff]  }
  0x13   :  { %2002 = vmatpush3.bf16.msra.mxu0 %v2308_v6  ;;  %2050 = vmatpush3.bf16.msra.mxu1 %v2308_v6  ;;  %v2238_v53 = vld [vmem:[%s2927_s0 + $0x1b0] sm:$0xff]   ;;  %v2240_v55 = vld [vmem:[%s2927_s0 + $0x1b8] sm:$0xff]   ;;  %v2241_v56 = vld [vmem:[%s2927_s0 + $0x140] sm:$0xff]  }
  0x14   :  { %2003 = vmatprep.subr.bf16.mxu0 %v2317_v7  ;;  %2051 = vmatprep.subr.bf16.mxu1 %v2317_v7  ;;  %v2242_v57 = vld [vmem:[%s2927_s0 + $0x1c0] sm:$0xff]   ;;  %v2243_v58 = vld [vmem:[%s2927_s0 + $0x148] sm:$0xff]   ;;  %v2245_v60 = vld [vmem:[%s2927_s0 + $0x150] sm:$0xff]  }
  0x15   :  { %v2244_v59 = vld [vmem:[%s2927_s0 + $0x1c8] sm:$0xff]   ;;  %v2246_v61 = vld [vmem:[%s2927_s0 + $0x1d0] sm:$0xff]   ;;  %v2247_v62 = vld [vmem:[%s2927_s0 + $0x158] sm:$0xff]  }
  0x16   :  { %v2248_v63 = vld [vmem:[%s2927_s0 + $0x1d8] sm:$0xff]   ;;  %v2253_v4 = vld [vmem:[%s2927_s0 + $0x170] sm:$0xff]  }
  0x17   :  { %2004 = vmatpush3.bf16.msra.mxu0 %v2317_v7  ;;  %2052 = vmatpush3.bf16.msra.mxu1 %v2317_v7  ;;  %v2254_v5 = vld [vmem:[%s2927_s0 + $0x1f0] sm:$0xff]  }
  0x18   :  { %2005 = vmatprep.subr.bf16.mxu0 %v2326_v8  ;;  %2053 = vmatprep.subr.bf16.mxu1 %v2326_v8 }
  0x1b   :  { %2006 = vmatpush3.bf16.msra.mxu0 %v2326_v8  ;;  %2054 = vmatpush3.bf16.msra.mxu1 %v2326_v8 }
  0x1c   :  { %2007 = vmatprep.subr.bf16.mxu0 %v2335_v9  ;;  %2055 = vmatprep.subr.bf16.mxu1 %v2335_v9 }
  0x1f   :  { %2008 = vmatpush3.bf16.msra.mxu0 %v2335_v9  ;;  %2056 = vmatpush3.bf16.msra.mxu1 %v2335_v9 }
  0x20   :  { %2089 = vmatprep.subr.bf16.mxu0 %v2185_v0  ;;  %2137 = vmatprep.subr.bf16.mxu1 %v2185_v0 }
  0x22   :  { %2010 = vmatmul.mubr.bf16.vlgmr.msra.gmra.mrb[0].mxu0 %v2195_v10  ;;  %2058 = vmatmul.mubr.bf16.vlgmr.msra.gmra.mrb[0].mxu1 %v2196_v11 }
  0x23   :  { %2090 = vmatpush3.bf16.msra.mxu0 %v2185_v0  ;;  %2138 = vmatpush3.bf16.msra.mxu1 %v2185_v0  ;;  %v2249_v0 = vld [vmem:[%s2927_s0 + $0x160] sm:$0xff]  }
  0x24   :  { %2013 = vmatprep.mubr.bf16.mxu0 %v2197_v12  ;;  %2061 = vmatprep.mubr.bf16.mxu1 %v2198_v13 }
  0x25   :  { %2091 = vmatprep.subr.bf16.mxu0 %v2186_v1  ;;  %2139 = vmatprep.subr.bf16.mxu1 %v2186_v1 }
  0x27   :  { %2092 = vmatpush3.bf16.msra.mxu0 %v2186_v1  ;;  %2140 = vmatpush3.bf16.msra.mxu1 %v2186_v1  ;;  %v2250_v1 = vld [vmem:[%s2927_s0 + $0x1e0] sm:$0xff]  }
  0x28   :  { %2093 = vmatprep.subr.bf16.mxu0 %v2286_v2  ;;  %2141 = vmatprep.subr.bf16.mxu1 %v2286_v2 }
  0x2a   :  { %2014 = vmatmul.mubr.bf16.gmra.mrb[4].mxu0 %v2199_v14  ;;  %2062 = vmatmul.mubr.bf16.gmra.mrb[4].mxu1 %v2200_v15 }
  0x2b   :  { %2017 = vmatprep.mubr.bf16.mxu0 %v2201_v16  ;;  %2065 = vmatprep.mubr.bf16.mxu1 %v2202_v17 }
  0x2c   :  { %2094 = vmatpush3.bf16.msra.mxu0 %v2286_v2  ;;  %2142 = vmatpush3.bf16.msra.mxu1 %v2286_v2  ;;  %v2251_v2 = vld [vmem:[%s2927_s0 + $0x168] sm:$0xff]  }
  0x2d   :  { %2095 = vmatprep.subr.bf16.mxu0 %v2291_v3  ;;  %2143 = vmatprep.subr.bf16.mxu1 %v2291_v3 }
  0x30   :  { %2096 = vmatpush3.bf16.msra.mxu0 %v2291_v3  ;;  %2144 = vmatpush3.bf16.msra.mxu1 %v2291_v3  ;;  %v2252_v3 = vld [vmem:[%s2927_s0 + $0x1e8] sm:$0xff]  }
  0x31   :  { %2097 = vmatprep.subr.bf16.mxu0 %v2308_v6  ;;  %2145 = vmatprep.subr.bf16.mxu1 %v2308_v6 }
  0x32   :  { %2018 = vmatmul.mubr.bf16.gmra.mrb[8].mxu0 %v2203_v18  ;;  %2066 = vmatmul.mubr.bf16.gmra.mrb[8].mxu1 %v2204_v19 }
  0x33   :  { %2021 = vmatprep.mubr.bf16.mxu0 %v2205_v20  ;;  %2069 = vmatprep.mubr.bf16.mxu1 %v2206_v21 }
  0x34   :  { %2098 = vmatpush3.bf16.msra.mxu0 %v2308_v6  ;;  %2146 = vmatpush3.bf16.msra.mxu1 %v2308_v6  ;;  %v2255_v6 = vld [vmem:[%s2927_s0 + $0x178] sm:$0xff]  }
  0x35   :  { %2099 = vmatprep.subr.bf16.mxu0 %v2317_v7  ;;  %2147 = vmatprep.subr.bf16.mxu1 %v2317_v7 }
  0x38   :  { %2100 = vmatpush3.bf16.msra.mxu0 %v2317_v7  ;;  %2148 = vmatpush3.bf16.msra.mxu1 %v2317_v7  ;;  %v2256_v7 = vld [vmem:[%s2927_s0 + $0x1f8] sm:$0xff]  }
  0x39   :  { %2101 = vmatprep.subr.bf16.mxu0 %v2326_v8  ;;  %2149 = vmatprep.subr.bf16.mxu1 %v2326_v8 }
  0x3a   :  { %2022 = vmatmul.mubr.bf16.gmra.mrb[12].mxu0 %v2207_v22  ;;  %2070 = vmatmul.mubr.bf16.gmra.mrb[12].mxu1 %v2208_v23 }
  0x3b   :  { %2025 = vmatprep.mubr.bf16.mxu0 %v2209_v24  ;;  %2073 = vmatprep.mubr.bf16.mxu1 %v2210_v25 }
  0x3c   :  { %2102 = vmatpush3.bf16.msra.mxu0 %v2326_v8  ;;  %2150 = vmatpush3.bf16.msra.mxu1 %v2326_v8 }
  0x3d   :  { %2103 = vmatprep.subr.bf16.mxu0 %v2335_v9  ;;  %2151 = vmatprep.subr.bf16.mxu1 %v2335_v9 }
  0x40   :  { %2104 = vmatpush3.bf16.msra.mxu0 %v2335_v9  ;;  %2152 = vmatpush3.bf16.msra.mxu1 %v2335_v9 }
  0x42   :  { %2026 = vmatmul.mubr.bf16.gmra.mrb[16].mxu0 %v2211_v26  ;;  %2074 = vmatmul.mubr.bf16.gmra.mrb[16].mxu1 %v2212_v27 }
  0x43   :  { %2029 = vmatprep.mubr.bf16.mxu0 %v2213_v28  ;;  %2077 = vmatprep.mubr.bf16.mxu1 %v2214_v29 }
  0x4a   :  { %2030 = vmatmul.mubr.bf16.gmra.mrb[20].mxu0 %v2215_v30  ;;  %2078 = vmatmul.mubr.bf16.gmra.mrb[20].mxu1 %v2216_v31 }
  0x4b   :  { %2033 = vmatprep.mubr.bf16.mxu0 %v2217_v32  ;;  %2081 = vmatprep.mubr.bf16.mxu1 %v2218_v33 }
  0x52   :  { %2034 = vmatmul.mubr.bf16.gmra.mrb[24].mxu0 %v2219_v34  ;;  %2082 = vmatmul.mubr.bf16.gmra.mrb[24].mxu1 %v2220_v35 }
  0x53   :  { %2037 = vmatprep.mubr.bf16.mxu0 %v2221_v36  ;;  %2085 = vmatprep.mubr.bf16.mxu1 %v2222_v37 }
  0x5a   :  { %2038 = vmatmul.mubr.bf16.gmra.mrb[28].mxu0 %v2223_v38  ;;  %2086 = vmatmul.mubr.bf16.gmra.mrb[28].mxu1 %v2224_v39 }
  0x5b   :  { %2105 = vmatprep.mubr.bf16.mxu0 %v2225_v40  ;;  %2153 = vmatprep.mubr.bf16.mxu1 %v2226_v41 }
  0x62   :  { %2106 = vmatmul.mubr.bf16.vlgmr.msra.gmra.mrb[32].mxu0 %v2227_v42  ;;  %2154 = vmatmul.mubr.bf16.vlgmr.msra.gmra.mrb[32].mxu1 %v2228_v43 }
  0x63   :  { %2109 = vmatprep.mubr.bf16.mxu0 %v2229_v44  ;;  %2157 = vmatprep.mubr.bf16.mxu1 %v2230_v45 }
  0x6a   :  { %2110 = vmatmul.mubr.bf16.gmra.mrb[36].mxu0 %v2231_v46  ;;  %2158 = vmatmul.mubr.bf16.gmra.mrb[36].mxu1 %v2232_v47 }
  0x6b   :  { %2113 = vmatprep.mubr.bf16.mxu0 %v2233_v48  ;;  %2161 = vmatprep.mubr.bf16.mxu1 %v2234_v49 }
  0x72   :  { %2114 = vmatmul.mubr.bf16.gmra.mrb[40].mxu0 %v2235_v50  ;;  %2162 = vmatmul.mubr.bf16.gmra.mrb[40].mxu1 %v2236_v51 }
  0x73   :  { %2117 = vmatprep.mubr.bf16.mxu0 %v2237_v52  ;;  %2165 = vmatprep.mubr.bf16.mxu1 %v2238_v53 }
  0x7a   :  { %2118 = vmatmul.mubr.bf16.gmra.mrb[44].mxu0 %v2239_v54  ;;  %2166 = vmatmul.mubr.bf16.gmra.mrb[44].mxu1 %v2240_v55 }
  0x7b   :  { %2121 = vmatprep.mubr.bf16.mxu0 %v2241_v56  ;;  %2169 = vmatprep.mubr.bf16.mxu1 %v2242_v57 }
  0x82   :  { %2122 = vmatmul.mubr.bf16.gmra.mrb[48].mxu0 %v2243_v58  ;;  %2170 = vmatmul.mubr.bf16.gmra.mrb[48].mxu1 %v2244_v59 }
  0x83   :  { %2125 = vmatprep.mubr.bf16.mxu0 %v2245_v60  ;;  %2173 = vmatprep.mubr.bf16.mxu1 %v2246_v61 }
  0x8a   :  { %2126 = vmatmul.mubr.bf16.gmra.mrb[52].mxu0 %v2247_v62  ;;  %2174 = vmatmul.mubr.bf16.gmra.mrb[52].mxu1 %v2248_v63 }
  0x8b   :  { %2129 = vmatprep.mubr.bf16.mxu0 %v2249_v0  ;;  %2177 = vmatprep.mubr.bf16.mxu1 %v2250_v1 }
  0x92   :  { %2130 = vmatmul.mubr.bf16.gmra.mrb[56].mxu0 %v2251_v2  ;;  %2178 = vmatmul.mubr.bf16.gmra.mrb[56].mxu1 %v2252_v3 }
  0x93   :  { %2133 = vmatprep.mubr.bf16.mxu0 %v2253_v4  ;;  %2181 = vmatprep.mubr.bf16.mxu1 %v2254_v5 }
  0x9a   :  { %2134 = vmatmul.mubr.bf16.gmra.mrb[60].mxu0 %v2255_v6  ;;  %2182 = vmatmul.mubr.bf16.gmra.mrb[60].mxu1 %v2256_v7 }
  0xf5   :  { %v2553_v8 = vpop.f32.mrb[0].mxu0  ;;  %v2555_v9 = vpop.f32.mrb[0].mxu1 }
  0xf6   :  { %v2559_v11 = vpop.f32.mrb[1].mxu0  ;;  %v2561_v12 = vpop.f32.mrb[1].mxu1 }
  0xf7   :  { %v2565_v14 = vpop.f32.mrb[2].mxu0  ;;  %v2567_v15 = vpop.f32.mrb[2].mxu1  ;;  %v2965_v0 = vmax.f32 %v2559_v11, %v2561_v12 }
  0xf8   :  { %v2571_v17 = vpop.f32.mrb[3].mxu0  ;;  %v2573_v18 = vpop.f32.mrb[3].mxu1 }
  0xfd   :  { %v2577_v20 = vpop.f32.mrb[4].mxu0  ;;  %v2579_v21 = vpop.f32.mrb[4].mxu1 }
  0xfe   :  { %v2583_v23 = vpop.f32.mrb[5].mxu0  ;;  %v2585_v24 = vpop.f32.mrb[5].mxu1 }
  0xff   :  { %v2589_v26 = vpop.f32.mrb[6].mxu0  ;;  %v2591_v27 = vpop.f32.mrb[6].mxu1 }
 0x100   :  { %v2595_v29 = vpop.f32.mrb[7].mxu0  ;;  %v2597_v30 = vpop.f32.mrb[7].mxu1 }
 0x105   :  { %v2601_v32 = vpop.f32.mrb[8].mxu0  ;;  %v2603_v33 = vpop.f32.mrb[8].mxu1 }
 0x106   :  { %v2607_v35 = vpop.f32.mrb[9].mxu0  ;;  %v2609_v36 = vpop.f32.mrb[9].mxu1 }
 0x107   :  { %v2613_v38 = vpop.f32.mrb[10].mxu0  ;;  %v2615_v39 = vpop.f32.mrb[10].mxu1 }
 0x108   :  { %v2619_v41 = vpop.f32.mrb[11].mxu0  ;;  %v2621_v42 = vpop.f32.mrb[11].mxu1 }
 0x10d   :  { %v2625_v44 = vpop.f32.mrb[12].mxu0  ;;  %v2627_v45 = vpop.f32.mrb[12].mxu1 }
 0x10e   :  { %v2631_v47 = vpop.f32.mrb[13].mxu0  ;;  %v2633_v48 = vpop.f32.mrb[13].mxu1 }
 0x10f   :  { %v2637_v50 = vpop.f32.mrb[14].mxu0  ;;  %v2639_v51 = vpop.f32.mrb[14].mxu1 }
 0x110   :  { %v2643_v53 = vpop.f32.mrb[15].mxu0  ;;  %v2645_v54 = vpop.f32.mrb[15].mxu1 }
 0x115   :  { %v2649_v56 = vpop.f32.mrb[16].mxu0  ;;  %v2651_v57 = vpop.f32.mrb[16].mxu1 }
 0x116   :  { %v2655_v59 = vpop.f32.mrb[17].mxu0  ;;  %v2657_v60 = vpop.f32.mrb[17].mxu1 }
 0x117   :  { %v2661_v62 = vpop.f32.mrb[18].mxu0  ;;  %v2663_v63 = vpop.f32.mrb[18].mxu1 }
 0x118   :  { %v2667_v1 = vpop.f32.mrb[19].mxu0  ;;  %v2669_v2 = vpop.f32.mrb[19].mxu1 }
 0x11d   :  { %v2673_v4 = vpop.f32.mrb[20].mxu0  ;;  %v2675_v5 = vpop.f32.mrb[20].mxu1 }
 0x11e   :  { %v2679_v7 = vpop.f32.mrb[21].mxu0  ;;  %v2681_v61 = vpop.f32.mrb[21].mxu1 }
 0x11f   :  { %v2685_v58 = vpop.f32.mrb[22].mxu0  ;;  %v2687_v55 = vpop.f32.mrb[22].mxu1 }
 0x120   :  { %v2691_v52 = vpop.f32.mrb[23].mxu0  ;;  %v2693_v49 = vpop.f32.mrb[23].mxu1 }
 0x121   :  { %2947 = vst [vmem:[#allocation2_spill] sm:$0xff] %v2693_v49 }
 0x125   :  { %v2697_v46 = vpop.f32.mrb[24].mxu0  ;;  %v2699_v43 = vpop.f32.mrb[24].mxu1 }
 0x126   :  { %2948 = vst [vmem:[#allocation3_spill] sm:$0xff] %v2697_v46  ;;  %2949 = vst [vmem:[#allocation4_spill] sm:$0xff] %v2699_v43  ;;  %v2703_v40 = vpop.f32.mrb[25].mxu0  ;;  %v2705_v37 = vpop.f32.mrb[25].mxu1 }
 0x127   :  { %2950 = vst [vmem:[#allocation5_spill] sm:$0xff] %v2703_v40  ;;  %2951 = vst [vmem:[#allocation6_spill] sm:$0xff] %v2705_v37  ;;  %v2709_v34 = vpop.f32.mrb[26].mxu0  ;;  %v2711_v31 = vpop.f32.mrb[26].mxu1  ;;  %v2751_v37 = vld [vmem:[%s2928_s2] ss:$0 sm:$0xff] }
 0x128   :  { %2952 = vst [vmem:[#allocation7_spill] sm:$0xff] %v2709_v34  ;;  %2953 = vst [vmem:[#allocation8_spill] sm:$0xff] %v2711_v31  ;;  %v2715_v28 = vpop.f32.mrb[27].mxu0  ;;  %v2717_v25 = vpop.f32.mrb[27].mxu1  ;;  %v2964_v34 = vmax.f32 %v2553_v8, %v2555_v9 }
 0x129   :  { %2954 = vst [vmem:[#allocation9_spill] sm:$0xff] %v2715_v28  ;;  %2955 = vst [vmem:[#allocation10_spill] sm:$0xff] %v2717_v25 }
 0x12d   :  { %v2721_v22 = vpop.f32.mrb[28].mxu0  ;;  %v2723_v19 = vpop.f32.mrb[28].mxu1 }
 0x12e   :  { %2956 = vst [vmem:[#allocation11_spill] sm:$0xff] %v2721_v22  ;;  %2957 = vst [vmem:[#allocation12_spill] sm:$0xff] %v2723_v19  ;;  %v2727_v16 = vpop.f32.mrb[29].mxu0  ;;  %v2729_v13 = vpop.f32.mrb[29].mxu1 }
 0x12f   :  { %2958 = vst [vmem:[#allocation13_spill] sm:$0xff] %v2727_v16  ;;  %2959 = vst [vmem:[#allocation14_spill] sm:$0xff] %v2729_v13  ;;  %v2733_v10 = vpop.f32.mrb[30].mxu0  ;;  %v2735_v31 = vpop.f32.mrb[30].mxu1 }
 0x130   :  { %2960 = vst [vmem:[#allocation15_spill] sm:$0xff] %v2733_v10  ;;  %2961 = vst [vmem:[#allocation16_spill] sm:$0xff] %v2735_v31  ;;  %v2739_v25 = vpop.f32.mrb[31].mxu0  ;;  %v2741_v28 = vpop.f32.mrb[31].mxu1 }
 0x131   :  { %2962 = vst [vmem:[#allocation17_spill] sm:$0xff] %v2739_v25  ;;  %2963 = vst [vmem:[#allocation18_spill] sm:$0xff] %v2741_v28  ;;  %v2966_v28 = vmax.f32 %v2565_v14, %v2567_v15 }
 0x135   :  { %v2107_v19 = vpop.f32.mrb[32].mxu0  ;;  %v2155_v22 = vpop.f32.mrb[32].mxu1 }
 0x136   :  { %v982_v6 = vmax.f32 %v2964_v34, %v2107_v19  ;;  %v853_v13 = vpop.f32.mrb[33].mxu0  ;;  %v1175_v16 = vpop.f32.mrb[33].mxu1  ;;  %v2967_v34 = vmax.f32 %v2571_v17, %v2573_v18 }
 0x137   :  { %v980_v31 = vmax.f32 %v2965_v0, %v853_v13  ;;  %v2108_v10 = vpop.f32.mrb[34].mxu0  ;;  %v2156_v40 = vpop.f32.mrb[34].mxu1 }
 0x138   :  { %v1304_v3 = vmax.f32 %v982_v6, %v2155_v22  ;;  %v983_v25 = vmax.f32 %v2966_v28, %v2108_v10  ;;  %v856_v8 = vpop.f32.mrb[35].mxu0  ;;  %v1178_v9 = vpop.f32.mrb[35].mxu1 }
 0x139   :  { %v1302_v19 = vmax.f32 %v980_v31, %v1175_v16  ;;  %v981_v43 = vmax.f32 %v2967_v34, %v856_v8  ;;  %v2968_v16 = vmax.f32 %v2577_v20, %v2579_v21 }
 0x13a   :  { %v1343_v46 = vadd.f32 %v2751_v37, %v1304_v3  ;;  %v1305_v49 = vmax.f32 %v983_v25, %v2156_v40  ;;  %v2969_v25 = vmax.f32 %v2583_v23, %v2585_v24 }
 0x13b   :  { %v1341_v11 = vadd.f32 %v2751_v37, %v1302_v19  ;;  %v1303_v12 = vmax.f32 %v981_v43, %v1178_v9 }
 0x13c   :  { %v1344_v13 = vadd.f32 %v2751_v37, %v1305_v49  ;;  %v1375_v10 = vmax.f32 %v1343_v46, 0.0  ;;  %v2970_v46 = vmax.f32 %v2589_v26, %v2591_v27 }
 0x13d   :  { %v1342_v22 = vadd.f32 %v2751_v37, %v1303_v12  ;;  %v2111_v0 = vpop.f32.mrb[36].mxu0  ;;  %v2159_v14 = vpop.f32.mrb[36].mxu1  ;;  %v1373_v31 = vmax.f32 %v1341_v11, 0.0  ;;  %v2971_v11 = vmax.f32 %v2595_v29, %v2597_v30 }
 0x13e   :  { %v1376_v15 = vmax.f32 %v1344_v13, 0.0  ;;  %v986_v28 = vmax.f32 %v2968_v16, %v2111_v0  ;;  %v869_v17 = vpop.f32.mrb[37].mxu0  ;;  %v1191_v18 = vpop.f32.mrb[37].mxu1 }
 0x13f   :  { %v1374_v3 = vmax.f32 %v1342_v22, 0.0  ;;  %v984_v40 = vmax.f32 %v2969_v25, %v869_v17  ;;  %v2112_v43 = vpop.f32.mrb[38].mxu0  ;;  %v2160_v49 = vpop.f32.mrb[38].mxu1 }
 0x140   :  { %v1810_v6 = vpack.c.bf16 %v1376_v15, %v1375_v10  ;;  %v1308_v8 = vmax.f32 %v986_v28, %v2159_v14  ;;  %v987_v9 = vmax.f32 %v2970_v46, %v2112_v43  ;;  %v872_v19 = vpop.f32.mrb[39].mxu0  ;;  %v1194_v34 = vpop.f32.mrb[39].mxu1  ;;  %v2972_v10 = vmax.f32 %v2601_v32, %v2603_v33 }
 0x141   :  { %v1805_v20 = vpack.c.bf16 %v1374_v3, %v1373_v31  ;;  %v1306_v21 = vmax.f32 %v984_v40, %v1191_v18  ;;  %v985_v12 = vmax.f32 %v2971_v11, %v872_v19  ;;  %v2973_v31 = vmax.f32 %v2607_v35, %v2609_v36 }
 0x142   :  { %1882 = vst [vmem:[%s2929_s3 + $0x8] sm:$0xff] %v1810_v6   ;;  %v1347_v23 = vadd.f32 %v2751_v37, %v1308_v8  ;;  %v1309_v24 = vmax.f32 %v987_v9, %v2160_v49  ;;  %v2974_v6 = vmax.f32 %v2613_v38, %v2615_v39  ;;  %v2975_v19 = vmax.f32 %v2619_v41, %v2621_v42 }
 0x143   :  { %1806 = vst [vmem:[%s2929_s3] sm:$0xff] %v1805_v20   ;;  %v1345_v26 = vadd.f32 %v2751_v37, %v1306_v21  ;;  %v1307_v27 = vmax.f32 %v985_v12, %v1194_v34 }
 0x144   :  { %v1348_v13 = vadd.f32 %v2751_v37, %v1309_v24  ;;  %v1379_v0 = vmax.f32 %v1347_v23, 0.0  ;;  %v2976_v23 = vmax.f32 %v2625_v44, %v2627_v45 }
 0x145   :  { %v1346_v22 = vadd.f32 %v2751_v37, %v1307_v27  ;;  %v2115_v29 = vpop.f32.mrb[40].mxu0  ;;  %v2163_v30 = vpop.f32.mrb[40].mxu1  ;;  %v1377_v17 = vmax.f32 %v1345_v26, 0.0 }
 0x146   :  { %v1380_v14 = vmax.f32 %v1348_v13, 0.0  ;;  %v990_v15 = vmax.f32 %v2972_v10, %v2115_v29  ;;  %v885_v16 = vpop.f32.mrb[41].mxu0  ;;  %v1207_v28 = vpop.f32.mrb[41].mxu1  ;;  %v2977_v29 = vmax.f32 %v2631_v47, %v2633_v48 }
 0x147   :  { %v1378_v18 = vmax.f32 %v1346_v22, 0.0  ;;  %v988_v3 = vmax.f32 %v2973_v31, %v885_v16  ;;  %v2116_v25 = vpop.f32.mrb[42].mxu0  ;;  %v2164_v40 = vpop.f32.mrb[42].mxu1  ;;  %v2978_v16 = vmax.f32 %v2637_v50, %v2639_v51  ;;  %v2979_v31 = vmax.f32 %v2643_v53, %v2645_v54 }
 0x148   :  { %v1820_v43 = vpack.c.bf16 %v1380_v14, %v1379_v0  ;;  %v1312_v49 = vmax.f32 %v990_v15, %v2163_v30  ;;  %v991_v8 = vmax.f32 %v2974_v6, %v2116_v25  ;;  %v888_v46 = vpop.f32.mrb[43].mxu0  ;;  %v1210_v9 = vpop.f32.mrb[43].mxu1  ;;  %v2980_v6 = vmax.f32 %v2649_v56, %v2651_v57 }
 0x149   :  { %v1815_v32 = vpack.c.bf16 %v1378_v18, %v1377_v17  ;;  %v1310_v33 = vmax.f32 %v988_v3, %v1207_v28  ;;  %v989_v34 = vmax.f32 %v2975_v19, %v888_v46  ;;  %v2981_v19 = vmax.f32 %v2655_v59, %v2657_v60 }
 0x14a   :  { %1884 = vst [vmem:[%s2929_s3 + $0x18] sm:$0xff] %v1820_v43   ;;  %v1351_v35 = vadd.f32 %v2751_v37, %v1312_v49  ;;  %v1313_v36 = vmax.f32 %v991_v8, %v2164_v40 }
 0x14b   :  { %1883 = vst [vmem:[%s2929_s3 + $0x10] sm:$0xff] %v1815_v32   ;;  %v1349_v38 = vadd.f32 %v2751_v37, %v1310_v33  ;;  %v1311_v39 = vmax.f32 %v989_v34, %v1210_v9 }
 0x14c   :  { %v1352_v20 = vadd.f32 %v2751_v37, %v1313_v36  ;;  %v1383_v11 = vmax.f32 %v1351_v35, 0.0 }
 0x14d   :  { %v1350_v21 = vadd.f32 %v2751_v37, %v1311_v39  ;;  %v2119_v41 = vpop.f32.mrb[44].mxu0  ;;  %v2167_v42 = vpop.f32.mrb[44].mxu1  ;;  %v1381_v13 = vmax.f32 %v1349_v38, 0.0 }
 0x14e   :  { %v1384_v12 = vmax.f32 %v1352_v20, 0.0  ;;  %v994_v24 = vmax.f32 %v2976_v23, %v2119_v41  ;;  %v901_v26 = vpop.f32.mrb[45].mxu0  ;;  %v1223_v27 = vpop.f32.mrb[45].mxu1  ;;  %v2982_v20 = vmax.f32 %v2661_v62, %v2663_v63 }
 0x14f   :  { %v1382_v22 = vmax.f32 %v1350_v21, 0.0  ;;  %v992_v30 = vmax.f32 %v2977_v29, %v901_v26  ;;  %v2120_v0 = vpop.f32.mrb[46].mxu0  ;;  %v2168_v14 = vpop.f32.mrb[46].mxu1 }
 0x150   :  { %v1830_v10 = vpack.c.bf16 %v1384_v12, %v1383_v11  ;;  %v1316_v15 = vmax.f32 %v994_v24, %v2167_v42  ;;  %v995_v28 = vmax.f32 %v2978_v16, %v2120_v0  ;;  %v904_v17 = vpop.f32.mrb[47].mxu0  ;;  %v1226_v18 = vpop.f32.mrb[47].mxu1  ;;  %v2983_v11 = vmax.f32 %v2667_v1, %v2669_v2 }
 0x151   :  { %v1825_v44 = vpack.c.bf16 %v1382_v22, %v1381_v13  ;;  %v1314_v45 = vmax.f32 %v992_v30, %v1223_v27  ;;  %v993_v3 = vmax.f32 %v2979_v31, %v904_v17  ;;  %v2984_v13 = vmax.f32 %v2673_v4, %v2675_v5 }
 0x152   :  { %1886 = vst [vmem:[%s2929_s3 + $0x28] sm:$0xff] %v1830_v10   ;;  %v1355_v47 = vadd.f32 %v2751_v37, %v1316_v15  ;;  %v1317_v48 = vmax.f32 %v995_v28, %v2168_v14  ;;  %v2985_v10 = vmax.f32 %v2679_v7, %v2681_v61 }
 0x153   :  { %1885 = vst [vmem:[%s2929_s3 + $0x20] sm:$0xff] %v1825_v44   ;;  %v1353_v50 = vadd.f32 %v2751_v37, %v1314_v45  ;;  %v1315_v51 = vmax.f32 %v993_v3, %v1226_v18  ;;  %v2986_v44 = vmax.f32 %v2685_v58, %v2687_v55 }
 0x154   :  { %v1356_v25 = vadd.f32 %v2751_v37, %v1317_v48  ;;  %v1387_v43 = vmax.f32 %v1355_v47, 0.0  ;;  %v2987_v47 = vld [vmem:[#allocation2_spill] sm:$0xff] }
 0x155   :  { %v1354_v40 = vadd.f32 %v2751_v37, %v1315_v51  ;;  %v2123_v53 = vpop.f32.mrb[48].mxu0  ;;  %v2171_v54 = vpop.f32.mrb[48].mxu1  ;;  %v1385_v32 = vmax.f32 %v1353_v50, 0.0  ;;  %v2988_v48 = vmax.f32 %v2691_v52, %v2987_v47 }
 0x156   :  { %v1388_v49 = vmax.f32 %v1356_v25, 0.0  ;;  %v998_v8 = vmax.f32 %v2980_v6, %v2123_v53  ;;  %v917_v46 = vpop.f32.mrb[49].mxu0  ;;  %v1239_v9 = vpop.f32.mrb[49].mxu1 }
 0x157   :  { %v1386_v33 = vmax.f32 %v1354_v40, 0.0  ;;  %v996_v34 = vmax.f32 %v2981_v19, %v917_v46  ;;  %v2124_v35 = vpop.f32.mrb[50].mxu0  ;;  %v2172_v36 = vpop.f32.mrb[50].mxu1  ;;  %v2992_v19 = vld [vmem:[#allocation5_spill] sm:$0xff] }
 0x158   :  { %v1840_v38 = vpack.c.bf16 %v1388_v49, %v1387_v43  ;;  %v1320_v39 = vmax.f32 %v998_v8, %v2171_v54  ;;  %v999_v21 = vmax.f32 %v2982_v20, %v2124_v35  ;;  %v920_v41 = vpop.f32.mrb[51].mxu0  ;;  %v1242_v42 = vpop.f32.mrb[51].mxu1  ;;  %v2989_v43 = vld [vmem:[#allocation3_spill] sm:$0xff]  ;;  %v2990_v49 = vld [vmem:[#allocation4_spill] sm:$0xff] }
 0x159   :  { %v1835_v56 = vpack.c.bf16 %v1386_v33, %v1385_v32  ;;  %v1318_v57 = vmax.f32 %v996_v34, %v1239_v9  ;;  %v997_v12 = vmax.f32 %v2983_v11, %v920_v41  ;;  %v2991_v6 = vmax.f32 %v2989_v43, %v2990_v49  ;;  %v2993_v34 = vld [vmem:[#allocation6_spill] sm:$0xff]  ;;  %v2995_v41 = vld [vmem:[#allocation7_spill] sm:$0xff] }
 0x15a   :  { %1888 = vst [vmem:[%s2929_s3 + $0x38] sm:$0xff] %v1840_v38   ;;  %v1359_v59 = vadd.f32 %v2751_v37, %v1320_v39  ;;  %v1321_v60 = vmax.f32 %v999_v21, %v2172_v36  ;;  %v2994_v35 = vmax.f32 %v2992_v19, %v2993_v34  ;;  %v3011_v43 = vld [vmem:[#allocation18_spill] sm:$0xff] }
 0x15b   :  { %1887 = vst [vmem:[%s2929_s3 + $0x30] sm:$0xff] %v1835_v56   ;;  %v1357_v62 = vadd.f32 %v2751_v37, %v1318_v57  ;;  %v1319_v63 = vmax.f32 %v997_v12, %v1242_v42  ;;  %v2996_v42 = vld [vmem:[#allocation8_spill] sm:$0xff] }
 0x15c   :  { %v1360_v23 = vadd.f32 %v2751_v37, %v1321_v60  ;;  %v1391_v26 = vmax.f32 %v1359_v59, 0.0  ;;  %v2997_v56 = vmax.f32 %v2995_v41, %v2996_v42 }
 0x15d   :  { %v1358_v24 = vadd.f32 %v2751_v37, %v1319_v63  ;;  %v2127_v1 = vpop.f32.mrb[52].mxu0  ;;  %v2175_v2 = vpop.f32.mrb[52].mxu1  ;;  %v1389_v0 = vmax.f32 %v1357_v62, 0.0  ;;  %v2998_v62 = vld [vmem:[#allocation9_spill] sm:$0xff]  ;;  %v2999_v63 = vld [vmem:[#allocation10_spill] sm:$0xff] }
 0x15e   :  { %v1392_v27 = vmax.f32 %v1360_v23, 0.0  ;;  %v1002_v22 = vmax.f32 %v2984_v13, %v2127_v1  ;;  %v933_v29 = vpop.f32.mrb[53].mxu0  ;;  %v1255_v30 = vpop.f32.mrb[53].mxu1  ;;  %v3000_v23 = vmax.f32 %v2998_v62, %v2999_v63 }
 0x15f   :  { %v1390_v14 = vmax.f32 %v1358_v24, 0.0  ;;  %v1000_v15 = vmax.f32 %v2985_v10, %v933_v29  ;;  %v2128_v16 = vpop.f32.mrb[54].mxu0  ;;  %v2176_v28 = vpop.f32.mrb[54].mxu1  ;;  %v3001_v10 = vld [vmem:[#allocation11_spill] sm:$0xff] }
 0x160   :  { %v1850_v17 = vpack.c.bf16 %v1392_v27, %v1391_v26  ;;  %v1324_v18 = vmax.f32 %v1002_v22, %v2175_v2  ;;  %v1003_v45 = vmax.f32 %v2986_v44, %v2128_v16  ;;  %v936_v31 = vpop.f32.mrb[55].mxu0  ;;  %v1258_v3 = vpop.f32.mrb[55].mxu1 }
 0x161   :  { %v1845_v4 = vpack.c.bf16 %v1390_v14, %v1389_v0  ;;  %v1322_v5 = vmax.f32 %v1000_v15, %v1255_v30  ;;  %v1001_v50 = vmax.f32 %v2988_v48, %v936_v31  ;;  %v3002_v15 = vld [vmem:[#allocation12_spill] sm:$0xff]  ;;  %v3004_v31 = vld [vmem:[#allocation13_spill] sm:$0xff] }
 0x162   :  { %1890 = vst [vmem:[%s2929_s3 + $0x48] sm:$0xff] %v1850_v17   ;;  %v1363_v61 = vadd.f32 %v2751_v37, %v1324_v18  ;;  %v1325_v7 = vmax.f32 %v1003_v45, %v2176_v28  ;;  %v3003_v16 = vmax.f32 %v3001_v10, %v3002_v15 }
 0x163   :  { %1889 = vst [vmem:[%s2929_s3 + $0x40] sm:$0xff] %v1845_v4   ;;  %v1361_v55 = vadd.f32 %v2751_v37, %v1322_v5  ;;  %v1323_v58 = vmax.f32 %v1001_v50, %v1258_v3  ;;  %v3005_v3 = vld [vmem:[#allocation14_spill] sm:$0xff] }
 0x164   :  { %v1364_v51 = vadd.f32 %v2751_v37, %v1325_v7  ;;  %v1395_v53 = vmax.f32 %v1363_v61, 0.0  ;;  %v3006_v4 = vmax.f32 %v3004_v31, %v3005_v3  ;;  %v3007_v7 = vld [vmem:[#allocation15_spill] sm:$0xff] }
 0x165   :  { %v1362_v25 = vadd.f32 %v2751_v37, %v1323_v58  ;;  %v2131_v52 = vpop.f32.mrb[56].mxu0  ;;  %v2179_v40 = vpop.f32.mrb[56].mxu1  ;;  %v1393_v32 = vmax.f32 %v1361_v55, 0.0  ;;  %v3008_v55 = vld [vmem:[#allocation16_spill] sm:$0xff] }
 0x166   :  { %v1396_v54 = vmax.f32 %v1364_v51, 0.0  ;;  %v1006_v8 = vmax.f32 %v2991_v6, %v2131_v52  ;;  %v949_v46 = vpop.f32.mrb[57].mxu0  ;;  %v1271_v9 = vpop.f32.mrb[57].mxu1  ;;  %v3009_v58 = vmax.f32 %v3007_v7, %v3008_v55 }
 0x167   :  { %v1394_v33 = vmax.f32 %v1362_v25, 0.0  ;;  %v1004_v36 = vmax.f32 %v2994_v35, %v949_v46  ;;  %v2132_v38 = vpop.f32.mrb[58].mxu0  ;;  %v2180_v39 = vpop.f32.mrb[58].mxu1 }
 0x168   :  { %v1860_v20 = vpack.c.bf16 %v1396_v54, %v1395_v53  ;;  %v1328_v21 = vmax.f32 %v1006_v8, %v2179_v40  ;;  %v1007_v57 = vmax.f32 %v2997_v56, %v2132_v38  ;;  %v952_v11 = vpop.f32.mrb[59].mxu0  ;;  %v1274_v12 = vpop.f32.mrb[59].mxu1  ;;  %v3010_v54 = vld [vmem:[#allocation17_spill] sm:$0xff] }
 0x169   :  { %v1855_v59 = vpack.c.bf16 %v1394_v33, %v1393_v32  ;;  %v1326_v60 = vmax.f32 %v1004_v36, %v1271_v9  ;;  %v1005_v24 = vmax.f32 %v3000_v23, %v952_v11  ;;  %v3012_v49 = vmax.f32 %v3010_v54, %v3011_v43 }
 0x16a   :  { %1892 = vst [vmem:[%s2929_s3 + $0x58] sm:$0xff] %v1860_v20   ;;  %v1367_v1 = vadd.f32 %v2751_v37, %v1328_v21  ;;  %v1329_v2 = vmax.f32 %v1007_v57, %v2180_v39 }
 0x16b   :  { %1891 = vst [vmem:[%s2929_s3 + $0x50] sm:$0xff] %v1855_v59   ;;  %v1365_v26 = vadd.f32 %v2751_v37, %v1326_v60  ;;  %v1327_v27 = vmax.f32 %v1005_v24, %v1274_v12 }
 0x16c   :  { %v1368_v13 = vadd.f32 %v2751_v37, %v1329_v2  ;;  %v1399_v0 = vmax.f32 %v1367_v1, 0.0 }
 0x16d   :  { %v1366_v22 = vadd.f32 %v2751_v37, %v1327_v27  ;;  %v2135_v29 = vpop.f32.mrb[60].mxu0  ;;  %v2183_v30 = vpop.f32.mrb[60].mxu1  ;;  %v1397_v44 = vmax.f32 %v1365_v26, 0.0 }
 0x16e   :  { %v1400_v14 = vmax.f32 %v1368_v13, 0.0  ;;  %v1010_v28 = vmax.f32 %v3003_v16, %v2135_v29  ;;  %v965_v17 = vpop.f32.mrb[61].mxu0  ;;  %v1287_v18 = vpop.f32.mrb[61].mxu1 }
 0x16f   :  { %v1398_v45 = vmax.f32 %v1366_v22, 0.0  ;;  %v1008_v5 = vmax.f32 %v3006_v4, %v965_v17  ;;  %v2136_v47 = vpop.f32.mrb[62].mxu0  ;;  %v2184_v48 = vpop.f32.mrb[62].mxu1 }
 0x170   :  { %v1870_v50 = vpack.c.bf16 %v1400_v14, %v1399_v0  ;;  %v1332_v61 = vmax.f32 %v1010_v28, %v2183_v30  ;;  %v1011_v51 = vmax.f32 %v3009_v58, %v2136_v47  ;;  %v968_v25 = vpop.f32.mrb[63].mxu0  ;;  %v1290_v52 = vpop.f32.mrb[63].mxu1 }
 0x171   :  { %v1865_v40 = vpack.c.bf16 %v1398_v45, %v1397_v44  ;;  %v1330_v53 = vmax.f32 %v1008_v5, %v1287_v18  ;;  %v1009_v6 = vmax.f32 %v3012_v49, %v968_v25 }
 0x172   :  { %1894 = vst [vmem:[%s2929_s3 + $0x68] sm:$0xff] %v1870_v50   ;;  %v1371_v8 = vadd.f32 %v2751_v37, %v1332_v61  ;;  %v1333_v46 = vmax.f32 %v1011_v51, %v2184_v48 }
 0x173   :  { %1893 = vst [vmem:[%s2929_s3 + $0x60] sm:$0xff] %v1865_v40   ;;  %v1369_v9 = vadd.f32 %v2751_v37, %v1330_v53  ;;  %v1331_v32 = vmax.f32 %v1009_v6, %v1290_v52 }
 0x174   :  { %v1372_v33 = vadd.f32 %v2751_v37, %v1333_v46  ;;  %v1403_v34 = vmax.f32 %v1371_v8, 0.0 }
 0x175   :  { %v1370_v19 = vadd.f32 %v2751_v37, %v1331_v32  ;;  %v1401_v36 = vmax.f32 %v1369_v9, 0.0 }
 0x176   :  { %v1404_v35 = vmax.f32 %v1372_v33, 0.0 }
 0x177   :  { %v1402_v38 = vmax.f32 %v1370_v19, 0.0 }
 0x178   :  { %v1880_v39 = vpack.c.bf16 %v1404_v35, %v1403_v34 }
 0x179   :  { %v1875_v20 = vpack.c.bf16 %v1402_v38, %v1401_v36 }
 0x17a   :  { %1896 = vst [vmem:[%s2929_s3 + $0x78] sm:$0xff] %v1880_v39  }
 0x17b   :  { %1895 = vst [vmem:[%s2929_s3 + $0x70] sm:$0xff] %v1875_v20  }

// kernel: vgg_feature_extractor.11
= control target key start
LH: loop header
LB: loop body
LE: loop exit
PB: predicated region body
PF: predicated region fallthrough
CT: control target
= control target key end

     0   :  { %s2042_s1 = inlined_call_operand.vmem [shape: bf16[1152,128], index: 1, kind: input, shape index: {}]   ;;  %s2043_s0 = inlined_call_operand.vmem [shape: bf16[1,64,1152], index: 0, kind: input, shape index: {}]   ;;  %s2044_s2 = inlined_call_operand.vmem [shape: f32[1,128], index: 2, kind: input, shape index: {}]   ;;  %s2045_s3 = inlined_call_operand.vmem [shape: bf16[64,128], index: 3, kind: output, shape index: {}]  }
   0x1   :  { %v1559_v0 = vld [vmem:[%s2042_s1 + $0x40] sm:$0xff]   ;;  %v1563_v4 = vld [vmem:[%s2042_s1 + $0x48] sm:$0xff]   ;;  %v1567_v8 = vld [vmem:[%s2042_s1 + $0x50] sm:$0xff]  }
   0x2   :  { %v1560_v1 = vld [vmem:[%s2042_s1 + $0xc0] sm:$0xff]   ;;  %1347 = vmatprep.subr.bf16.mxu0 %v1559_v0  ;;  %v1564_v5 = vld [vmem:[%s2042_s1 + $0xc8] sm:$0xff]   ;;  %v1568_v9 = vld [vmem:[%s2042_s1 + $0xd0] sm:$0xff]  }
   0x3   :  { %v1561_v2 = vld [vmem:[%s2042_s1] sm:$0xff]   ;;  %1387 = vmatprep.subr.bf16.mxu1 %v1560_v1  ;;  %v1565_v6 = vld [vmem:[%s2042_s1 + $0x8] sm:$0xff]   ;;  %v1569_v10 = vld [vmem:[%s2042_s1 + $0x10] sm:$0xff]  }
   0x4   :  { %v1562_v3 = vld [vmem:[%s2042_s1 + $0x80] sm:$0xff]   ;;  %1348 = vmatpush3.bf16.msra.mxu0 %v1561_v2  ;;  %v1566_v7 = vld [vmem:[%s2042_s1 + $0x88] sm:$0xff]   ;;  %v1570_v11 = vld [vmem:[%s2042_s1 + $0x90] sm:$0xff]  }
   0x5   :  { %1388 = vmatpush3.bf16.msra.mxu1 %v1562_v3  ;;  %1349 = vmatprep.subr.bf16.mxu0 %v1563_v4  ;;  %v1571_v12 = vld [vmem:[%s2042_s1 + $0x58] sm:$0xff]   ;;  %v1575_v16 = vld [vmem:[%s2042_s1 + $0x60] sm:$0xff]   ;;  %v1579_v20 = vld [vmem:[%s2042_s1 + $0x68] sm:$0xff]  }
   0x6   :  { %1389 = vmatprep.subr.bf16.mxu1 %v1564_v5  ;;  %v1572_v13 = vld [vmem:[%s2042_s1 + $0xd8] sm:$0xff]   ;;  %v1576_v17 = vld [vmem:[%s2042_s1 + $0xe0] sm:$0xff]   ;;  %v1580_v21 = vld [vmem:[%s2042_s1 + $0xe8] sm:$0xff]  }
   0x7   :  { %v1573_v14 = vld [vmem:[%s2042_s1 + $0x18] sm:$0xff]   ;;  %v1577_v18 = vld [vmem:[%s2042_s1 + $0x20] sm:$0xff]   ;;  %v1581_v22 = vld [vmem:[%s2042_s1 + $0x28] sm:$0xff]  }
   0x8   :  { %1350 = vmatpush3.bf16.msra.mxu0 %v1565_v6  ;;  %v1574_v15 = vld [vmem:[%s2042_s1 + $0x98] sm:$0xff]   ;;  %v1578_v19 = vld [vmem:[%s2042_s1 + $0xa0] sm:$0xff]   ;;  %v1582_v23 = vld [vmem:[%s2042_s1 + $0xa8] sm:$0xff]  }
   0x9   :  { %1390 = vmatpush3.bf16.msra.mxu1 %v1566_v7  ;;  %1351 = vmatprep.subr.bf16.mxu0 %v1567_v8  ;;  %v1583_v24 = vld [vmem:[%s2042_s1 + $0x70] sm:$0xff]   ;;  %v1587_v28 = vld [vmem:[%s2042_s1 + $0x78] sm:$0xff]   ;;  %v1591_v32 = vld [vmem:[%s2043_s0] ss:$36 sps:$4 sm:$0xff]  }
   0xa   :  { %1391 = vmatprep.subr.bf16.mxu1 %v1568_v9  ;;  %v1584_v25 = vld [vmem:[%s2042_s1 + $0xf0] sm:$0xff]   ;;  %v1588_v29 = vld [vmem:[%s2042_s1 + $0xf8] sm:$0xff]   ;;  %v1593_v33 = vld [vmem:[%s2043_s0 + $0x4] ss:$36 sps:$4 sm:$0xff]  }
   0xb   :  { %v1585_v26 = vld [vmem:[%s2042_s1 + $0x30] sm:$0xff]   ;;  %v1589_v30 = vld [vmem:[%s2042_s1 + $0x38] sm:$0xff]   ;;  %v1594_v34 = vld [vmem:[%s2043_s0 + $0x8] ss:$36 sps:$4 sm:$0xff]   ;;  %854 = vmatprep.mubr.bf16.mxu0 %v1593_v33 }
   0xc   :  { %1352 = vmatpush3.bf16.msra.mxu0 %v1569_v10  ;;  %v1586_v27 = vld [vmem:[%s2042_s1 + $0xb0] sm:$0xff]   ;;  %v1590_v31 = vld [vmem:[%s2042_s1 + $0xb8] sm:$0xff]   ;;  %v1597_v36 = vld [vmem:[%s2042_s1 + $0x140] sm:$0xff]  }
   0xd   :  { %1392 = vmatpush3.bf16.msra.mxu1 %v1570_v11  ;;  %1353 = vmatprep.subr.bf16.mxu0 %v1571_v12  ;;  %v1596_v35 = vld [vmem:[%s2043_s0 + $0xc] ss:$36 sps:$4 sm:$0xff]   ;;  %v1598_v37 = vld [vmem:[%s2042_s1 + $0x1c0] sm:$0xff]   ;;  %v1607_v45 = vld [vmem:[%s2043_s0 + $0x54] ss:$36 sps:$4 sm:$0xff]  }
   0xe   :  { %1393 = vmatprep.subr.bf16.mxu1 %v1572_v13  ;;  %919 = vmatprep.mubr.bf16.mxu1 %v1596_v35  ;;  %v1599_v38 = vld [vmem:[%s2042_s1 + $0x100] sm:$0xff]   ;;  %v1601_v40 = vld [vmem:[%s2042_s1 + $0x148] sm:$0xff]   ;;  %v1610_v47 = vld [vmem:[%s2043_s0 + $0x50] ss:$36 sps:$4 sm:$0xff]  }
   0xf   :  { %v1600_v39 = vld [vmem:[%s2042_s1 + $0x180] sm:$0xff]   ;;  %v1602_v41 = vld [vmem:[%s2042_s1 + $0x1c8] sm:$0xff]   ;;  %v1611_v48 = vld [vmem:[%s2042_s1 + $0x150] sm:$0xff]  }
  0x10   :  { %1354 = vmatpush3.bf16.msra.mxu0 %v1573_v14  ;;  %v1603_v42 = vld [vmem:[%s2042_s1 + $0x108] sm:$0xff]   ;;  %v1612_v49 = vld [vmem:[%s2042_s1 + $0x1d0] sm:$0xff]   ;;  %v1615_v52 = vld [vmem:[%s2042_s1 + $0x158] sm:$0xff]  }
  0x11   :  { %1394 = vmatpush3.bf16.msra.mxu1 %v1574_v15  ;;  %1355 = vmatprep.subr.bf16.mxu0 %v1575_v16  ;;  %v1604_v43 = vld [vmem:[%s2042_s1 + $0x188] sm:$0xff]   ;;  %v1613_v50 = vld [vmem:[%s2042_s1 + $0x110] sm:$0xff]   ;;  %v1616_v53 = vld [vmem:[%s2042_s1 + $0x1d8] sm:$0xff]  }
  0x12   :  { %1395 = vmatprep.subr.bf16.mxu1 %v1576_v17  ;;  %v1605_v44 = vld [vmem:[%s2043_s0 + $0x4c] ss:$36 sps:$4 sm:$0xff]   ;;  %v1617_v54 = vld [vmem:[%s2042_s1 + $0x118] sm:$0xff]   ;;  %v1625_v60 = vld [vmem:[%s2042_s1 + $0x160] sm:$0xff]  }
  0x13   :  { %v1609_v46 = vld [vmem:[%s2043_s0 + $0x48] ss:$36 sps:$4 sm:$0xff]   ;;  %v1614_v51 = vld [vmem:[%s2042_s1 + $0x190] sm:$0xff]   ;;  %v1618_v55 = vld [vmem:[%s2042_s1 + $0x198] sm:$0xff]  }
  0x14   :  { %1356 = vmatpush3.bf16.msra.mxu0 %v1577_v18  ;;  %v1619_v56 = vld [vmem:[%s2043_s0 + $0x94] ss:$36 sps:$4 sm:$0xff]   ;;  %v1621_v57 = vld [vmem:[%s2043_s0 + $0x9c] ss:$36 sps:$4 sm:$0xff]   ;;  %v1629_v0 = vld [vmem:[%s2042_s1 + $0x168] sm:$0xff]  }
  0x15   :  { %1396 = vmatpush3.bf16.msra.mxu1 %v1578_v19  ;;  %1357 = vmatprep.subr.bf16.mxu0 %v1579_v20  ;;  %v1623_v58 = vld [vmem:[%s2043_s0 + $0x90] ss:$36 sps:$4 sm:$0xff]   ;;  %v1624_v59 = vld [vmem:[%s2043_s0 + $0x98] ss:$36 sps:$4 sm:$0xff]   ;;  %v1626_v61 = vld [vmem:[%s2042_s1 + $0x1e0] sm:$0xff]  }
  0x16   :  { %1397 = vmatprep.subr.bf16.mxu1 %v1580_v21  ;;  %v1627_v62 = vld [vmem:[%s2042_s1 + $0x120] sm:$0xff]   ;;  %v1630_v1 = vld [vmem:[%s2042_s1 + $0x1e8] sm:$0xff]   ;;  %v1637_v6 = vld [vmem:[%s2043_s0 + $0xd8] ss:$36 sps:$4 sm:$0xff]  }
  0x17   :  { %v1628_v63 = vld [vmem:[%s2042_s1 + $0x1a0] sm:$0xff]   ;;  %v1631_v2 = vld [vmem:[%s2042_s1 + $0x128] sm:$0xff]   ;;  %v1639_v8 = vld [vmem:[%s2042_s1 + $0x170] sm:$0xff]  }
  0x18   :  { %1358 = vmatpush3.bf16.msra.mxu0 %v1581_v22  ;;  %v1632_v3 = vld [vmem:[%s2042_s1 + $0x1a8] sm:$0xff]   ;;  %v1633_v4 = vld [vmem:[%s2043_s0 + $0xdc] ss:$36 sps:$4 sm:$0xff]   ;;  %v1640_v9 = vld [vmem:[%s2042_s1 + $0x1f0] sm:$0xff]  }
  0x19   :  { %1398 = vmatpush3.bf16.msra.mxu1 %v1582_v23  ;;  %1359 = vmatprep.subr.bf16.mxu0 %v1583_v24  ;;  %v1635_v5 = vld [vmem:[%s2043_s0 + $0xe4] ss:$36 sps:$4 sm:$0xff]   ;;  %v1641_v10 = vld [vmem:[%s2042_s1 + $0x130] sm:$0xff]   ;;  %v1643_v12 = vld [vmem:[%s2042_s1 + $0x178] sm:$0xff]  }
  0x1a   :  { %1399 = vmatprep.subr.bf16.mxu1 %v1584_v25  ;;  %v1638_v7 = vld [vmem:[%s2043_s0 + $0xe0] ss:$36 sps:$4 sm:$0xff]   ;;  %v1642_v11 = vld [vmem:[%s2042_s1 + $0x1b0] sm:$0xff]   ;;  %v1644_v13 = vld [vmem:[%s2042_s1 + $0x1f8] sm:$0xff]  }
  0x1b   :  { %v1645_v14 = vld [vmem:[%s2042_s1 + $0x138] sm:$0xff]   ;;  %v1647_v16 = vld [vmem:[%s2043_s0 + $0x10] ss:$36 sps:$4 sm:$0xff]   ;;  %v1653_v20 = vld [vmem:[%s2042_s1 + $0x200] sm:$0xff]  }
  0x1c   :  { %1360 = vmatpush3.bf16.msra.mxu0 %v1585_v26  ;;  %v1646_v15 = vld [vmem:[%s2042_s1 + $0x1b8] sm:$0xff]   ;;  %v1654_v21 = vld [vmem:[%s2042_s1 + $0x208] sm:$0xff]   ;;  %v1660_v25 = vld [vmem:[%s2043_s0 + $0x60] ss:$36 sps:$4 sm:$0xff]  }
  0x1d   :  { %1400 = vmatpush3.bf16.msra.mxu1 %v1586_v27  ;;  %1361 = vmatprep.subr.bf16.mxu0 %v1587_v28  ;;  %v1649_v17 = vld [vmem:[%s2043_s0 + $0x14] ss:$36 sps:$4 sm:$0xff]   ;;  %v1652_v19 = vld [vmem:[%s2043_s0 + $0x1c] ss:$36 sps:$4 sm:$0xff]   ;;  %v1657_v23 = vld [vmem:[%s2043_s0 + $0x64] ss:$36 sps:$4 sm:$0xff]  }
  0x1e   :  { %1401 = vmatprep.subr.bf16.mxu1 %v1588_v29  ;;  %v1650_v18 = vld [vmem:[%s2043_s0 + $0x18] ss:$36 sps:$4 sm:$0xff]   ;;  %v1661_v26 = vld [vmem:[%s2042_s1 + $0x210] sm:$0xff]   ;;  %v1663_v27 = vld [vmem:[%s2043_s0 + $0xa4] ss:$36 sps:$4 sm:$0xff]  }
  0x1f   :  { %v1655_v22 = vld [vmem:[%s2043_s0 + $0x5c] ss:$36 sps:$4 sm:$0xff]   ;;  %v1665_v28 = vld [vmem:[%s2043_s0 + $0xac] ss:$36 sps:$4 sm:$0xff]  }
  0x20   :  { %1362 = vmatpush3.bf16.msra.mxu0 %v1589_v30  ;;  %v1659_v24 = vld [vmem:[%s2043_s0 + $0x58] ss:$36 sps:$4 sm:$0xff]   ;;  %v1667_v30 = vld [vmem:[%s2043_s0 + $0xa0] ss:$36 sps:$4 sm:$0xff]   ;;  %v1671_v33 = vld [vmem:[%s2043_s0 + $0xec] ss:$36 sps:$4 sm:$0xff]  }
  0x21   :  { %1402 = vmatpush3.bf16.msra.mxu1 %v1590_v31  ;;  %1427 = vmatprep.subr.bf16.mxu0 %v1597_v36  ;;  %v1662_v29 = vld [vmem:[%s2042_s1 + $0x218] sm:$0xff]   ;;  %v1668_v31 = vld [vmem:[%s2043_s0 + $0xa8] ss:$36 sps:$4 sm:$0xff]  }
  0x22   :  { %1467 = vmatprep.subr.bf16.mxu1 %v1598_v37  ;;  %v1670_v35 = vld [vmem:[%s2042_s1 + $0x228] sm:$0xff]   ;;  %v1677_v37 = vld [vmem:[%s2042_s1 + $0x230] sm:$0xff]  }
  0x23   :  { %855 = vmatmul.mubr.bf16.vlgmr.msra.gmra.mrb[0].mxu0 %v1591_v32  ;;  %v1669_v32 = vld [vmem:[%s2042_s1 + $0x220] sm:$0xff]   ;;  %v1675_v36 = vld [vmem:[%s2043_s0 + $0xe8] ss:$36 sps:$4 sm:$0xff]  }
  0x24   :  { %920 = vmatmul.mubr.bf16.vlgmr.msra.gmra.mrb[0].mxu1 %v1594_v34  ;;  %1428 = vmatpush3.bf16.msra.mxu0 %v1599_v38  ;;  %v1673_v34 = vld [vmem:[%s2043_s0 + $0xf4] ss:$36 sps:$4 sm:$0xff]  }
  0x25   :  { %1468 = vmatpush3.bf16.msra.mxu1 %v1600_v39  ;;  %1429 = vmatprep.subr.bf16.mxu0 %v1601_v40  ;;  %v1676_v38 = vld [vmem:[%s2043_s0 + $0xf0] ss:$36 sps:$4 sm:$0xff]   ;;  %v1679_v39 = vld [vmem:[%s2043_s0 + $0x20] ss:$36 sps:$4 sm:$0xff]  }
  0x26   :  { %1469 = vmatprep.subr.bf16.mxu1 %v1602_v41  ;;  %862 = vmatprep.mubr.bf16.mxu0 %v1605_v44  ;;  %v1680_v40 = vld [vmem:[%s2043_s0 + $0xb0] ss:$36 sps:$4 sm:$0xff]   ;;  %v1678_v41 = vld [vmem:[%s2042_s1 + $0x238] sm:$0xff]  }
  0x27   :  { %927 = vmatprep.mubr.bf16.mxu1 %v1607_v45 }
  0x28   :  { %1430 = vmatpush3.bf16.msra.mxu0 %v1603_v42  ;;  %v1681_v42 = vld [vmem:[%s2043_s0 + $0x68] ss:$36 sps:$4 sm:$0xff]  }
  0x29   :  { %1470 = vmatpush3.bf16.msra.mxu1 %v1604_v43  ;;  %1431 = vmatprep.subr.bf16.mxu0 %v1611_v48  ;;  %v1682_v43 = vld [vmem:[%s2043_s0 + $0xf8] ss:$36 sps:$4 sm:$0xff]  }
  0x2a   :  { %1471 = vmatprep.subr.bf16.mxu1 %v1612_v49 }
  0x2b   :  { %863 = vmatmul.mubr.bf16.gmra.mrb[4].mxu0 %v1609_v46  ;;  %v1199_v46 = vld [vmem:[%s2044_s2] ss:$0 sm:$0xff] }
  0x2c   :  { %928 = vmatmul.mubr.bf16.gmra.mrb[4].mxu1 %v1610_v47  ;;  %1432 = vmatpush3.bf16.msra.mxu0 %v1613_v50 }
  0x2d   :  { %1472 = vmatpush3.bf16.msra.mxu1 %v1614_v51  ;;  %1433 = vmatprep.subr.bf16.mxu0 %v1615_v52 }
  0x2e   :  { %1473 = vmatprep.subr.bf16.mxu1 %v1616_v53  ;;  %870 = vmatprep.mubr.bf16.mxu0 %v1619_v56 }
  0x2f   :  { %935 = vmatprep.mubr.bf16.mxu1 %v1621_v57 }
  0x30   :  { %1434 = vmatpush3.bf16.msra.mxu0 %v1617_v54 }
  0x31   :  { %1474 = vmatpush3.bf16.msra.mxu1 %v1618_v55  ;;  %1435 = vmatprep.subr.bf16.mxu0 %v1625_v60 }
  0x32   :  { %1475 = vmatprep.subr.bf16.mxu1 %v1626_v61 }
  0x33   :  { %871 = vmatmul.mubr.bf16.gmra.mrb[8].mxu0 %v1623_v58 }
  0x34   :  { %936 = vmatmul.mubr.bf16.gmra.mrb[8].mxu1 %v1624_v59  ;;  %1436 = vmatpush3.bf16.msra.mxu0 %v1627_v62 }
  0x35   :  { %1476 = vmatpush3.bf16.msra.mxu1 %v1628_v63  ;;  %1437 = vmatprep.subr.bf16.mxu0 %v1629_v0 }
  0x36   :  { %1477 = vmatprep.subr.bf16.mxu1 %v1630_v1  ;;  %878 = vmatprep.mubr.bf16.mxu0 %v1633_v4 }
  0x37   :  { %943 = vmatprep.mubr.bf16.mxu1 %v1635_v5 }
  0x38   :  { %1438 = vmatpush3.bf16.msra.mxu0 %v1631_v2 }
  0x39   :  { %1478 = vmatpush3.bf16.msra.mxu1 %v1632_v3  ;;  %1439 = vmatprep.subr.bf16.mxu0 %v1639_v8 }
  0x3a   :  { %1479 = vmatprep.subr.bf16.mxu1 %v1640_v9 }
  0x3b   :  { %879 = vmatmul.mubr.bf16.gmra.mrb[12].mxu0 %v1637_v6 }
  0x3c   :  { %944 = vmatmul.mubr.bf16.gmra.mrb[12].mxu1 %v1638_v7  ;;  %1440 = vmatpush3.bf16.msra.mxu0 %v1641_v10 }
  0x3d   :  { %1480 = vmatpush3.bf16.msra.mxu1 %v1642_v11  ;;  %1441 = vmatprep.subr.bf16.mxu0 %v1643_v12 }
  0x3e   :  { %1481 = vmatprep.subr.bf16.mxu1 %v1644_v13  ;;  %984 = vmatprep.mubr.bf16.mxu0 %v1649_v17 }
  0x3f   :  { %1049 = vmatprep.mubr.bf16.mxu1 %v1652_v19 }
  0x40   :  { %1442 = vmatpush3.bf16.msra.mxu0 %v1645_v14 }
  0x41   :  { %1482 = vmatpush3.bf16.msra.mxu1 %v1646_v15  ;;  %1519 = vmatprep.subr.bf16.mxu0 %v1653_v20 }
  0x42   :  { %1543 = vmatprep.subr.bf16.mxu1 %v1653_v20 }
  0x43   :  { %985 = vmatmul.mubr.bf16.vlgmr.msra.gmra.mrb[16].mxu0 %v1647_v16 }
  0x44   :  { %1050 = vmatmul.mubr.bf16.vlgmr.msra.gmra.mrb[16].mxu1 %v1650_v18  ;;  %1520 = vmatpush3.bf16.msra.mxu0 %v1653_v20 }
  0x45   :  { %1551 = vmatpush3.bf16.msra.mxu1 %v1653_v20  ;;  %1521 = vmatprep.subr.bf16.mxu0 %v1654_v21 }
  0x46   :  { %1544 = vmatprep.subr.bf16.mxu1 %v1654_v21  ;;  %992 = vmatprep.mubr.bf16.mxu0 %v1655_v22 }
  0x47   :  { %1057 = vmatprep.mubr.bf16.mxu1 %v1657_v23 }
  0x48   :  { %1522 = vmatpush3.bf16.msra.mxu0 %v1654_v21 }
  0x49   :  { %1552 = vmatpush3.bf16.msra.mxu1 %v1654_v21  ;;  %1523 = vmatprep.subr.bf16.mxu0 %v1661_v26 }
  0x4a   :  { %1545 = vmatprep.subr.bf16.mxu1 %v1661_v26 }
  0x4b   :  { %993 = vmatmul.mubr.bf16.gmra.mrb[20].mxu0 %v1659_v24 }
  0x4c   :  { %1058 = vmatmul.mubr.bf16.gmra.mrb[20].mxu1 %v1660_v25  ;;  %1000 = vmatprep.mubr.bf16.mxu0 %v1663_v27 }
  0x4d   :  { %1524 = vmatpush3.bf16.msra.mxu0 %v1661_v26  ;;  %1065 = vmatprep.mubr.bf16.mxu1 %v1665_v28 }
  0x4e   :  { %1553 = vmatpush3.bf16.msra.mxu1 %v1661_v26  ;;  %1525 = vmatprep.subr.bf16.mxu0 %v1662_v29 }
  0x4f   :  { %1546 = vmatprep.subr.bf16.mxu1 %v1662_v29 }
  0x51   :  { %1526 = vmatpush3.bf16.msra.mxu0 %v1662_v29 }
  0x52   :  { %1554 = vmatpush3.bf16.msra.mxu1 %v1662_v29  ;;  %1527 = vmatprep.subr.bf16.mxu0 %v1669_v32 }
  0x53   :  { %1001 = vmatmul.mubr.bf16.gmra.mrb[24].mxu0 %v1667_v30  ;;  %1547 = vmatprep.subr.bf16.mxu1 %v1669_v32 }
  0x54   :  { %1066 = vmatmul.mubr.bf16.gmra.mrb[24].mxu1 %v1668_v31  ;;  %1008 = vmatprep.mubr.bf16.mxu0 %v1671_v33 }
  0x55   :  { %1528 = vmatpush3.bf16.msra.mxu0 %v1669_v32  ;;  %1073 = vmatprep.mubr.bf16.mxu1 %v1673_v34 }
  0x56   :  { %1555 = vmatpush3.bf16.msra.mxu1 %v1669_v32  ;;  %1529 = vmatprep.subr.bf16.mxu0 %v1670_v35 }
  0x57   :  { %1548 = vmatprep.subr.bf16.mxu1 %v1670_v35 }
  0x59   :  { %1530 = vmatpush3.bf16.msra.mxu0 %v1670_v35 }
  0x5a   :  { %1556 = vmatpush3.bf16.msra.mxu1 %v1670_v35  ;;  %1531 = vmatprep.subr.bf16.mxu0 %v1677_v37 }
  0x5b   :  { %1009 = vmatmul.mubr.bf16.gmra.mrb[28].mxu0 %v1675_v36  ;;  %1549 = vmatprep.subr.bf16.mxu1 %v1677_v37 }
  0x5c   :  { %1074 = vmatmul.mubr.bf16.gmra.mrb[28].mxu1 %v1676_v38  ;;  %1535 = vmatprep.mubr.bf16.mxu0 %v1679_v39 }
  0x5d   :  { %1532 = vmatpush3.bf16.msra.mxu0 %v1677_v37  ;;  %1539 = vmatprep.mubr.bf16.mxu1 %v1680_v40 }
  0x5e   :  { %1557 = vmatpush3.bf16.msra.mxu1 %v1677_v37  ;;  %1533 = vmatprep.subr.bf16.mxu0 %v1678_v41 }
  0x5f   :  { %1550 = vmatprep.subr.bf16.mxu1 %v1678_v41 }
  0x61   :  { %1534 = vmatpush3.bf16.msra.mxu0 %v1678_v41 }
  0x62   :  { %1558 = vmatpush3.bf16.msra.mxu1 %v1678_v41 }
  0x64   :  { %1536 = vmatmul.mubr.bf16.vlgmr.msra.gmra.mrb[32].mxu0 %v1681_v42 }
  0x65   :  { %1540 = vmatmul.mubr.bf16.vlgmr.msra.gmra.mrb[32].mxu1 %v1682_v43 }
  0xf6   :  { %v1363_v44 = vpop.f32.mrb[0].mxu0 }
  0xf7   :  { %v1403_v45 = vpop.f32.mrb[0].mxu1  ;;  %v1364_v47 = vpop.f32.mrb[1].mxu0 }
  0xf8   :  { %v1365_v48 = vadd.f32 %v1364_v47, %v1363_v44  ;;  %v1404_v49 = vpop.f32.mrb[1].mxu1  ;;  %v1366_v50 = vpop.f32.mrb[2].mxu0 }
  0xf9   :  { %v1405_v51 = vadd.f32 %v1404_v49, %v1403_v45  ;;  %v1406_v52 = vpop.f32.mrb[2].mxu1  ;;  %v1367_v53 = vpop.f32.mrb[3].mxu0 }
  0xfa   :  { %v857_v54 = vadd.f32 %v1365_v48, %v1199_v46  ;;  %v1368_v55 = vadd.f32 %v1367_v53, %v1366_v50  ;;  %v1407_v56 = vpop.f32.mrb[3].mxu1 }
  0xfb   :  { %v1408_v57 = vadd.f32 %v1407_v56, %v1406_v52 }
  0xfc   :  { %v922_v58 = vadd.f32 %v1405_v51, %v857_v54  ;;  %v860_v59 = vadd.f32 %v1368_v55, %v1199_v46 }
  0xfe   :  { %v925_v60 = vadd.f32 %v1408_v57, %v860_v59  ;;  %v1369_v61 = vpop.f32.mrb[4].mxu0 }
  0xff   :  { %v1409_v62 = vpop.f32.mrb[4].mxu1  ;;  %v1370_v63 = vpop.f32.mrb[5].mxu0 }
 0x100   :  { %v1371_v0 = vadd.f32 %v1370_v63, %v1369_v61  ;;  %v1410_v1 = vpop.f32.mrb[5].mxu1  ;;  %v1372_v2 = vpop.f32.mrb[6].mxu0 }
 0x101   :  { %v1411_v3 = vadd.f32 %v1410_v1, %v1409_v62  ;;  %v1412_v4 = vpop.f32.mrb[6].mxu1  ;;  %v1373_v5 = vpop.f32.mrb[7].mxu0 }
 0x102   :  { %v865_v6 = vadd.f32 %v1371_v0, %v1199_v46  ;;  %v1374_v7 = vadd.f32 %v1373_v5, %v1372_v2  ;;  %v1413_v8 = vpop.f32.mrb[7].mxu1 }
 0x103   :  { %v1414_v9 = vadd.f32 %v1413_v8, %v1412_v4 }
 0x104   :  { %v930_v10 = vadd.f32 %v1411_v3, %v865_v6  ;;  %v868_v11 = vadd.f32 %v1374_v7, %v1199_v46 }
 0x106   :  { %v933_v12 = vadd.f32 %v1414_v9, %v868_v11  ;;  %v1375_v13 = vpop.f32.mrb[8].mxu0 }
 0x107   :  { %v1415_v14 = vpop.f32.mrb[8].mxu1  ;;  %v1376_v15 = vpop.f32.mrb[9].mxu0 }
 0x108   :  { %v1377_v16 = vadd.f32 %v1376_v15, %v1375_v13  ;;  %v1416_v17 = vpop.f32.mrb[9].mxu1  ;;  %v1378_v18 = vpop.f32.mrb[10].mxu0 }
 0x109   :  { %v1417_v19 = vadd.f32 %v1416_v17, %v1415_v14  ;;  %v1418_v20 = vpop.f32.mrb[10].mxu1  ;;  %v1379_v21 = vpop.f32.mrb[11].mxu0 }
 0x10a   :  { %v873_v22 = vadd.f32 %v1377_v16, %v1199_v46  ;;  %v1380_v23 = vadd.f32 %v1379_v21, %v1378_v18  ;;  %v1419_v24 = vpop.f32.mrb[11].mxu1 }
 0x10b   :  { %v1420_v25 = vadd.f32 %v1419_v24, %v1418_v20 }
 0x10c   :  { %v938_v26 = vadd.f32 %v1417_v19, %v873_v22  ;;  %v876_v27 = vadd.f32 %v1380_v23, %v1199_v46 }
 0x10e   :  { %v941_v28 = vadd.f32 %v1420_v25, %v876_v27  ;;  %v1381_v29 = vpop.f32.mrb[12].mxu0 }
 0x10f   :  { %v1421_v30 = vpop.f32.mrb[12].mxu1  ;;  %v1382_v31 = vpop.f32.mrb[13].mxu0 }
 0x110   :  { %v1422_v32 = vpop.f32.mrb[13].mxu1  ;;  %v1383_v33 = vadd.f32 %v1382_v31, %v1381_v29  ;;  %v1384_v35 = vpop.f32.mrb[14].mxu0 }
 0x111   :  { %v1423_v34 = vadd.f32 %v1422_v32, %v1421_v30  ;;  %v1424_v36 = vpop.f32.mrb[14].mxu1  ;;  %v1385_v37 = vpop.f32.mrb[15].mxu0 }
 0x112   :  { %v1425_v38 = vpop.f32.mrb[15].mxu1  ;;  %v881_v39 = vadd.f32 %v1383_v33, %v1199_v46  ;;  %v1386_v40 = vadd.f32 %v1385_v37, %v1384_v35 }
 0x113   :  { %v1426_v41 = vadd.f32 %v1425_v38, %v1424_v36 }
 0x114   :  { %v946_v42 = vadd.f32 %v1423_v34, %v881_v39  ;;  %v884_v43 = vadd.f32 %v1386_v40, %v1199_v46 }
 0x116   :  { %v949_v44 = vadd.f32 %v1426_v41, %v884_v43  ;;  %v1443_v45 = vpop.f32.mrb[16].mxu0 }
 0x117   :  { %v1444_v47 = vpop.f32.mrb[17].mxu0  ;;  %v1483_v48 = vpop.f32.mrb[16].mxu1 }
 0x118   :  { %v1445_v49 = vadd.f32 %v1444_v47, %v1443_v45  ;;  %v1446_v50 = vpop.f32.mrb[18].mxu0  ;;  %v1484_v51 = vpop.f32.mrb[17].mxu1 }
 0x119   :  { %v1447_v52 = vpop.f32.mrb[19].mxu0  ;;  %v1485_v54 = vadd.f32 %v1484_v51, %v1483_v48  ;;  %v1486_v55 = vpop.f32.mrb[18].mxu1 }
 0x11a   :  { %v987_v53 = vadd.f32 %v1445_v49, %v922_v58  ;;  %v1448_v56 = vadd.f32 %v1447_v52, %v1446_v50  ;;  %v1487_v57 = vpop.f32.mrb[19].mxu1 }
 0x11b   :  { %v1488_v61 = vadd.f32 %v1487_v57, %v1486_v55 }
 0x11c   :  { %v990_v59 = vadd.f32 %v1448_v56, %v925_v60  ;;  %v1052_v62 = vadd.f32 %v1485_v54, %v987_v53 }
 0x11e   :  { %v1449_v63 = vpop.f32.mrb[20].mxu0  ;;  %v1055_v0 = vadd.f32 %v1488_v61, %v990_v59 }
 0x11f   :  { %v1450_v1 = vpop.f32.mrb[21].mxu0  ;;  %v1489_v46 = vpop.f32.mrb[20].mxu1 }
 0x120   :  { %v1451_v2 = vadd.f32 %v1450_v1, %v1449_v63  ;;  %v1452_v3 = vpop.f32.mrb[22].mxu0  ;;  %v1490_v4 = vpop.f32.mrb[21].mxu1 }
 0x121   :  { %v1453_v5 = vpop.f32.mrb[23].mxu0  ;;  %v1491_v7 = vadd.f32 %v1490_v4, %v1489_v46  ;;  %v1492_v8 = vpop.f32.mrb[22].mxu1 }
 0x122   :  { %v995_v6 = vadd.f32 %v1451_v2, %v930_v10  ;;  %v1454_v9 = vadd.f32 %v1453_v5, %v1452_v3  ;;  %v1493_v58 = vpop.f32.mrb[23].mxu1 }
 0x123   :  { %v1494_v13 = vadd.f32 %v1493_v58, %v1492_v8 }
 0x124   :  { %v998_v11 = vadd.f32 %v1454_v9, %v933_v12  ;;  %v1060_v14 = vadd.f32 %v1491_v7, %v995_v6 }
 0x126   :  { %v1455_v15 = vpop.f32.mrb[24].mxu0  ;;  %v1063_v60 = vadd.f32 %v1494_v13, %v998_v11 }
 0x127   :  { %v1456_v16 = vpop.f32.mrb[25].mxu0  ;;  %v1495_v17 = vpop.f32.mrb[24].mxu1 }
 0x128   :  { %v1457_v18 = vadd.f32 %v1456_v16, %v1455_v15  ;;  %v1458_v19 = vpop.f32.mrb[26].mxu0  ;;  %v1496_v20 = vpop.f32.mrb[25].mxu1 }
 0x129   :  { %v1459_v21 = vpop.f32.mrb[27].mxu0  ;;  %v1497_v23 = vadd.f32 %v1496_v20, %v1495_v17  ;;  %v1498_v24 = vpop.f32.mrb[26].mxu1 }
 0x12a   :  { %v1003_v22 = vadd.f32 %v1457_v18, %v938_v26  ;;  %v1460_v25 = vadd.f32 %v1459_v21, %v1458_v19  ;;  %v1499_v10 = vpop.f32.mrb[27].mxu1 }
 0x12b   :  { %v1500_v29 = vadd.f32 %v1499_v10, %v1498_v24 }
 0x12c   :  { %v1006_v27 = vadd.f32 %v1460_v25, %v941_v28  ;;  %v1068_v30 = vadd.f32 %v1497_v23, %v1003_v22 }
 0x12e   :  { %v1461_v31 = vpop.f32.mrb[28].mxu0  ;;  %v1071_v12 = vadd.f32 %v1500_v29, %v1006_v27 }
 0x12f   :  { %v1462_v32 = vpop.f32.mrb[29].mxu0  ;;  %v1501_v33 = vpop.f32.mrb[28].mxu1 }
 0x130   :  { %v1463_v34 = vadd.f32 %v1462_v32, %v1461_v31  ;;  %v1464_v35 = vpop.f32.mrb[30].mxu0  ;;  %v1502_v36 = vpop.f32.mrb[29].mxu1 }
 0x131   :  { %v1465_v37 = vpop.f32.mrb[31].mxu0  ;;  %v1503_v39 = vadd.f32 %v1502_v36, %v1501_v33  ;;  %v1504_v40 = vpop.f32.mrb[30].mxu1 }
 0x132   :  { %v1011_v38 = vadd.f32 %v1463_v34, %v946_v42  ;;  %v1466_v41 = vadd.f32 %v1465_v37, %v1464_v35  ;;  %v1505_v26 = vpop.f32.mrb[31].mxu1 }
 0x133   :  { %v1506_v45 = vadd.f32 %v1505_v26, %v1504_v40 }
 0x134   :  { %v1014_v43 = vadd.f32 %v1466_v41, %v949_v44  ;;  %v1076_v47 = vadd.f32 %v1503_v39, %v1011_v38 }
 0x136   :  { %v1079_v48 = vadd.f32 %v1506_v45, %v1014_v43 }
 0x137   :  { %v1537_v28 = vpop.f32.mrb[32].mxu0 }
 0x138   :  { %v1125_v49 = vadd.f32 %v1537_v28, %v1060_v14  ;;  %v1541_v50 = vpop.f32.mrb[32].mxu1  ;;  %v1116_v51 = vpop.f32.mrb[33].mxu0 }
 0x139   :  { %v1141_v52 = vadd.f32 %v1541_v50, %v1076_v47  ;;  %v1117_v53 = vadd.f32 %v1116_v51, %v1052_v62  ;;  %v1132_v54 = vpop.f32.mrb[33].mxu1  ;;  %v1538_v55 = vpop.f32.mrb[34].mxu0 }
 0x13a   :  { %v1133_v56 = vadd.f32 %v1132_v54, %v1068_v30  ;;  %v1128_v57 = vadd.f32 %v1538_v55, %v1063_v60  ;;  %v1542_v59 = vpop.f32.mrb[34].mxu1  ;;  %v1119_v42 = vpop.f32.mrb[35].mxu0  ;;  %v1149_v46 = vmax.f32 %v1125_v49, 0.0 }
 0x13b   :  { %v1144_v61 = vadd.f32 %v1542_v59, %v1079_v48  ;;  %v1120_v63 = vadd.f32 %v1119_v42, %v1055_v0  ;;  %v1135_v1 = vpop.f32.mrb[35].mxu1  ;;  %v1153_v3 = vmax.f32 %v1141_v52, 0.0  ;;  %v1147_v4 = vmax.f32 %v1117_v53, 0.0 }
 0x13c   :  { %v1150_v44 = vmax.f32 %v1128_v57, 0.0  ;;  %v1136_v2 = vadd.f32 %v1135_v1, %v1071_v12  ;;  %v1151_v7 = vmax.f32 %v1133_v56, 0.0 }
 0x13d   :  { %v1154_v5 = vmax.f32 %v1144_v61, 0.0  ;;  %v1148_v6 = vmax.f32 %v1120_v63, 0.0 }
 0x13e   :  { %v1332_v8 = vpack.c.bf16 %v1150_v44, %v1149_v46  ;;  %v1152_v9 = vmax.f32 %v1136_v2, 0.0 }
 0x13f   :  { %v1342_v62 = vpack.c.bf16 %v1154_v5, %v1153_v3  ;;  %v1327_v58 = vpack.c.bf16 %v1148_v6, %v1147_v4 }
 0x140   :  { %1344 = vst [vmem:[%s2045_s3 + $0x8] sm:$0xff] %v1332_v8   ;;  %v1337_v11 = vpack.c.bf16 %v1152_v9, %v1151_v7 }
 0x141   :  { %1346 = vst [vmem:[%s2045_s3 + $0x18] sm:$0xff] %v1342_v62   ;;  %1328 = vst [vmem:[%s2045_s3] sm:$0xff] %v1327_v58  }
 0x142   :  { %1345 = vst [vmem:[%s2045_s3 + $0x10] sm:$0xff] %v1337_v11  }

// kernel: vgg_feature_extractor.10
= control target key start
LH: loop header
LB: loop body
LE: loop exit
PB: predicated region body
PF: predicated region fallthrough
CT: control target
= control target key end

     0   :  { %s6013_s1 = inlined_call_operand.vmem [shape: bf16[1152,128], index: 1, kind: input, shape index: {}]   ;;  %s6014_s0 = inlined_call_operand.vmem [shape: bf16[4,64,1152], index: 0, kind: input, shape index: {}]   ;;  %s6015_s2 = inlined_call_operand.vmem [shape: f32[1,128], index: 2, kind: input, shape index: {}]   ;;  %s6016_s3 = inlined_call_operand.vmem [shape: bf16[64,128], index: 3, kind: output, shape index: {}]  }
   0x1   :  { %v4416_v0 = vld [vmem:[%s6013_s1 + $0x40] sm:$0xff]   ;;  %v4439_v4 = vld [vmem:[%s6013_s1 + $0x48] sm:$0xff]   ;;  %v4463_v8 = vld [vmem:[%s6013_s1 + $0x50] sm:$0xff]  }
   0x2   :  { %v4421_v1 = vld [vmem:[%s6013_s1 + $0xc0] sm:$0xff]   ;;  %3257 = vmatprep.subr.bf16.mxu0 %v4416_v0  ;;  %v4445_v5 = vld [vmem:[%s6013_s1 + $0xc8] sm:$0xff]   ;;  %v4469_v9 = vld [vmem:[%s6013_s1 + $0xd0] sm:$0xff]  }
   0x3   :  { %v4427_v2 = vld [vmem:[%s6013_s1] sm:$0xff]   ;;  %3297 = vmatprep.subr.bf16.mxu1 %v4421_v1  ;;  %v4451_v6 = vld [vmem:[%s6013_s1 + $0x8] sm:$0xff]   ;;  %v4475_v10 = vld [vmem:[%s6013_s1 + $0x10] sm:$0xff]  }
   0x4   :  { %v4433_v3 = vld [vmem:[%s6013_s1 + $0x80] sm:$0xff]   ;;  %3258 = vmatpush3.bf16.msra.mxu0 %v4427_v2  ;;  %v4457_v7 = vld [vmem:[%s6013_s1 + $0x88] sm:$0xff]   ;;  %v4481_v11 = vld [vmem:[%s6013_s1 + $0x90] sm:$0xff]  }
   0x5   :  { %3298 = vmatpush3.bf16.msra.mxu1 %v4433_v3  ;;  %3259 = vmatprep.subr.bf16.mxu0 %v4439_v4  ;;  %v4487_v12 = vld [vmem:[%s6013_s1 + $0x58] sm:$0xff]   ;;  %v4511_v16 = vld [vmem:[%s6013_s1 + $0x60] sm:$0xff]   ;;  %v4535_v20 = vld [vmem:[%s6013_s1 + $0x68] sm:$0xff]  }
   0x6   :  { %3299 = vmatprep.subr.bf16.mxu1 %v4445_v5  ;;  %v4493_v13 = vld [vmem:[%s6013_s1 + $0xd8] sm:$0xff]   ;;  %v4517_v17 = vld [vmem:[%s6013_s1 + $0xe0] sm:$0xff]   ;;  %v4541_v21 = vld [vmem:[%s6013_s1 + $0xe8] sm:$0xff]  }
   0x7   :  { %v4499_v14 = vld [vmem:[%s6013_s1 + $0x18] sm:$0xff]   ;;  %v4523_v18 = vld [vmem:[%s6013_s1 + $0x20] sm:$0xff]   ;;  %v4547_v22 = vld [vmem:[%s6013_s1 + $0x28] sm:$0xff]  }
   0x8   :  { %3260 = vmatpush3.bf16.msra.mxu0 %v4451_v6  ;;  %v4505_v15 = vld [vmem:[%s6013_s1 + $0x98] sm:$0xff]   ;;  %v4529_v19 = vld [vmem:[%s6013_s1 + $0xa0] sm:$0xff]   ;;  %v4553_v23 = vld [vmem:[%s6013_s1 + $0xa8] sm:$0xff]  }
   0x9   :  { %3300 = vmatpush3.bf16.msra.mxu1 %v4457_v7  ;;  %3261 = vmatprep.subr.bf16.mxu0 %v4463_v8  ;;  %v4559_v24 = vld [vmem:[%s6013_s1 + $0x70] sm:$0xff]   ;;  %v4583_v28 = vld [vmem:[%s6013_s1 + $0x78] sm:$0xff]   ;;  %v4073_v32 = vld [vmem:[%s6014_s0] ss:$36 sps:$4 sm:$0xff]  }
   0xa   :  { %3301 = vmatprep.subr.bf16.mxu1 %v4469_v9  ;;  %v4565_v25 = vld [vmem:[%s6013_s1 + $0xf0] sm:$0xff]   ;;  %v4589_v29 = vld [vmem:[%s6013_s1 + $0xf8] sm:$0xff]   ;;  %v4075_v33 = vld [vmem:[%s6014_s0 + $0x4] ss:$36 sps:$4 sm:$0xff]  }
   0xb   :  { %v4571_v26 = vld [vmem:[%s6013_s1 + $0x30] sm:$0xff]   ;;  %v4595_v30 = vld [vmem:[%s6013_s1 + $0x38] sm:$0xff]   ;;  %v4076_v34 = vld [vmem:[%s6014_s0 + $0x8] ss:$36 sps:$4 sm:$0xff]   ;;  %847 = vmatprep.mubr.bf16.mxu0 %v4075_v33 }
   0xc   :  { %3262 = vmatpush3.bf16.msra.mxu0 %v4475_v10  ;;  %v4577_v27 = vld [vmem:[%s6013_s1 + $0xb0] sm:$0xff]   ;;  %v4601_v31 = vld [vmem:[%s6013_s1 + $0xb8] sm:$0xff]   ;;  %v4620_v36 = vld [vmem:[%s6013_s1 + $0x140] sm:$0xff]  }
   0xd   :  { %3302 = vmatpush3.bf16.msra.mxu1 %v4481_v11  ;;  %3263 = vmatprep.subr.bf16.mxu0 %v4487_v12  ;;  %v4078_v35 = vld [vmem:[%s6014_s0 + $0xc] ss:$36 sps:$4 sm:$0xff]   ;;  %v4625_v37 = vld [vmem:[%s6013_s1 + $0x1c0] sm:$0xff]   ;;  %v4089_v45 = vld [vmem:[%s6014_s0 + $0x54] ss:$36 sps:$4 sm:$0xff]  }
   0xe   :  { %3303 = vmatprep.subr.bf16.mxu1 %v4493_v13  ;;  %912 = vmatprep.mubr.bf16.mxu1 %v4078_v35  ;;  %v4631_v38 = vld [vmem:[%s6013_s1 + $0x100] sm:$0xff]   ;;  %v4643_v40 = vld [vmem:[%s6013_s1 + $0x148] sm:$0xff]   ;;  %v4092_v47 = vld [vmem:[%s6014_s0 + $0x50] ss:$36 sps:$4 sm:$0xff]  }
   0xf   :  { %v4637_v39 = vld [vmem:[%s6013_s1 + $0x180] sm:$0xff]   ;;  %v4649_v41 = vld [vmem:[%s6013_s1 + $0x1c8] sm:$0xff]   ;;  %v4680_v48 = vld [vmem:[%s6013_s1 + $0x150] sm:$0xff]  }
  0x10   :  { %3264 = vmatpush3.bf16.msra.mxu0 %v4499_v14  ;;  %v4655_v42 = vld [vmem:[%s6013_s1 + $0x108] sm:$0xff]   ;;  %v4685_v49 = vld [vmem:[%s6013_s1 + $0x1d0] sm:$0xff]   ;;  %v4703_v52 = vld [vmem:[%s6013_s1 + $0x158] sm:$0xff]  }
  0x11   :  { %3304 = vmatpush3.bf16.msra.mxu1 %v4505_v15  ;;  %3265 = vmatprep.subr.bf16.mxu0 %v4511_v16  ;;  %v4661_v43 = vld [vmem:[%s6013_s1 + $0x188] sm:$0xff]   ;;  %v4691_v50 = vld [vmem:[%s6013_s1 + $0x110] sm:$0xff]   ;;  %v4709_v53 = vld [vmem:[%s6013_s1 + $0x1d8] sm:$0xff]  }
  0x12   :  { %3305 = vmatprep.subr.bf16.mxu1 %v4517_v17  ;;  %v4087_v44 = vld [vmem:[%s6014_s0 + $0x4c] ss:$36 sps:$4 sm:$0xff]   ;;  %v4715_v54 = vld [vmem:[%s6013_s1 + $0x118] sm:$0xff]   ;;  %v4740_v60 = vld [vmem:[%s6013_s1 + $0x160] sm:$0xff]  }
  0x13   :  { %v4091_v46 = vld [vmem:[%s6014_s0 + $0x48] ss:$36 sps:$4 sm:$0xff]   ;;  %v4697_v51 = vld [vmem:[%s6013_s1 + $0x190] sm:$0xff]   ;;  %v4721_v55 = vld [vmem:[%s6013_s1 + $0x198] sm:$0xff]  }
  0x14   :  { %3266 = vmatpush3.bf16.msra.mxu0 %v4523_v18  ;;  %v4101_v56 = vld [vmem:[%s6014_s0 + $0x94] ss:$36 sps:$4 sm:$0xff]   ;;  %v4103_v57 = vld [vmem:[%s6014_s0 + $0x9c] ss:$36 sps:$4 sm:$0xff]   ;;  %v4769_v33 = vld [vmem:[%s6013_s1 + $0x1e8] sm:$0xff]  }
  0x15   :  { %3306 = vmatpush3.bf16.msra.mxu1 %v4529_v19  ;;  %3267 = vmatprep.subr.bf16.mxu0 %v4535_v20  ;;  %v4105_v58 = vld [vmem:[%s6014_s0 + $0x90] ss:$36 sps:$4 sm:$0xff]   ;;  %v4106_v59 = vld [vmem:[%s6014_s0 + $0x98] ss:$36 sps:$4 sm:$0xff]   ;;  %v4745_v61 = vld [vmem:[%s6013_s1 + $0x1e0] sm:$0xff]   ;;  %6041 = vst [vmem:[#allocation2_spill] sm:$0xff] %v4769_v33 }
  0x16   :  { %3307 = vmatprep.subr.bf16.mxu1 %v4541_v21  ;;  %v4751_v62 = vld [vmem:[%s6013_s1 + $0x120] sm:$0xff]   ;;  %v4781_v35 = vld [vmem:[%s6013_s1 + $0x1a8] sm:$0xff]  }
  0x17   :  { %v4757_v63 = vld [vmem:[%s6013_s1 + $0x1a0] sm:$0xff]   ;;  %6042 = vst [vmem:[#allocation3_spill] sm:$0xff] %v4781_v35 }
  0x18   :  { %3268 = vmatpush3.bf16.msra.mxu0 %v4547_v22 }
  0x19   :  { %3308 = vmatpush3.bf16.msra.mxu1 %v4553_v23  ;;  %3269 = vmatprep.subr.bf16.mxu0 %v4559_v24 }
  0x1a   :  { %3309 = vmatprep.subr.bf16.mxu1 %v4565_v25 }
  0x1c   :  { %3270 = vmatpush3.bf16.msra.mxu0 %v4571_v26 }
  0x1d   :  { %3310 = vmatpush3.bf16.msra.mxu1 %v4577_v27  ;;  %3271 = vmatprep.subr.bf16.mxu0 %v4583_v28 }
  0x1e   :  { %3311 = vmatprep.subr.bf16.mxu1 %v4589_v29 }
  0x20   :  { %3272 = vmatpush3.bf16.msra.mxu0 %v4595_v30 }
  0x21   :  { %3312 = vmatpush3.bf16.msra.mxu1 %v4601_v31  ;;  %3337 = vmatprep.subr.bf16.mxu0 %v4620_v36 }
  0x22   :  { %3377 = vmatprep.subr.bf16.mxu1 %v4625_v37 }
  0x23   :  { %848 = vmatmul.mubr.bf16.vlgmr.msra.gmra.mrb[0].mxu0 %v4073_v32  ;;  %v4763_v32 = vld [vmem:[%s6013_s1 + $0x168] sm:$0xff]  }
  0x24   :  { %913 = vmatmul.mubr.bf16.vlgmr.msra.gmra.mrb[0].mxu1 %v4076_v34  ;;  %3338 = vmatpush3.bf16.msra.mxu0 %v4631_v38  ;;  %v4775_v34 = vld [vmem:[%s6013_s1 + $0x128] sm:$0xff]  }
  0x25   :  { %3378 = vmatpush3.bf16.msra.mxu1 %v4637_v39  ;;  %3339 = vmatprep.subr.bf16.mxu0 %v4643_v40 }
  0x26   :  { %3379 = vmatprep.subr.bf16.mxu1 %v4649_v41  ;;  %855 = vmatprep.mubr.bf16.mxu0 %v4087_v44  ;;  %v4115_v44 = vld [vmem:[%s6014_s0 + $0xdc] ss:$36 sps:$4 sm:$0xff]  }
  0x27   :  { %920 = vmatprep.mubr.bf16.mxu1 %v4089_v45  ;;  %v4117_v45 = vld [vmem:[%s6014_s0 + $0xe4] ss:$36 sps:$4 sm:$0xff]  }
  0x28   :  { %3340 = vmatpush3.bf16.msra.mxu0 %v4655_v42 }
  0x29   :  { %3380 = vmatpush3.bf16.msra.mxu1 %v4661_v43  ;;  %3341 = vmatprep.subr.bf16.mxu0 %v4680_v48 }
  0x2a   :  { %3381 = vmatprep.subr.bf16.mxu1 %v4685_v49 }
  0x2b   :  { %856 = vmatmul.mubr.bf16.gmra.mrb[4].mxu0 %v4091_v46  ;;  %v4119_v46 = vld [vmem:[%s6014_s0 + $0xd8] ss:$36 sps:$4 sm:$0xff]  }
  0x2c   :  { %921 = vmatmul.mubr.bf16.gmra.mrb[4].mxu1 %v4092_v47  ;;  %3342 = vmatpush3.bf16.msra.mxu0 %v4691_v50  ;;  %v4120_v47 = vld [vmem:[%s6014_s0 + $0xe0] ss:$36 sps:$4 sm:$0xff]  }
  0x2d   :  { %3382 = vmatpush3.bf16.msra.mxu1 %v4697_v51  ;;  %3343 = vmatprep.subr.bf16.mxu0 %v4703_v52 }
  0x2e   :  { %3383 = vmatprep.subr.bf16.mxu1 %v4709_v53  ;;  %863 = vmatprep.mubr.bf16.mxu0 %v4101_v56  ;;  %v4800_v56 = vld [vmem:[%s6013_s1 + $0x170] sm:$0xff]  }
  0x2f   :  { %928 = vmatprep.mubr.bf16.mxu1 %v4103_v57  ;;  %v4805_v57 = vld [vmem:[%s6013_s1 + $0x1f0] sm:$0xff]  }
  0x30   :  { %3344 = vmatpush3.bf16.msra.mxu0 %v4715_v54  ;;  %6043 = vst [vmem:[#allocation4_spill] sm:$0xff] %v4805_v57 }
  0x31   :  { %3384 = vmatpush3.bf16.msra.mxu1 %v4721_v55  ;;  %3345 = vmatprep.subr.bf16.mxu0 %v4740_v60 }
  0x32   :  { %3385 = vmatprep.subr.bf16.mxu1 %v4745_v61 }
  0x33   :  { %864 = vmatmul.mubr.bf16.gmra.mrb[8].mxu0 %v4105_v58  ;;  %v4811_v58 = vld [vmem:[%s6013_s1 + $0x130] sm:$0xff]  }
  0x34   :  { %929 = vmatmul.mubr.bf16.gmra.mrb[8].mxu1 %v4106_v59  ;;  %3346 = vmatpush3.bf16.msra.mxu0 %v4751_v62  ;;  %v4817_v59 = vld [vmem:[%s6013_s1 + $0x1b0] sm:$0xff]  }
  0x35   :  { %3386 = vmatpush3.bf16.msra.mxu1 %v4757_v63  ;;  %3347 = vmatprep.subr.bf16.mxu0 %v4763_v32  ;;  %6044 = vst [vmem:[#allocation5_spill] sm:$0xff] %v4817_v59 }
  0x36   :  { %3387 = vmatprep.subr.bf16.mxu1 %v4769_v33  ;;  %871 = vmatprep.mubr.bf16.mxu0 %v4115_v44  ;;  %v4823_v44 = vld [vmem:[%s6013_s1 + $0x178] sm:$0xff]   ;;  %v4861_v33 = vld [vmem:[%s6013_s1 + $0x200] sm:$0xff]  }
  0x37   :  { %936 = vmatprep.mubr.bf16.mxu1 %v4117_v45  ;;  %v4829_v45 = vld [vmem:[%s6013_s1 + $0x1f8] sm:$0xff]  }
  0x38   :  { %3348 = vmatpush3.bf16.msra.mxu0 %v4775_v34  ;;  %6045 = vst [vmem:[#allocation6_spill] sm:$0xff] %v4829_v45 }
  0x39   :  { %3388 = vmatpush3.bf16.msra.mxu1 %v4781_v35  ;;  %3349 = vmatprep.subr.bf16.mxu0 %v4800_v56  ;;  %v4134_v35 = vld [vmem:[%s6014_s0 + $0x1c] ss:$36 sps:$4 sm:$0xff]  }
  0x3a   :  { %3389 = vmatprep.subr.bf16.mxu1 %v4805_v57  ;;  %v4131_v57 = vld [vmem:[%s6014_s0 + $0x14] ss:$36 sps:$4 sm:$0xff]  }
  0x3b   :  { %872 = vmatmul.mubr.bf16.gmra.mrb[12].mxu0 %v4119_v46  ;;  %v4835_v46 = vld [vmem:[%s6013_s1 + $0x138] sm:$0xff]  }
  0x3c   :  { %937 = vmatmul.mubr.bf16.gmra.mrb[12].mxu1 %v4120_v47  ;;  %3350 = vmatpush3.bf16.msra.mxu0 %v4811_v58  ;;  %v4841_v47 = vld [vmem:[%s6013_s1 + $0x1b8] sm:$0xff]  }
  0x3d   :  { %3390 = vmatpush3.bf16.msra.mxu1 %v4817_v59  ;;  %3351 = vmatprep.subr.bf16.mxu0 %v4823_v44  ;;  %6046 = vst [vmem:[#allocation7_spill] sm:$0xff] %v4841_v47  ;;  %v4129_v59 = vld [vmem:[%s6014_s0 + $0x10] ss:$36 sps:$4 sm:$0xff]  }
  0x3e   :  { %3391 = vmatprep.subr.bf16.mxu1 %v4829_v45  ;;  %v4132_v45 = vld [vmem:[%s6014_s0 + $0x18] ss:$36 sps:$4 sm:$0xff]   ;;  %977 = vmatprep.mubr.bf16.mxu0 %v4131_v57 }
  0x3f   :  { %1042 = vmatprep.mubr.bf16.mxu1 %v4134_v35  ;;  %v4137_v57 = vld [vmem:[%s6014_s0 + $0x5c] ss:$36 sps:$4 sm:$0xff]  }
  0x40   :  { %3352 = vmatpush3.bf16.msra.mxu0 %v4835_v46  ;;  %v4139_v35 = vld [vmem:[%s6014_s0 + $0x58] ss:$36 sps:$4 sm:$0xff]  }
  0x41   :  { %3392 = vmatpush3.bf16.msra.mxu1 %v4841_v47  ;;  %v4866_v47 = vld [vmem:[%s6013_s1 + $0x208] sm:$0xff]   ;;  %3945 = vmatprep.subr.bf16.mxu0 %v4861_v33 }
  0x42   :  { %3429 = vmatprep.subr.bf16.mxu1 %v4416_v0  ;;  %v4140_v0 = vld [vmem:[%s6014_s0 + $0x64] ss:$36 sps:$4 sm:$0xff]  }
  0x43   :  { %978 = vmatmul.mubr.bf16.vlgmr.msra.gmra.mrb[16].mxu0 %v4129_v59  ;;  %v4885_v59 = vld [vmem:[%s6013_s1 + $0x210] sm:$0xff]  }
  0x44   :  { %1043 = vmatmul.mubr.bf16.vlgmr.msra.gmra.mrb[16].mxu1 %v4132_v45  ;;  %3946 = vmatpush3.bf16.msra.mxu0 %v4861_v33  ;;  %v4145_v45 = vld [vmem:[%s6014_s0 + $0xa4] ss:$36 sps:$4 sm:$0xff]  }
  0x45   :  { %3430 = vmatpush3.bf16.msra.mxu1 %v4427_v2  ;;  %3947 = vmatprep.subr.bf16.mxu0 %v4866_v47  ;;  %v4143_v2 = vld [vmem:[%s6014_s0 + $0x60] ss:$36 sps:$4 sm:$0xff]  }
  0x46   :  { %3431 = vmatprep.subr.bf16.mxu1 %v4439_v4  ;;  %985 = vmatprep.mubr.bf16.mxu0 %v4137_v57  ;;  %v4899_v4 = vld [vmem:[%s6013_s1 + $0x218] sm:$0xff]   ;;  %v4148_v57 = vld [vmem:[%s6014_s0 + $0xac] ss:$36 sps:$4 sm:$0xff]  }
  0x47   :  { %1050 = vmatprep.mubr.bf16.mxu1 %v4140_v0  ;;  %v4153_v0 = vld [vmem:[%s6014_s0 + $0xec] ss:$36 sps:$4 sm:$0xff]  }
  0x48   :  { %3948 = vmatpush3.bf16.msra.mxu0 %v4866_v47 }
  0x49   :  { %3432 = vmatpush3.bf16.msra.mxu1 %v4451_v6  ;;  %3949 = vmatprep.subr.bf16.mxu0 %v4885_v59  ;;  %v4147_v6 = vld [vmem:[%s6014_s0 + $0xa0] ss:$36 sps:$4 sm:$0xff]  }
  0x4a   :  { %3433 = vmatprep.subr.bf16.mxu1 %v4463_v8  ;;  %v4915_v8 = vld [vmem:[%s6013_s1 + $0x220] sm:$0xff]  }
  0x4b   :  { %986 = vmatmul.mubr.bf16.gmra.mrb[20].mxu0 %v4139_v35  ;;  %v4156_v35 = vld [vmem:[%s6014_s0 + $0xf4] ss:$36 sps:$4 sm:$0xff]  }
  0x4c   :  { %993 = vmatprep.mubr.bf16.mxu0 %v4145_v45  ;;  %1051 = vmatmul.mubr.bf16.gmra.mrb[20].mxu1 %v4143_v2  ;;  %v4161_v2 = vld [vmem:[%s6014_s0 + $0x20] ss:$36 sps:$4 sm:$0xff]  }
  0x4d   :  { %3950 = vmatpush3.bf16.msra.mxu0 %v4885_v59  ;;  %3434 = vmatpush3.bf16.msra.mxu1 %v4475_v10  ;;  %v4151_v10 = vld [vmem:[%s6014_s0 + $0xa8] ss:$36 sps:$4 sm:$0xff]  }
  0x4e   :  { %3951 = vmatprep.subr.bf16.mxu0 %v4899_v4  ;;  %3435 = vmatprep.subr.bf16.mxu1 %v4487_v12  ;;  %v4929_v12 = vld [vmem:[%s6013_s1 + $0x228] sm:$0xff]  }
  0x4f   :  { %1058 = vmatprep.mubr.bf16.mxu1 %v4148_v57  ;;  %v4165_v45 = vld [vmem:[%s6014_s0 + $0x124] ss:$36 sps:$4 sm:$0xff]  }
  0x50   :  { %v5158_v57 = vld [vmem:[%s6013_s1 + $0x48] sm:$0xff]  }
  0x51   :  { %3952 = vmatpush3.bf16.msra.mxu0 %v4899_v4  ;;  %3436 = vmatpush3.bf16.msra.mxu1 %v4499_v14  ;;  %v4155_v14 = vld [vmem:[%s6014_s0 + $0xe8] ss:$36 sps:$4 sm:$0xff]  }
  0x52   :  { %3953 = vmatprep.subr.bf16.mxu0 %v4915_v8  ;;  %3437 = vmatprep.subr.bf16.mxu1 %v4511_v16  ;;  %v4945_v16 = vld [vmem:[%s6013_s1 + $0x230] sm:$0xff]  }
  0x53   :  { %994 = vmatmul.mubr.bf16.gmra.mrb[24].mxu0 %v4147_v6  ;;  %v5164_v6 = vld [vmem:[%s6013_s1 + $0xc8] sm:$0xff]  }
  0x54   :  { %1001 = vmatprep.mubr.bf16.mxu0 %v4153_v0  ;;  %1059 = vmatmul.mubr.bf16.gmra.mrb[24].mxu1 %v4151_v10  ;;  %v4208_v0 = vld [vmem:[%s6014_s0 + $0x180] ss:$36 sps:$4 sm:$0xff]   ;;  %v4213_v10 = vld [vmem:[%s6014_s0 + $0x218] ss:$36 sps:$4 sm:$0xff]  }
  0x55   :  { %3954 = vmatpush3.bf16.msra.mxu0 %v4915_v8  ;;  %3438 = vmatpush3.bf16.msra.mxu1 %v4523_v18  ;;  %v4159_v18 = vld [vmem:[%s6014_s0 + $0xf0] ss:$36 sps:$4 sm:$0xff]  }
  0x56   :  { %3955 = vmatprep.subr.bf16.mxu0 %v4929_v12  ;;  %3439 = vmatprep.subr.bf16.mxu1 %v4535_v20  ;;  %v4959_v20 = vld [vmem:[%s6013_s1 + $0x238] sm:$0xff]  }
  0x57   :  { %1066 = vmatprep.mubr.bf16.mxu1 %v4156_v35  ;;  %v5176_v35 = vld [vmem:[%s6013_s1 + $0x8] sm:$0xff]  }
  0x59   :  { %3956 = vmatpush3.bf16.msra.mxu0 %v4929_v12  ;;  %3440 = vmatpush3.bf16.msra.mxu1 %v4547_v22  ;;  %v4162_v22 = vld [vmem:[%s6014_s0 + $0x68] ss:$36 sps:$4 sm:$0xff]  }
  0x5a   :  { %3957 = vmatprep.subr.bf16.mxu0 %v4945_v16  ;;  %3441 = vmatprep.subr.bf16.mxu1 %v4559_v24  ;;  %v4163_v24 = vld [vmem:[%s6014_s0 + $0x120] ss:$36 sps:$4 sm:$0xff]  }
  0x5b   :  { %1002 = vmatmul.mubr.bf16.gmra.mrb[28].mxu0 %v4155_v14  ;;  %v5182_v14 = vld [vmem:[%s6013_s1 + $0x88] sm:$0xff]  }
  0x5c   :  { %3961 = vmatprep.mubr.bf16.mxu0 %v4161_v2  ;;  %1067 = vmatmul.mubr.bf16.gmra.mrb[28].mxu1 %v4159_v18  ;;  %v5188_v2 = vld [vmem:[%s6013_s1 + $0x50] sm:$0xff]  }
  0x5d   :  { %3958 = vmatpush3.bf16.msra.mxu0 %v4945_v16  ;;  %3442 = vmatpush3.bf16.msra.mxu1 %v4571_v26  ;;  %v4166_v26 = vld [vmem:[%s6014_s0 + $0xb0] ss:$36 sps:$4 sm:$0xff]  }
  0x5e   :  { %3959 = vmatprep.subr.bf16.mxu0 %v4959_v20  ;;  %3443 = vmatprep.subr.bf16.mxu1 %v4583_v28  ;;  %v4168_v28 = vld [vmem:[%s6014_s0 + $0x16c] ss:$36 sps:$4 sm:$0xff]  }
  0x5f   :  { %1397 = vmatprep.mubr.bf16.mxu1 %v4165_v45  ;;  %v5194_v18 = vld [vmem:[%s6013_s1 + $0xd0] sm:$0xff]  }
  0x60   :  { %v4209_v45 = vld [vmem:[%s6014_s0 + $0x1cc] ss:$36 sps:$4 sm:$0xff]  }
  0x61   :  { %3960 = vmatpush3.bf16.msra.mxu0 %v4959_v20  ;;  %3444 = vmatpush3.bf16.msra.mxu1 %v4595_v30  ;;  %v4170_v30 = vld [vmem:[%s6014_s0 + $0x168] ss:$36 sps:$4 sm:$0xff]  }
  0x62   :  { %3469 = vmatprep.subr.bf16.mxu0 %v4421_v1  ;;  %3509 = vmatprep.subr.bf16.mxu1 %v4620_v36  ;;  %v4167_v1 = vld [vmem:[%s6014_s0 + $0xf8] ss:$36 sps:$4 sm:$0xff]   ;;  %v4194_v36 = vld [vmem:[%s6014_s0 + $0x1c0] ss:$36 sps:$4 sm:$0xff]  }
  0x64   :  { %3962 = vmatmul.mubr.bf16.vlgmr.msra.gmra.mrb[32].mxu0 %v4162_v22  ;;  %1398 = vmatmul.mubr.bf16.vlgmr.msra.gmra.mrb[32].mxu1 %v4163_v24  ;;  %v4222_v22 = vld [vmem:[%s6014_s0 + $0x24c] ss:$36 sps:$4 sm:$0xff]  }
  0x65   :  { %3470 = vmatpush3.bf16.msra.mxu0 %v4433_v3  ;;  %3510 = vmatpush3.bf16.msra.mxu1 %v4631_v38  ;;  %v4171_v3 = vld [vmem:[%s6014_s0 + $0x1b4] ss:$36 sps:$4 sm:$0xff]   ;;  %v4198_v38 = vld [vmem:[%s6014_s0 + $0x20c] ss:$36 sps:$4 sm:$0xff]  }
  0x66   :  { %3471 = vmatprep.subr.bf16.mxu0 %v4445_v5  ;;  %3511 = vmatprep.subr.bf16.mxu1 %v4643_v40  ;;  %v4179_v5 = vld [vmem:[%s6014_s0 + $0x12c] ss:$36 sps:$4 sm:$0xff]   ;;  %v4197_v40 = vld [vmem:[%s6014_s0 + $0x200] ss:$36 sps:$4 sm:$0xff]  }
  0x67   :  { %3965 = vmatprep.mubr.bf16.mxu0 %v4166_v26  ;;  %1405 = vmatprep.mubr.bf16.mxu1 %v4168_v28  ;;  %v5206_v24 = vld [vmem:[%s6013_s1 + $0x10] sm:$0xff]   ;;  %v5218_v28 = vld [vmem:[%s6013_s1 + $0x58] sm:$0xff]  }
  0x68   :  { %v5212_v26 = vld [vmem:[%s6013_s1 + $0x90] sm:$0xff]  }
  0x69   :  { %3472 = vmatpush3.bf16.msra.mxu0 %v4457_v7  ;;  %3512 = vmatpush3.bf16.msra.mxu1 %v4655_v42  ;;  %v4173_v7 = vld [vmem:[%s6014_s0 + $0x1b0] ss:$36 sps:$4 sm:$0xff]   ;;  %v6048_v42 = vld [vmem:[#allocation3_spill] sm:$0xff] }
  0x6a   :  { %3473 = vmatprep.subr.bf16.mxu0 %v4469_v9  ;;  %3513 = vmatprep.subr.bf16.mxu1 %v4680_v48  ;;  %v4174_v9 = vld [vmem:[%s6014_s0 + $0x1fc] ss:$36 sps:$4 sm:$0xff]  }
  0x6b   :  { %v4203_v48 = vld [vmem:[%s6014_s0 + $0x13c] ss:$36 sps:$4 sm:$0xff]  }
  0x6c   :  { %3966 = vmatmul.mubr.bf16.gmra.mrb[36].mxu0 %v4167_v1  ;;  %1406 = vmatmul.mubr.bf16.gmra.mrb[36].mxu1 %v4170_v30  ;;  %v5224_v1 = vld [vmem:[%s6013_s1 + $0xd8] sm:$0xff]   ;;  %v4211_v30 = vld [vmem:[%s6014_s0 + $0x1c8] ss:$36 sps:$4 sm:$0xff]  }
  0x6d   :  { %3474 = vmatpush3.bf16.msra.mxu0 %v4481_v11  ;;  %3514 = vmatpush3.bf16.msra.mxu1 %v4691_v50  ;;  %v4176_v11 = vld [vmem:[%s6014_s0 + $0x1f8] ss:$36 sps:$4 sm:$0xff]  }
  0x6e   :  { %3475 = vmatprep.subr.bf16.mxu0 %v4493_v13  ;;  %3515 = vmatprep.subr.bf16.mxu1 %v4703_v52  ;;  %v4182_v13 = vld [vmem:[%s6014_s0 + $0x134] ss:$36 sps:$4 sm:$0xff]  }
  0x6f   :  { %1413 = vmatprep.mubr.bf16.mxu1 %v4171_v3  ;;  %1462 = vmatprep.mubr.bf16.mxu0 %v4179_v5  ;;  %v6050_v50 = vld [vmem:[#allocation5_spill] sm:$0xff] }
  0x70   :  { %v4201_v52 = vld [vmem:[%s6014_s0 + $0x138] ss:$36 sps:$4 sm:$0xff]  }
  0x71   :  { %3476 = vmatpush3.bf16.msra.mxu0 %v4505_v15  ;;  %3516 = vmatpush3.bf16.msra.mxu1 %v4715_v54  ;;  %v4177_v15 = vld [vmem:[%s6014_s0 + $0x128] ss:$36 sps:$4 sm:$0xff]   ;;  %v5233_v3 = vld [vmem:[%s6013_s1 + $0x18] sm:$0xff]  }
  0x72   :  { %3477 = vmatprep.subr.bf16.mxu0 %v4517_v17  ;;  %3517 = vmatprep.subr.bf16.mxu1 %v4740_v60  ;;  %v4180_v17 = vld [vmem:[%s6014_s0 + $0x130] ss:$36 sps:$4 sm:$0xff]   ;;  %v6052_v54 = vld [vmem:[#allocation7_spill] sm:$0xff]  ;;  %v5134_v60 = vld [vmem:[%s6013_s1 + $0xc0] sm:$0xff]  }
  0x73   :  { %v5239_v5 = vld [vmem:[%s6013_s1 + $0x98] sm:$0xff]  }
  0x74   :  { %1414 = vmatmul.mubr.bf16.gmra.mrb[40].mxu1 %v4173_v7  ;;  %v5245_v7 = vld [vmem:[%s6013_s1 + $0x60] sm:$0xff]  }
  0x75   :  { %3478 = vmatpush3.bf16.msra.mxu0 %v4529_v19  ;;  %3518 = vmatpush3.bf16.msra.mxu1 %v4751_v62  ;;  %v4183_v19 = vld [vmem:[%s6014_s0 + $0x174] ss:$36 sps:$4 sm:$0xff]  }
  0x76   :  { %3479 = vmatprep.subr.bf16.mxu0 %v4541_v21  ;;  %3519 = vmatprep.subr.bf16.mxu1 %v4763_v32  ;;  %v4186_v21 = vld [vmem:[%s6014_s0 + $0x17c] ss:$36 sps:$4 sm:$0xff]   ;;  %v4212_v62 = vld [vmem:[%s6014_s0 + $0x1d0] ss:$36 sps:$4 sm:$0xff]  }
  0x77   :  { %1421 = vmatprep.mubr.bf16.mxu1 %v4174_v9  ;;  %v5152_v32 = vld [vmem:[%s6013_s1 + $0x80] sm:$0xff]  }
  0x78   :  { %v5251_v9 = vld [vmem:[%s6013_s1 + $0xe0] sm:$0xff]  }
  0x79   :  { %3480 = vmatpush3.bf16.msra.mxu0 %v4553_v23  ;;  %3520 = vmatpush3.bf16.msra.mxu1 %v4775_v34  ;;  %v4185_v23 = vld [vmem:[%s6014_s0 + $0x170] ss:$36 sps:$4 sm:$0xff]  }
  0x7a   :  { %3481 = vmatprep.subr.bf16.mxu0 %v4565_v25  ;;  %3521 = vmatprep.subr.bf16.mxu1 %v4800_v56  ;;  %v4188_v25 = vld [vmem:[%s6014_s0 + $0x178] ss:$36 sps:$4 sm:$0xff]  }
  0x7c   :  { %1422 = vmatmul.mubr.bf16.gmra.mrb[44].mxu1 %v4176_v11  ;;  %v4214_v11 = vld [vmem:[%s6014_s0 + $0x214] ss:$36 sps:$4 sm:$0xff]  }
  0x7d   :  { %3482 = vmatpush3.bf16.msra.mxu0 %v4577_v27  ;;  %3522 = vmatpush3.bf16.msra.mxu1 %v4811_v58  ;;  %v4189_v27 = vld [vmem:[%s6014_s0 + $0x1bc] ss:$36 sps:$4 sm:$0xff]  }
  0x7e   :  { %3483 = vmatprep.subr.bf16.mxu0 %v4589_v29  ;;  %3523 = vmatprep.subr.bf16.mxu1 %v4823_v44  ;;  %v4192_v29 = vld [vmem:[%s6014_s0 + $0x1c4] ss:$36 sps:$4 sm:$0xff]  }
  0x7f   :  { %1527 = vmatprep.mubr.bf16.mxu1 %v4182_v13  ;;  %v5260_v13 = vld [vmem:[%s6013_s1 + $0x20] sm:$0xff]  }
  0x81   :  { %3484 = vmatpush3.bf16.msra.mxu0 %v4601_v31  ;;  %3524 = vmatpush3.bf16.msra.mxu1 %v4835_v46  ;;  %v4191_v31 = vld [vmem:[%s6014_s0 + $0x1b8] ss:$36 sps:$4 sm:$0xff]  }
  0x82   :  { %3549 = vmatprep.subr.bf16.mxu0 %v4625_v37  ;;  %3969 = vmatprep.subr.bf16.mxu1 %v4861_v33  ;;  %v4195_v37 = vld [vmem:[%s6014_s0 + $0x204] ss:$36 sps:$4 sm:$0xff]  }
  0x84   :  { %1463 = vmatmul.mubr.bf16.vlgmr.msra.gmra.mrb[40].mxu0 %v4177_v15  ;;  %1528 = vmatmul.mubr.bf16.vlgmr.msra.gmra.mrb[48].mxu1 %v4180_v17  ;;  %v5266_v15 = vld [vmem:[%s6013_s1 + $0xa0] sm:$0xff]   ;;  %v5272_v17 = vld [vmem:[%s6013_s1 + $0x68] sm:$0xff]  }
  0x85   :  { %3550 = vmatpush3.bf16.msra.mxu0 %v4637_v39  ;;  %3970 = vmatpush3.bf16.msra.mxu1 %v4861_v33  ;;  %v6047_v39 = vld [vmem:[#allocation2_spill] sm:$0xff] }
  0x86   :  { %3551 = vmatprep.subr.bf16.mxu0 %v4649_v41  ;;  %3971 = vmatprep.subr.bf16.mxu1 %v4866_v47  ;;  %v4200_v41 = vld [vmem:[%s6014_s0 + $0x208] ss:$36 sps:$4 sm:$0xff]  }
  0x87   :  { %1470 = vmatprep.mubr.bf16.mxu0 %v4183_v19  ;;  %1535 = vmatprep.mubr.bf16.mxu1 %v4186_v21  ;;  %v5278_v19 = vld [vmem:[%s6013_s1 + $0xe8] sm:$0xff]   ;;  %v4216_v21 = vld [vmem:[%s6014_s0 + $0x210] ss:$36 sps:$4 sm:$0xff]  }
  0x89   :  { %3552 = vmatpush3.bf16.msra.mxu0 %v4661_v43  ;;  %3972 = vmatpush3.bf16.msra.mxu1 %v4866_v47  ;;  %v6049_v43 = vld [vmem:[#allocation4_spill] sm:$0xff] }
  0x8a   :  { %3553 = vmatprep.subr.bf16.mxu0 %v4685_v49  ;;  %3973 = vmatprep.subr.bf16.mxu1 %v4885_v59  ;;  %v4204_v49 = vld [vmem:[%s6014_s0 + $0x140] ss:$36 sps:$4 sm:$0xff]  }
  0x8c   :  { %1471 = vmatmul.mubr.bf16.gmra.mrb[44].mxu0 %v4185_v23  ;;  %1536 = vmatmul.mubr.bf16.gmra.mrb[52].mxu1 %v4188_v25  ;;  %v5287_v23 = vld [vmem:[%s6013_s1 + $0x28] sm:$0xff]  }
  0x8d   :  { %3554 = vmatpush3.bf16.msra.mxu0 %v4697_v51  ;;  %3974 = vmatpush3.bf16.msra.mxu1 %v4885_v59  ;;  %v6051_v51 = vld [vmem:[#allocation6_spill] sm:$0xff]  ;;  %v5293_v25 = vld [vmem:[%s6013_s1 + $0xa8] sm:$0xff]  }
  0x8e   :  { %3555 = vmatprep.subr.bf16.mxu0 %v4709_v53  ;;  %3975 = vmatprep.subr.bf16.mxu1 %v4899_v4  ;;  %v4205_v53 = vld [vmem:[%s6014_s0 + $0x188] ss:$36 sps:$4 sm:$0xff]  }
  0x8f   :  { %1478 = vmatprep.mubr.bf16.mxu0 %v4189_v27  ;;  %1543 = vmatprep.mubr.bf16.mxu1 %v4192_v29  ;;  %v5299_v27 = vld [vmem:[%s6013_s1 + $0x70] sm:$0xff]  }
  0x90   :  { %v5305_v29 = vld [vmem:[%s6013_s1 + $0xf0] sm:$0xff]  }
  0x91   :  { %3556 = vmatpush3.bf16.msra.mxu0 %v4721_v55  ;;  %3976 = vmatpush3.bf16.msra.mxu1 %v4899_v4  ;;  %v5128_v55 = vld [vmem:[%s6013_s1 + $0x40] sm:$0xff]  }
  0x92   :  { %3557 = vmatprep.subr.bf16.mxu0 %v4745_v61  ;;  %3977 = vmatprep.subr.bf16.mxu1 %v4915_v8  ;;  %v4206_v61 = vld [vmem:[%s6014_s0 + $0x184] ss:$36 sps:$4 sm:$0xff]  }
  0x94   :  { %1479 = vmatmul.mubr.bf16.gmra.mrb[48].mxu0 %v4191_v31  ;;  %1544 = vmatmul.mubr.bf16.gmra.mrb[56].mxu1 %v4194_v36  ;;  %v4219_v31 = vld [vmem:[%s6014_s0 + $0x244] ss:$36 sps:$4 sm:$0xff]   ;;  %v5314_v36 = vld [vmem:[%s6013_s1 + $0x30] sm:$0xff]  }
  0x95   :  { %3558 = vmatpush3.bf16.msra.mxu0 %v4757_v63  ;;  %3978 = vmatpush3.bf16.msra.mxu1 %v4915_v8  ;;  %v5146_v63 = vld [vmem:[%s6013_s1] sm:$0xff]  }
  0x96   :  { %3559 = vmatprep.subr.bf16.mxu0 %v6047_v39  ;;  %3979 = vmatprep.subr.bf16.mxu1 %v4929_v12 }
  0x97   :  { %1486 = vmatprep.mubr.bf16.mxu0 %v4195_v37  ;;  %1551 = vmatprep.mubr.bf16.mxu1 %v4198_v38  ;;  %v5320_v37 = vld [vmem:[%s6013_s1 + $0xb0] sm:$0xff]   ;;  %v5326_v38 = vld [vmem:[%s6013_s1 + $0x78] sm:$0xff]  }
  0x98   :  { %6053 = vst [vmem:[#allocation2_spill] sm:$0xff] %v5320_v37 }
  0x99   :  { %3560 = vmatpush3.bf16.msra.mxu0 %v6048_v42  ;;  %3980 = vmatpush3.bf16.msra.mxu1 %v4929_v12 }
  0x9a   :  { %3561 = vmatprep.subr.bf16.mxu0 %v6049_v43  ;;  %3981 = vmatprep.subr.bf16.mxu1 %v4945_v16 }
  0x9c   :  { %1487 = vmatmul.mubr.bf16.gmra.mrb[52].mxu0 %v4197_v40  ;;  %1552 = vmatmul.mubr.bf16.gmra.mrb[60].mxu1 %v4200_v41  ;;  %v5332_v40 = vld [vmem:[%s6013_s1 + $0xf8] sm:$0xff]   ;;  %v4217_v41 = vld [vmem:[%s6014_s0 + $0x240] ss:$36 sps:$4 sm:$0xff]  }
  0x9d   :  { %3562 = vmatpush3.bf16.msra.mxu0 %v6050_v50  ;;  %3982 = vmatpush3.bf16.msra.mxu1 %v4945_v16  ;;  %6054 = vst [vmem:[#allocation3_spill] sm:$0xff] %v5332_v40 }
  0x9e   :  { %3563 = vmatprep.subr.bf16.mxu0 %v6051_v51  ;;  %3983 = vmatprep.subr.bf16.mxu1 %v4959_v20 }
  0x9f   :  { %1592 = vmatprep.mubr.bf16.mxu0 %v4203_v48  ;;  %3985 = vmatprep.mubr.bf16.mxu1 %v4204_v49  ;;  %v4220_v48 = vld [vmem:[%s6014_s0 + $0x248] ss:$36 sps:$4 sm:$0xff]   ;;  %v5344_v49 = vld [vmem:[%s6013_s1 + $0x38] sm:$0xff]  }
  0xa1   :  { %3564 = vmatpush3.bf16.msra.mxu0 %v6052_v54  ;;  %3984 = vmatpush3.bf16.msra.mxu1 %v4959_v20 }
  0xa2   :  { %3601 = vmatprep.subr.bf16.mxu0 %v5128_v55  ;;  %3641 = vmatprep.subr.bf16.mxu1 %v5134_v60 }
  0xa4   :  { %1593 = vmatmul.mubr.bf16.vlgmr.msra.gmra.mrb[56].mxu0 %v4201_v52  ;;  %3986 = vmatmul.mubr.bf16.vlgmr.msra.gmra.mrb[64].mxu1 %v4205_v53  ;;  %v5350_v52 = vld [vmem:[%s6013_s1 + $0xb8] sm:$0xff]   ;;  %v5356_v53 = vld [vmem:[%s6013_s1 + $0x140] sm:$0xff]  }
  0xa5   :  { %3602 = vmatpush3.bf16.msra.mxu0 %v5146_v63  ;;  %3642 = vmatpush3.bf16.msra.mxu1 %v5152_v32  ;;  %6055 = vst [vmem:[#allocation4_spill] sm:$0xff] %v5350_v52 }
  0xa6   :  { %3603 = vmatprep.subr.bf16.mxu0 %v5158_v57  ;;  %3643 = vmatprep.subr.bf16.mxu1 %v5164_v6 }
  0xa7   :  { %1600 = vmatprep.mubr.bf16.mxu0 %v4206_v61  ;;  %3989 = vmatprep.mubr.bf16.mxu1 %v4212_v62  ;;  %v5362_v61 = vld [vmem:[%s6013_s1 + $0x1c0] sm:$0xff]   ;;  %v4223_v62 = vld [vmem:[%s6014_s0 + $0x28c] ss:$36 sps:$4 sm:$0xff]  }
  0xa8   :  { %6056 = vst [vmem:[#allocation5_spill] sm:$0xff] %v5362_v61 }
  0xa9   :  { %3604 = vmatpush3.bf16.msra.mxu0 %v5176_v35  ;;  %3644 = vmatpush3.bf16.msra.mxu1 %v5182_v14 }
  0xaa   :  { %3605 = vmatprep.subr.bf16.mxu0 %v5188_v2  ;;  %3645 = vmatprep.subr.bf16.mxu1 %v5194_v18 }
  0xac   :  { %1601 = vmatmul.mubr.bf16.gmra.mrb[60].mxu0 %v4208_v0  ;;  %3990 = vmatmul.mubr.bf16.gmra.mrb[68].mxu1 %v4213_v10  ;;  %v4225_v0 = vld [vmem:[%s6014_s0 + $0x294] ss:$36 sps:$4 sm:$0xff]   ;;  %v5374_v10 = vld [vmem:[%s6013_s1 + $0x100] sm:$0xff]  }
  0xad   :  { %3606 = vmatpush3.bf16.msra.mxu0 %v5206_v24  ;;  %3646 = vmatpush3.bf16.msra.mxu1 %v5212_v26 }
  0xae   :  { %3607 = vmatprep.subr.bf16.mxu0 %v5218_v28  ;;  %3647 = vmatprep.subr.bf16.mxu1 %v5224_v1 }
  0xaf   :  { %1608 = vmatprep.mubr.bf16.mxu0 %v4209_v45  ;;  %2020 = vmatprep.mubr.bf16.mxu1 %v4222_v22  ;;  %v5380_v45 = vld [vmem:[%s6013_s1 + $0x180] sm:$0xff]   ;;  %v5386_v22 = vld [vmem:[%s6013_s1 + $0x148] sm:$0xff]  }
  0xb0   :  { %6057 = vst [vmem:[#allocation6_spill] sm:$0xff] %v5380_v45 }
  0xb1   :  { %3608 = vmatpush3.bf16.msra.mxu0 %v5233_v3  ;;  %3648 = vmatpush3.bf16.msra.mxu1 %v5239_v5 }
  0xb2   :  { %3609 = vmatprep.subr.bf16.mxu0 %v5245_v7  ;;  %3649 = vmatprep.subr.bf16.mxu1 %v5251_v9 }
  0xb4   :  { %1609 = vmatmul.mubr.bf16.gmra.mrb[64].mxu0 %v4211_v30  ;;  %v5392_v30 = vld [vmem:[%s6013_s1 + $0x1c8] sm:$0xff]  }
  0xb5   :  { %3610 = vmatpush3.bf16.msra.mxu0 %v5260_v13  ;;  %3650 = vmatpush3.bf16.msra.mxu1 %v5266_v15  ;;  %6058 = vst [vmem:[#allocation7_spill] sm:$0xff] %v5392_v30 }
  0xb6   :  { %3611 = vmatprep.subr.bf16.mxu0 %v5272_v17  ;;  %3651 = vmatprep.subr.bf16.mxu1 %v5278_v19 }
  0xb7   :  { %1616 = vmatprep.mubr.bf16.mxu0 %v4214_v11  ;;  %v4227_v11 = vld [vmem:[%s6014_s0 + $0x288] ss:$36 sps:$4 sm:$0xff]  }
  0xb9   :  { %3612 = vmatpush3.bf16.msra.mxu0 %v5287_v23  ;;  %3652 = vmatpush3.bf16.msra.mxu1 %v5293_v25 }
  0xba   :  { %3613 = vmatprep.subr.bf16.mxu0 %v5299_v27  ;;  %3653 = vmatprep.subr.bf16.mxu1 %v5305_v29 }
  0xbc   :  { %1617 = vmatmul.mubr.bf16.gmra.mrb[68].mxu0 %v4216_v21  ;;  %v4228_v21 = vld [vmem:[%s6014_s0 + $0x290] ss:$36 sps:$4 sm:$0xff]  }
  0xbd   :  { %3614 = vmatpush3.bf16.msra.mxu0 %v5314_v36  ;;  %3654 = vmatpush3.bf16.msra.mxu1 %v5320_v37  ;;  %v5506_v37 = vld [vmem:[%s6013_s1 + $0x168] sm:$0xff]  }
  0xbe   :  { %3615 = vmatprep.subr.bf16.mxu0 %v5326_v38  ;;  %3655 = vmatprep.subr.bf16.mxu1 %v5332_v40  ;;  %v5494_v40 = vld [vmem:[%s6013_s1 + $0x120] sm:$0xff]  }
  0xbf   :  { %1955 = vmatprep.mubr.bf16.mxu0 %v4219_v31  ;;  %v5404_v31 = vld [vmem:[%s6013_s1 + $0x108] sm:$0xff]  }
  0xc1   :  { %3616 = vmatpush3.bf16.msra.mxu0 %v5344_v49  ;;  %3656 = vmatpush3.bf16.msra.mxu1 %v5350_v52  ;;  %v4235_v52 = vld [vmem:[%s6014_s0 + $0x31c] ss:$36 sps:$4 sm:$0xff]  }
  0xc2   :  { %3681 = vmatprep.subr.bf16.mxu0 %v5356_v53  ;;  %3721 = vmatprep.subr.bf16.mxu1 %v5362_v61  ;;  %v5464_v61 = vld [vmem:[%s6013_s1 + $0x118] sm:$0xff]  }
  0xc4   :  { %1956 = vmatmul.mubr.bf16.vlgmr.msra.gmra.mrb[72].mxu0 %v4217_v41  ;;  %2021 = vmatmul.mubr.bf16.vlgmr.msra.gmra.mrb[72].mxu1 %v4220_v48  ;;  %v5410_v41 = vld [vmem:[%s6013_s1 + $0x188] sm:$0xff]   ;;  %v5416_v48 = vld [vmem:[%s6013_s1 + $0x150] sm:$0xff]  }
  0xc5   :  { %3682 = vmatpush3.bf16.msra.mxu0 %v5374_v10  ;;  %3722 = vmatpush3.bf16.msra.mxu1 %v5380_v45  ;;  %6059 = vst [vmem:[#allocation8_spill] sm:$0xff] %v5410_v41  ;;  %v5446_v45 = vld [vmem:[%s6013_s1 + $0x158] sm:$0xff]  }
  0xc6   :  { %3683 = vmatprep.subr.bf16.mxu0 %v5386_v22  ;;  %3723 = vmatprep.subr.bf16.mxu1 %v5392_v30  ;;  %v5434_v30 = vld [vmem:[%s6013_s1 + $0x110] sm:$0xff]  }
  0xc7   :  { %1963 = vmatprep.mubr.bf16.mxu0 %v4223_v62  ;;  %2028 = vmatprep.mubr.bf16.mxu1 %v4225_v0  ;;  %v5422_v62 = vld [vmem:[%s6013_s1 + $0x1d0] sm:$0xff]  }
  0xc8   :  { %6060 = vst [vmem:[#allocation9_spill] sm:$0xff] %v5422_v62  ;;  %v4229_v0 = vld [vmem:[%s6014_s0 + $0x2d4] ss:$36 sps:$4 sm:$0xff]  }
  0xc9   :  { %3684 = vmatpush3.bf16.msra.mxu0 %v5404_v31  ;;  %3724 = vmatpush3.bf16.msra.mxu1 %v5410_v41  ;;  %v4231_v41 = vld [vmem:[%s6014_s0 + $0x2dc] ss:$36 sps:$4 sm:$0xff]  }
  0xca   :  { %3685 = vmatprep.subr.bf16.mxu0 %v5416_v48  ;;  %3725 = vmatprep.subr.bf16.mxu1 %v5422_v62  ;;  %v5440_v62 = vld [vmem:[%s6013_s1 + $0x190] sm:$0xff]  }
  0xcb   :  { %6061 = vst [vmem:[#allocation10_spill] sm:$0xff] %v5440_v62 }
  0xcc   :  { %1964 = vmatmul.mubr.bf16.gmra.mrb[76].mxu0 %v4227_v11  ;;  %2029 = vmatmul.mubr.bf16.gmra.mrb[76].mxu1 %v4228_v21  ;;  %v5452_v11 = vld [vmem:[%s6013_s1 + $0x1d8] sm:$0xff]   ;;  %v4233_v21 = vld [vmem:[%s6014_s0 + $0x2d0] ss:$36 sps:$4 sm:$0xff]  }
  0xcd   :  { %3686 = vmatpush3.bf16.msra.mxu0 %v5434_v30  ;;  %3726 = vmatpush3.bf16.msra.mxu1 %v5440_v62  ;;  %6062 = vst [vmem:[#allocation11_spill] sm:$0xff] %v5452_v11  ;;  %v4234_v62 = vld [vmem:[%s6014_s0 + $0x2d8] ss:$36 sps:$4 sm:$0xff]  }
  0xce   :  { %3687 = vmatprep.subr.bf16.mxu0 %v5446_v45  ;;  %3727 = vmatprep.subr.bf16.mxu1 %v5452_v11  ;;  %v5482_v11 = vld [vmem:[%s6013_s1 + $0x1e0] sm:$0xff]  }
  0xcf   :  { %1971 = vmatprep.mubr.bf16.mxu0 %v4229_v0  ;;  %2036 = vmatprep.mubr.bf16.mxu1 %v4231_v41  ;;  %v5470_v0 = vld [vmem:[%s6013_s1 + $0x198] sm:$0xff]   ;;  %v5476_v41 = vld [vmem:[%s6013_s1 + $0x160] sm:$0xff]   ;;  %6064 = vst [vmem:[#allocation13_spill] sm:$0xff] %v5482_v11 }
  0xd0   :  { %6063 = vst [vmem:[#allocation12_spill] sm:$0xff] %v5470_v0 }
  0xd1   :  { %3688 = vmatpush3.bf16.msra.mxu0 %v5464_v61  ;;  %3728 = vmatpush3.bf16.msra.mxu1 %v5470_v0  ;;  %v4237_v0 = vld [vmem:[%s6014_s0 + $0x324] ss:$36 sps:$4 sm:$0xff]  }
  0xd2   :  { %3689 = vmatprep.subr.bf16.mxu0 %v5476_v41  ;;  %3729 = vmatprep.subr.bf16.mxu1 %v5482_v11  ;;  %v5500_v11 = vld [vmem:[%s6013_s1 + $0x1a0] sm:$0xff]  }
  0xd4   :  { %1972 = vmatmul.mubr.bf16.gmra.mrb[80].mxu0 %v4233_v21  ;;  %2037 = vmatmul.mubr.bf16.gmra.mrb[80].mxu1 %v4234_v62  ;;  %v4239_v62 = vld [vmem:[%s6014_s0 + $0x318] ss:$36 sps:$4 sm:$0xff]   ;;  %v4240_v21 = vld [vmem:[%s6014_s0 + $0x320] ss:$36 sps:$4 sm:$0xff]  }
  0xd5   :  { %3690 = vmatpush3.bf16.msra.mxu0 %v5494_v40  ;;  %3730 = vmatpush3.bf16.msra.mxu1 %v5500_v11 }
  0xd6   :  { %3691 = vmatprep.subr.bf16.mxu0 %v5506_v37  ;;  %3731 = vmatprep.subr.bf16.mxu1 %v6047_v39  ;;  %v4243_v39 = vld [vmem:[%s6014_s0 + $0x254] ss:$36 sps:$4 sm:$0xff]  }
  0xd7   :  { %1979 = vmatprep.mubr.bf16.mxu0 %v4235_v52  ;;  %2044 = vmatprep.mubr.bf16.mxu1 %v4237_v0  ;;  %v4246_v52 = vld [vmem:[%s6014_s0 + $0x25c] ss:$36 sps:$4 sm:$0xff]  }
  0xd9   :  { %3692 = vmatpush3.bf16.msra.mxu0 %v4775_v34  ;;  %3732 = vmatpush3.bf16.msra.mxu1 %v6048_v42  ;;  %v4241_v34 = vld [vmem:[%s6014_s0 + $0x250] ss:$36 sps:$4 sm:$0xff]   ;;  %v4252_v42 = vld [vmem:[%s6014_s0 + $0x2a0] ss:$36 sps:$4 sm:$0xff]  }
  0xda   :  { %3693 = vmatprep.subr.bf16.mxu0 %v4800_v56  ;;  %3733 = vmatprep.subr.bf16.mxu1 %v6049_v43  ;;  %v4244_v56 = vld [vmem:[%s6014_s0 + $0x258] ss:$36 sps:$4 sm:$0xff]   ;;  %v4256_v43 = vld [vmem:[%s6014_s0 + $0x2ec] ss:$36 sps:$4 sm:$0xff]  }
  0xdc   :  { %1980 = vmatmul.mubr.bf16.gmra.mrb[84].mxu0 %v4239_v62  ;;  %2045 = vmatmul.mubr.bf16.gmra.mrb[84].mxu1 %v4240_v21 }
  0xdd   :  { %3694 = vmatpush3.bf16.msra.mxu0 %v4811_v58  ;;  %3734 = vmatpush3.bf16.msra.mxu1 %v6050_v50  ;;  %v4247_v58 = vld [vmem:[%s6014_s0 + $0x29c] ss:$36 sps:$4 sm:$0xff]  }
  0xde   :  { %3695 = vmatprep.subr.bf16.mxu0 %v4823_v44  ;;  %3735 = vmatprep.subr.bf16.mxu1 %v6051_v51  ;;  %v4250_v44 = vld [vmem:[%s6014_s0 + $0x2a4] ss:$36 sps:$4 sm:$0xff]  }
  0xdf   :  { %2085 = vmatprep.mubr.bf16.mxu0 %v4243_v39  ;;  %2150 = vmatprep.mubr.bf16.mxu1 %v4246_v52  ;;  %v4259_v52 = vld [vmem:[%s6014_s0 + $0x32c] ss:$36 sps:$4 sm:$0xff]  }
  0xe1   :  { %3696 = vmatpush3.bf16.msra.mxu0 %v4835_v46  ;;  %3736 = vmatpush3.bf16.msra.mxu1 %v6052_v54  ;;  %v4249_v46 = vld [vmem:[%s6014_s0 + $0x298] ss:$36 sps:$4 sm:$0xff]  }
  0xe2   :  { %3993 = vmatprep.subr.bf16.mxu0 %v4861_v33  ;;  %3773 = vmatprep.subr.bf16.mxu1 %v5128_v55 }
  0xe4   :  { %2086 = vmatmul.mubr.bf16.vlgmr.msra.gmra.mrb[88].mxu0 %v4241_v34  ;;  %2151 = vmatmul.mubr.bf16.vlgmr.msra.gmra.mrb[88].mxu1 %v4244_v56  ;;  %v4262_v34 = vld [vmem:[%s6014_s0 + $0x334] ss:$36 sps:$4 sm:$0xff]  }
  0xe5   :  { %3994 = vmatpush3.bf16.msra.mxu0 %v4861_v33  ;;  %3774 = vmatpush3.bf16.msra.mxu1 %v5146_v63  ;;  %v4253_v33 = vld [vmem:[%s6014_s0 + $0x2e4] ss:$36 sps:$4 sm:$0xff]  }
  0xe6   :  { %3995 = vmatprep.subr.bf16.mxu0 %v4866_v47  ;;  %3775 = vmatprep.subr.bf16.mxu1 %v5158_v57 }
  0xe7   :  { %2093 = vmatprep.mubr.bf16.mxu0 %v4247_v58  ;;  %2158 = vmatprep.mubr.bf16.mxu1 %v4250_v44 }
  0xe9   :  { %3996 = vmatpush3.bf16.msra.mxu0 %v4866_v47  ;;  %3776 = vmatpush3.bf16.msra.mxu1 %v5176_v35 }
  0xea   :  { %3997 = vmatprep.subr.bf16.mxu0 %v4885_v59  ;;  %3777 = vmatprep.subr.bf16.mxu1 %v5188_v2 }
  0xec   :  { %2094 = vmatmul.mubr.bf16.gmra.mrb[92].mxu0 %v4249_v46  ;;  %2159 = vmatmul.mubr.bf16.gmra.mrb[92].mxu1 %v4252_v42  ;;  %v4261_v46 = vld [vmem:[%s6014_s0 + $0x328] ss:$36 sps:$4 sm:$0xff]  }
  0xed   :  { %3998 = vmatpush3.bf16.msra.mxu0 %v4885_v59  ;;  %3778 = vmatpush3.bf16.msra.mxu1 %v5206_v24  ;;  %v4255_v59 = vld [vmem:[%s6014_s0 + $0x2e0] ss:$36 sps:$4 sm:$0xff]   ;;  %v4258_v24 = vld [vmem:[%s6014_s0 + $0x2e8] ss:$36 sps:$4 sm:$0xff]  }
  0xee   :  { %3999 = vmatprep.subr.bf16.mxu0 %v4899_v4  ;;  %3779 = vmatprep.subr.bf16.mxu1 %v5218_v28 }
  0xef   :  { %2101 = vmatprep.mubr.bf16.mxu0 %v4253_v33  ;;  %2166 = vmatprep.mubr.bf16.mxu1 %v4256_v43 }
  0xf1   :  { %4000 = vmatpush3.bf16.msra.mxu0 %v4899_v4  ;;  %3780 = vmatpush3.bf16.msra.mxu1 %v5233_v3 }
  0xf2   :  { %4001 = vmatprep.subr.bf16.mxu0 %v4915_v8  ;;  %3781 = vmatprep.subr.bf16.mxu1 %v5245_v7 }
  0xf4   :  { %2102 = vmatmul.mubr.bf16.gmra.mrb[96].mxu0 %v4255_v59  ;;  %2167 = vmatmul.mubr.bf16.gmra.mrb[96].mxu1 %v4258_v24 }
  0xf5   :  { %4002 = vmatpush3.bf16.msra.mxu0 %v4915_v8  ;;  %3782 = vmatpush3.bf16.msra.mxu1 %v5260_v13  ;;  %v4264_v8 = vld [vmem:[%s6014_s0 + $0x330] ss:$36 sps:$4 sm:$0xff]  }
  0xf6   :  { %v3273_v50 = vpop.f32.mrb[0].mxu0  ;;  %4003 = vmatprep.subr.bf16.mxu0 %v4929_v12  ;;  %3783 = vmatprep.subr.bf16.mxu1 %v5272_v17 }
  0xf7   :  { %v3313_v51 = vpop.f32.mrb[0].mxu1  ;;  %v3274_v54 = vpop.f32.mrb[1].mxu0  ;;  %2109 = vmatprep.mubr.bf16.mxu0 %v4259_v52  ;;  %2174 = vmatprep.mubr.bf16.mxu1 %v4262_v34  ;;  %v4283_v52 = vld [vmem:[%s6014_s0 + $0x36c] ss:$36 sps:$4 sm:$0xff]  }
  0xf8   :  { %v3275_v47 = vadd.f32 %v3274_v54, %v3273_v50  ;;  %v3314_v55 = vpop.f32.mrb[1].mxu1  ;;  %v3276_v63 = vpop.f32.mrb[2].mxu0  ;;  %v4265_v54 = vld [vmem:[%s6014_s0 + $0x260] ss:$36 sps:$4 sm:$0xff]  }
  0xf9   :  { %v3315_v57 = vadd.f32 %v3314_v55, %v3313_v51  ;;  %v3316_v35 = vpop.f32.mrb[2].mxu1  ;;  %v3277_v2 = vpop.f32.mrb[3].mxu0  ;;  %4004 = vmatpush3.bf16.msra.mxu0 %v4929_v12  ;;  %3784 = vmatpush3.bf16.msra.mxu1 %v5287_v23  ;;  %v4266_v23 = vld [vmem:[%s6014_s0 + $0x2a8] ss:$36 sps:$4 sm:$0xff]  }
  0xfa   :  { %v3278_v0 = vadd.f32 %v3277_v2, %v3276_v63  ;;  %v3317_v62 = vpop.f32.mrb[3].mxu1  ;;  %4005 = vmatprep.subr.bf16.mxu0 %v4945_v16  ;;  %3785 = vmatprep.subr.bf16.mxu1 %v5299_v27  ;;  %v4267_v27 = vld [vmem:[%s6014_s0 + $0x360] ss:$36 sps:$4 sm:$0xff]  }
  0xfb   :  { %v5576_v21 = vadd.f32 %v3315_v57, %v3275_v47  ;;  %v3318_v39 = vadd.f32 %v3317_v62, %v3316_v35  ;;  %v4269_v47 = vld [vmem:[%s6014_s0 + $0x364] ss:$36 sps:$4 sm:$0xff]   ;;  %v4270_v62 = vld [vmem:[%s6014_s0 + $0x2f0] ss:$36 sps:$4 sm:$0xff]  }
  0xfc   :  { %2110 = vmatmul.mubr.bf16.gmra.mrb[100].mxu0 %v4261_v46  ;;  %2175 = vmatmul.mubr.bf16.gmra.mrb[100].mxu1 %v4264_v8 }
  0xfd   :  { %v5582_v28 = vadd.f32 %v3318_v39, %v3278_v0  ;;  %4006 = vmatpush3.bf16.msra.mxu0 %v4945_v16  ;;  %3786 = vmatpush3.bf16.msra.mxu1 %v5314_v36  ;;  %v4271_v39 = vld [vmem:[%s6014_s0 + $0x338] ss:$36 sps:$4 sm:$0xff]  }
  0xfe   :  { %v3279_v4 = vpop.f32.mrb[4].mxu0  ;;  %4007 = vmatprep.subr.bf16.mxu0 %v4959_v20  ;;  %3787 = vmatprep.subr.bf16.mxu1 %v5326_v38 }
  0xff   :  { %v3319_v3 = vpop.f32.mrb[4].mxu1  ;;  %v3280_v7 = vpop.f32.mrb[5].mxu0  ;;  %4009 = vmatprep.mubr.bf16.mxu0 %v4265_v54  ;;  %2513 = vmatprep.mubr.bf16.mxu1 %v4269_v47  ;;  %v6065_v54 = vld [vmem:[#allocation2_spill] sm:$0xff] }
 0x100   :  { %v3281_v56 = vadd.f32 %v3280_v7, %v3279_v4  ;;  %v3320_v58 = vpop.f32.mrb[5].mxu1  ;;  %v3282_v44 = vpop.f32.mrb[6].mxu0 }
 0x101   :  { %v3321_v13 = vadd.f32 %v3320_v58, %v3319_v3  ;;  %v3322_v42 = vpop.f32.mrb[6].mxu1  ;;  %v3283_v33 = vpop.f32.mrb[7].mxu0  ;;  %4008 = vmatpush3.bf16.msra.mxu0 %v4959_v20  ;;  %3788 = vmatpush3.bf16.msra.mxu1 %v5344_v49  ;;  %v4272_v20 = vld [vmem:[%s6014_s0 + $0x3ac] ss:$36 sps:$4 sm:$0xff]  }
 0x102   :  { %v3284_v17 = vadd.f32 %v3283_v33, %v3282_v44  ;;  %v3323_v43 = vpop.f32.mrb[7].mxu1  ;;  %3813 = vmatprep.subr.bf16.mxu0 %v5134_v60  ;;  %3853 = vmatprep.subr.bf16.mxu1 %v5356_v53 }
 0x103   :  { %v5604_v50 = vadd.f32 %v3321_v13, %v3281_v56  ;;  %v3324_v51 = vadd.f32 %v3323_v43, %v3322_v42  ;;  %v4280_v13 = vld [vmem:[%s6014_s0 + $0x438] ss:$36 sps:$4 sm:$0xff]  }
 0x104   :  { %4010 = vmatmul.mubr.bf16.vlgmr.msra.gmra.mrb[104].mxu0 %v4266_v23  ;;  %2514 = vmatmul.mubr.bf16.vlgmr.msra.gmra.mrb[104].mxu1 %v4267_v27 }
 0x105   :  { %v5612_v12 = vadd.f32 %v3324_v51, %v3284_v17  ;;  %3814 = vmatpush3.bf16.msra.mxu0 %v5152_v32  ;;  %3854 = vmatpush3.bf16.msra.mxu1 %v5374_v10  ;;  %v4274_v32 = vld [vmem:[%s6014_s0 + $0x3a8] ss:$36 sps:$4 sm:$0xff]   ;;  %v4375_v17 = vld [vmem:[%s6013_s1 + $0x170] sm:$0xff]  }
 0x106   :  { %v3285_v55 = vpop.f32.mrb[8].mxu0  ;;  %3815 = vmatprep.subr.bf16.mxu0 %v5164_v6  ;;  %3855 = vmatprep.subr.bf16.mxu1 %v5386_v22  ;;  %v4275_v22 = vld [vmem:[%s6014_s0 + $0x3f4] ss:$36 sps:$4 sm:$0xff]  }
 0x107   :  { %v3325_v16 = vpop.f32.mrb[8].mxu1  ;;  %v3286_v36 = vpop.f32.mrb[9].mxu0  ;;  %4013 = vmatprep.mubr.bf16.mxu0 %v4270_v62  ;;  %2521 = vmatprep.mubr.bf16.mxu1 %v4272_v20  ;;  %v6067_v62 = vld [vmem:[#allocation4_spill] sm:$0xff] }
 0x108   :  { %v3287_v38 = vadd.f32 %v3286_v36, %v3285_v55  ;;  %v3326_v63 = vpop.f32.mrb[9].mxu1  ;;  %v3288_v57 = vpop.f32.mrb[10].mxu0  ;;  %v4377_v55 = vld [vmem:[%s6013_s1 + $0x178] sm:$0xff]  }
 0x109   :  { %v3327_v35 = vadd.f32 %v3326_v63, %v3325_v16  ;;  %v3328_v2 = vpop.f32.mrb[10].mxu1  ;;  %v3289_v0 = vpop.f32.mrb[11].mxu0  ;;  %3816 = vmatpush3.bf16.msra.mxu0 %v5182_v14  ;;  %3856 = vmatpush3.bf16.msra.mxu1 %v5404_v31 }
 0x10a   :  { %v3290_v49 = vadd.f32 %v3289_v0, %v3288_v57  ;;  %v3329_v60 = vpop.f32.mrb[11].mxu1  ;;  %3817 = vmatprep.subr.bf16.mxu0 %v5194_v18  ;;  %3857 = vmatprep.subr.bf16.mxu1 %v5416_v48 }
 0x10b   :  { %v5636_v53 = vadd.f32 %v3327_v35, %v3287_v38  ;;  %v3330_v59 = vadd.f32 %v3329_v60, %v3328_v2  ;;  %v4281_v35 = vld [vmem:[%s6014_s0 + $0x368] ss:$36 sps:$4 sm:$0xff]   ;;  %v4284_v2 = vld [vmem:[%s6014_s0 + $0x370] ss:$36 sps:$4 sm:$0xff]  }
 0x10c   :  { %4014 = vmatmul.mubr.bf16.gmra.mrb[108].mxu0 %v4271_v39  ;;  %2522 = vmatmul.mubr.bf16.gmra.mrb[108].mxu1 %v4274_v32  ;;  %v6068_v32 = vld [vmem:[#allocation5_spill] sm:$0xff] }
 0x10d   :  { %v5640_v24 = vadd.f32 %v3330_v59, %v3290_v49  ;;  %3818 = vmatpush3.bf16.msra.mxu0 %v5212_v26  ;;  %3858 = vmatpush3.bf16.msra.mxu1 %v5434_v30  ;;  %v4277_v26 = vld [vmem:[%s6014_s0 + $0x3f0] ss:$36 sps:$4 sm:$0xff]   ;;  %v4378_v59 = vld [vmem:[%s6013_s1 + $0x138] sm:$0xff]  }
 0x10e   :  { %v3291_v6 = vpop.f32.mrb[12].mxu0  ;;  %3819 = vmatprep.subr.bf16.mxu0 %v5224_v1  ;;  %3859 = vmatprep.subr.bf16.mxu1 %v5446_v45  ;;  %v4278_v1 = vld [vmem:[%s6014_s0 + $0x43c] ss:$36 sps:$4 sm:$0xff]  }
 0x10f   :  { %v3331_v10 = vpop.f32.mrb[12].mxu1  ;;  %v3292_v34 = vpop.f32.mrb[13].mxu0  ;;  %2529 = vmatprep.mubr.bf16.mxu1 %v4275_v22  ;;  %2578 = vmatprep.mubr.bf16.mxu0 %v4283_v52  ;;  %v4290_v52 = vld [vmem:[%s6014_s0 + $0x3bc] ss:$36 sps:$4 sm:$0xff]  }
 0x110   :  { %v3332_v14 = vpop.f32.mrb[13].mxu1  ;;  %v3293_v18 = vadd.f32 %v3292_v34, %v3291_v6  ;;  %v3294_v48 = vpop.f32.mrb[14].mxu0  ;;  %v4379_v6 = vld [vmem:[%s6013_s1 + $0x200] sm:$0xff]  }
 0x111   :  { %v3333_v31 = vadd.f32 %v3332_v14, %v3331_v10  ;;  %v3334_v4 = vpop.f32.mrb[14].mxu1  ;;  %v3295_v3 = vpop.f32.mrb[15].mxu0  ;;  %3820 = vmatpush3.bf16.msra.mxu0 %v5239_v5  ;;  %3860 = vmatpush3.bf16.msra.mxu1 %v5464_v61  ;;  %v6069_v14 = vld [vmem:[#allocation6_spill] sm:$0xff] }
 0x112   :  { %v3335_v7 = vpop.f32.mrb[15].mxu1  ;;  %v3296_v58 = vadd.f32 %v3295_v3, %v3294_v48  ;;  %3821 = vmatprep.subr.bf16.mxu0 %v5251_v9  ;;  %3861 = vmatprep.subr.bf16.mxu1 %v5476_v41 }
 0x113   :  { %v5662_v56 = vadd.f32 %v3333_v31, %v3293_v18  ;;  %v3336_v44 = vadd.f32 %v3335_v7, %v3334_v4  ;;  %v6070_v4 = vld [vmem:[#allocation7_spill] sm:$0xff] }
 0x114   :  { %2530 = vmatmul.mubr.bf16.gmra.mrb[112].mxu1 %v4277_v26 }
 0x115   :  { %v5668_v30 = vadd.f32 %v3336_v44, %v3296_v58  ;;  %3822 = vmatpush3.bf16.msra.mxu0 %v5266_v15  ;;  %3862 = vmatpush3.bf16.msra.mxu1 %v5494_v40  ;;  %v4380_v58 = vld [vmem:[%s6013_s1 + $0x208] sm:$0xff]  }
 0x116   :  { %v3353_v45 = vpop.f32.mrb[16].mxu0  ;;  %3823 = vmatprep.subr.bf16.mxu0 %v5278_v19  ;;  %3863 = vmatprep.subr.bf16.mxu1 %v5506_v37  ;;  %v4374_v19 = vld [vmem:[%s6013_s1 + $0x128] sm:$0xff]  }
 0x117   :  { %v3354_v46 = vpop.f32.mrb[17].mxu0  ;;  %v3393_v9 = vpop.f32.mrb[16].mxu1  ;;  %2537 = vmatprep.mubr.bf16.mxu1 %v4278_v1  ;;  %v4289_v1 = vld [vmem:[%s6014_s0 + $0x3b0] ss:$36 sps:$4 sm:$0xff]  }
 0x118   :  { %v3355_v5 = vadd.f32 %v3354_v46, %v3353_v45  ;;  %v3356_v61 = vpop.f32.mrb[18].mxu0  ;;  %v3394_v8 = vpop.f32.mrb[17].mxu1  ;;  %v4292_v45 = vld [vmem:[%s6014_s0 + $0x3b8] ss:$36 sps:$4 sm:$0xff]  }
 0x119   :  { %v3357_v41 = vpop.f32.mrb[19].mxu0  ;;  %3824 = vmatpush3.bf16.msra.mxu0 %v5293_v25  ;;  %v3395_v42 = vadd.f32 %v3394_v8, %v3393_v9  ;;  %v3396_v33 = vpop.f32.mrb[18].mxu1  ;;  %3864 = vmatpush3.bf16.msra.mxu1 %v4374_v19  ;;  %v4286_v25 = vld [vmem:[%s6014_s0 + $0x374] ss:$36 sps:$4 sm:$0xff]  }
 0x11a   :  { %v980_v15 = vadd.f32 %v3355_v5, %v5576_v21  ;;  %v3358_v40 = vadd.f32 %v3357_v41, %v3356_v61  ;;  %v3397_v37 = vpop.f32.mrb[19].mxu1  ;;  %3825 = vmatprep.subr.bf16.mxu0 %v5305_v29  ;;  %3865 = vmatprep.subr.bf16.mxu1 %v4375_v17  ;;  %v4376_v29 = vld [vmem:[%s6013_s1 + $0x130] sm:$0xff]  }
 0x11b   :  { %v3398_v43 = vadd.f32 %v3397_v37, %v3396_v33  ;;  %v6071_v5 = vld [vmem:[#allocation8_spill] sm:$0xff]  ;;  %v4296_v33 = vld [vmem:[%s6014_s0 + $0x404] ss:$36 sps:$4 sm:$0xff]  }
 0x11c   :  { %v983_v21 = vadd.f32 %v3358_v40, %v5582_v28  ;;  %v5696_v51 = vadd.f32 %v3395_v42, %v980_v15  ;;  %2538 = vmatmul.mubr.bf16.gmra.mrb[116].mxu1 %v4280_v13  ;;  %v6066_v28 = vld [vmem:[#allocation3_spill] sm:$0xff]  ;;  %v6072_v13 = vld [vmem:[#allocation9_spill] sm:$0xff]  ;;  %v4381_v15 = vld [vmem:[%s6013_s1 + $0x210] sm:$0xff]  }
 0x11d   :  { %3826 = vmatpush3.bf16.msra.mxu0 %v6065_v54  ;;  %3866 = vmatpush3.bf16.msra.mxu1 %v4376_v29  ;;  %v4293_v40 = vld [vmem:[%s6014_s0 + $0x3fc] ss:$36 sps:$4 sm:$0xff]  }
 0x11e   :  { %v3359_v47 = vpop.f32.mrb[20].mxu0  ;;  %v5702_v23 = vadd.f32 %v3398_v43, %v983_v21  ;;  %3827 = vmatprep.subr.bf16.mxu0 %v6066_v28  ;;  %3867 = vmatprep.subr.bf16.mxu1 %v4377_v55  ;;  %v6073_v37 = vld [vmem:[#allocation10_spill] sm:$0xff]  ;;  %v4382_v29 = vld [vmem:[%s6013_s1 + $0x218] sm:$0xff]  }
 0x11f   :  { %v3360_v27 = vpop.f32.mrb[21].mxu0  ;;  %v3399_v38 = vpop.f32.mrb[20].mxu1  ;;  %2643 = vmatprep.mubr.bf16.mxu1 %v4286_v25  ;;  %v6074_v25 = vld [vmem:[#allocation11_spill] sm:$0xff]  ;;  %v4295_v55 = vld [vmem:[%s6014_s0 + $0x3f8] ss:$36 sps:$4 sm:$0xff]  }
 0x120   :  { %v3361_v16 = vadd.f32 %v3360_v27, %v3359_v47  ;;  %v3362_v36 = vpop.f32.mrb[22].mxu0  ;;  %v3400_v57 = vpop.f32.mrb[21].mxu1 }
 0x121   :  { %v3363_v63 = vpop.f32.mrb[23].mxu0  ;;  %3828 = vmatpush3.bf16.msra.mxu0 %v6067_v62  ;;  %v3401_v49 = vadd.f32 %v3400_v57, %v3399_v38  ;;  %v3402_v60 = vpop.f32.mrb[22].mxu1  ;;  %3868 = vmatpush3.bf16.msra.mxu1 %v4378_v59  ;;  %v6075_v38 = vld [vmem:[#allocation12_spill] sm:$0xff]  ;;  %v4383_v62 = vld [vmem:[%s6013_s1 + $0x220] sm:$0xff]  }
 0x122   :  { %v988_v0 = vadd.f32 %v3361_v16, %v5604_v50  ;;  %v3364_v20 = vadd.f32 %v3363_v63, %v3362_v36  ;;  %v3403_v39 = vpop.f32.mrb[23].mxu1  ;;  %3893 = vmatprep.subr.bf16.mxu0 %v6068_v32  ;;  %4017 = vmatprep.subr.bf16.mxu1 %v4379_v6  ;;  %v4287_v50 = vld [vmem:[%s6014_s0 + $0x3b4] ss:$36 sps:$4 sm:$0xff]   ;;  %v4298_v16 = vld [vmem:[%s6014_s0 + $0x400] ss:$36 sps:$4 sm:$0xff]   ;;  %v4384_v32 = vld [vmem:[%s6013_s1 + $0x1e8] sm:$0xff]  }
 0x123   :  { %v3404_v22 = vadd.f32 %v3403_v39, %v3402_v60  ;;  %v4302_v60 = vld [vmem:[%s6014_s0 + $0x44c] ss:$36 sps:$4 sm:$0xff]  }
 0x124   :  { %v991_v10 = vadd.f32 %v3364_v20, %v5612_v12  ;;  %v5730_v34 = vadd.f32 %v3401_v49, %v988_v0  ;;  %2579 = vmatmul.mubr.bf16.vlgmr.msra.gmra.mrb[112].mxu0 %v4281_v35  ;;  %2644 = vmatmul.mubr.bf16.vlgmr.msra.gmra.mrb[120].mxu1 %v4284_v2  ;;  %v6076_v0 = vld [vmem:[#allocation13_spill] sm:$0xff]  ;;  %v4299_v20 = vld [vmem:[%s6014_s0 + $0x444] ss:$36 sps:$4 sm:$0xff]  }
 0x125   :  { %3894 = vmatpush3.bf16.msra.mxu0 %v6069_v14  ;;  %4018 = vmatpush3.bf16.msra.mxu1 %v4379_v6 }
 0x126   :  { %v3365_v18 = vpop.f32.mrb[24].mxu0  ;;  %v5733_v31 = vadd.f32 %v3404_v22, %v991_v10  ;;  %3895 = vmatprep.subr.bf16.mxu0 %v6070_v4  ;;  %2586 = vmatprep.mubr.bf16.mxu0 %v4287_v50  ;;  %v4301_v22 = vld [vmem:[%s6014_s0 + $0x440] ss:$36 sps:$4 sm:$0xff]   ;;  %v4386_v4 = vld [vmem:[%s6013_s1 + $0x1a8] sm:$0xff]  }
 0x127   :  { %v3366_v48 = vpop.f32.mrb[25].mxu0  ;;  %v3405_v7 = vpop.f32.mrb[24].mxu1  ;;  %4019 = vmatprep.subr.bf16.mxu1 %v4380_v58  ;;  %2651 = vmatprep.mubr.bf16.mxu1 %v4290_v52  ;;  %v4304_v52 = vld [vmem:[%s6014_s0 + $0x448] ss:$36 sps:$4 sm:$0xff]  }
 0x128   :  { %v3367_v12 = vadd.f32 %v3366_v48, %v3365_v18  ;;  %v3368_v3 = vpop.f32.mrb[26].mxu0  ;;  %v3406_v26 = vpop.f32.mrb[25].mxu1 }
 0x129   :  { %v3369_v44 = vpop.f32.mrb[27].mxu0  ;;  %3896 = vmatpush3.bf16.msra.mxu0 %v6071_v5  ;;  %v3407_v9 = vadd.f32 %v3406_v26, %v3405_v7  ;;  %v3408_v41 = vpop.f32.mrb[26].mxu1  ;;  %4020 = vmatpush3.bf16.msra.mxu1 %v4380_v58  ;;  %v4387_v58 = vld [vmem:[%s6013_s1 + $0x1f0] sm:$0xff]   ;;  %v4390_v5 = vld [vmem:[%s6013_s1 + $0x1f8] sm:$0xff]  }
 0x12a   :  { %v996_v46 = vadd.f32 %v3367_v12, %v5636_v53  ;;  %v3370_v61 = vadd.f32 %v3369_v44, %v3368_v3  ;;  %v3409_v8 = vpop.f32.mrb[27].mxu1  ;;  %3897 = vmatprep.subr.bf16.mxu0 %v6072_v13  ;;  %4021 = vmatprep.subr.bf16.mxu1 %v4381_v15  ;;  %v4307_v44 = vld [vmem:[%s6014_s0 + $0x37c] ss:$36 sps:$4 sm:$0xff]  }
 0x12b   :  { %v3410_v42 = vadd.f32 %v3409_v8, %v3408_v41  ;;  %v4305_v13 = vld [vmem:[%s6014_s0 + $0x378] ss:$36 sps:$4 sm:$0xff]  }
 0x12c   :  { %v999_v53 = vadd.f32 %v3370_v61, %v5640_v24  ;;  %v5758_v19 = vadd.f32 %v3407_v9, %v996_v46  ;;  %2587 = vmatmul.mubr.bf16.gmra.mrb[116].mxu0 %v4289_v1  ;;  %2652 = vmatmul.mubr.bf16.gmra.mrb[124].mxu1 %v4292_v45  ;;  %v4389_v46 = vld [vmem:[%s6013_s1 + $0x1b0] sm:$0xff]   ;;  %v4391_v61 = vld [vmem:[%s6013_s1 + $0x238] sm:$0xff]  }
 0x12d   :  { %3898 = vmatpush3.bf16.msra.mxu0 %v6073_v37  ;;  %4022 = vmatpush3.bf16.msra.mxu1 %v4381_v15  ;;  %v4309_v15 = vld [vmem:[%s6014_s0 + $0x3c8] ss:$36 sps:$4 sm:$0xff]  }
 0x12e   :  { %v3371_v17 = vpop.f32.mrb[28].mxu0  ;;  %v5761_v21 = vadd.f32 %v3410_v42, %v999_v53  ;;  %3899 = vmatprep.subr.bf16.mxu0 %v6074_v25  ;;  %2594 = vmatprep.mubr.bf16.mxu0 %v4293_v40  ;;  %v4310_v37 = vld [vmem:[%s6014_s0 + $0x3c4] ss:$36 sps:$4 sm:$0xff]   ;;  %v4316_v25 = vld [vmem:[%s6014_s0 + $0x410] ss:$36 sps:$4 sm:$0xff]  }
 0x12f   :  { %v3372_v43 = vpop.f32.mrb[29].mxu0  ;;  %v3411_v47 = vpop.f32.mrb[28].mxu1  ;;  %4023 = vmatprep.subr.bf16.mxu1 %v4382_v29  ;;  %2659 = vmatprep.mubr.bf16.mxu1 %v4296_v33  ;;  %v4392_v33 = vld [vmem:[%s6013_s1 + $0x1b8] sm:$0xff]  }
 0x130   :  { %v3373_v24 = vadd.f32 %v3372_v43, %v3371_v17  ;;  %v3374_v54 = vpop.f32.mrb[30].mxu0  ;;  %v3412_v28 = vpop.f32.mrb[29].mxu1 }
 0x131   :  { %v3375_v27 = vpop.f32.mrb[31].mxu0  ;;  %3900 = vmatpush3.bf16.msra.mxu0 %v6075_v38  ;;  %v3413_v57 = vadd.f32 %v3412_v28, %v3411_v47  ;;  %v3414_v35 = vpop.f32.mrb[30].mxu1  ;;  %4024 = vmatpush3.bf16.msra.mxu1 %v4382_v29  ;;  %v4312_v28 = vld [vmem:[%s6014_s0 + $0x3c0] ss:$36 sps:$4 sm:$0xff]  }
 0x132   :  { %v1004_v36 = vadd.f32 %v3373_v24, %v5662_v56  ;;  %v3376_v63 = vadd.f32 %v3375_v27, %v3374_v54  ;;  %v3415_v2 = vpop.f32.mrb[31].mxu1  ;;  %3901 = vmatprep.subr.bf16.mxu0 %v6076_v0  ;;  %4025 = vmatprep.subr.bf16.mxu1 %v4383_v62 }
 0x133   :  { %v3416_v49 = vadd.f32 %v3415_v2, %v3414_v35  ;;  %v4315_v2 = vld [vmem:[%s6014_s0 + $0x408] ss:$36 sps:$4 sm:$0xff]  }
 0x134   :  { %v1007_v56 = vadd.f32 %v3376_v63, %v5668_v30  ;;  %v1069_v59 = vadd.f32 %v3413_v57, %v1004_v36  ;;  %2595 = vmatmul.mubr.bf16.gmra.mrb[120].mxu0 %v4295_v55  ;;  %2660 = vmatmul.mubr.bf16.gmra.mrb[128].mxu1 %v4298_v16  ;;  %v4385_v30 = vld [vmem:[%s6013_s1 + $0x228] sm:$0xff]   ;;  %v4317_v16 = vld [vmem:[%s6014_s0 + $0x458] ss:$36 sps:$4 sm:$0xff]  }
 0x135   :  { %3902 = vmatpush3.bf16.msra.mxu0 %v5500_v11  ;;  %4026 = vmatpush3.bf16.msra.mxu1 %v4383_v62 }
 0x136   :  { %v1072_v39 = vadd.f32 %v3416_v49, %v1007_v56  ;;  %3903 = vmatprep.subr.bf16.mxu0 %v4384_v32  ;;  %2602 = vmatprep.mubr.bf16.mxu0 %v4299_v20  ;;  %v4318_v56 = vld [vmem:[%s6014_s0 + $0x454] ss:$36 sps:$4 sm:$0xff]  }
 0x137   :  { %v3963_v6 = vpop.f32.mrb[32].mxu0  ;;  %4027 = vmatprep.subr.bf16.mxu1 %v4385_v30  ;;  %2667 = vmatprep.mubr.bf16.mxu1 %v4302_v60  ;;  %v3445_v50 = vpop.f32.mrb[32].mxu1 }
 0x138   :  { %v5794_v10 = vadd.f32 %v3963_v6, %v5730_v34  ;;  %v1109_v11 = vpop.f32.mrb[33].mxu0  ;;  %v3446_v14 = vpop.f32.mrb[33].mxu1 }
 0x139   :  { %v5803_v18 = vadd.f32 %v1109_v11, %v5696_v51  ;;  %v3964_v48 = vpop.f32.mrb[34].mxu0  ;;  %3904 = vmatpush3.bf16.msra.mxu0 %v4386_v4  ;;  %4028 = vmatpush3.bf16.msra.mxu1 %v4385_v30  ;;  %v5808_v34 = vadd.f32 %v3446_v14, %v3445_v50  ;;  %v3448_v12 = vpop.f32.mrb[34].mxu1  ;;  %v4388_v51 = vld [vmem:[%s6013_s1 + $0x230] sm:$0xff]  }
 0x13a   :  { %v5811_v3 = vadd.f32 %v3964_v48, %v5733_v31  ;;  %v1112_v7 = vpop.f32.mrb[35].mxu0  ;;  %3905 = vmatprep.subr.bf16.mxu0 %v4387_v58  ;;  %4029 = vmatprep.subr.bf16.mxu1 %v4388_v51  ;;  %v3449_v26 = vpop.f32.mrb[35].mxu1  ;;  %v4308_v31 = vld [vmem:[%s6014_s0 + $0x380] ss:$36 sps:$4 sm:$0xff]   ;;  %v4320_v30 = vld [vmem:[%s6014_s0 + $0x450] ss:$36 sps:$4 sm:$0xff]  }
 0x13b   :  { %v5823_v1 = vadd.f32 %v1112_v7, %v5702_v23  ;;  %v5828_v45 = vadd.f32 %v3449_v26, %v3448_v12 }
 0x13c   :  { %2603 = vmatmul.mubr.bf16.gmra.mrb[124].mxu0 %v4301_v22  ;;  %2668 = vmatmul.mubr.bf16.gmra.mrb[132].mxu1 %v4304_v52 }
 0x13d   :  { %3906 = vmatpush3.bf16.msra.mxu0 %v4389_v46  ;;  %4030 = vmatpush3.bf16.msra.mxu1 %v4388_v51 }
 0x13e   :  { %3907 = vmatprep.subr.bf16.mxu0 %v4390_v5  ;;  %2708 = vmatprep.mubr.bf16.mxu0 %v4307_v44 }
 0x13f   :  { %v3967_v23 = vpop.f32.mrb[36].mxu0  ;;  %4031 = vmatprep.subr.bf16.mxu1 %v4391_v61  ;;  %4033 = vmatprep.mubr.bf16.mxu1 %v4308_v31  ;;  %v3451_v9 = vpop.f32.mrb[36].mxu1 }
 0x140   :  { %v5839_v41 = vadd.f32 %v3967_v23, %v1069_v59  ;;  %v1125_v8 = vpop.f32.mrb[37].mxu0  ;;  %v3452_v40 = vpop.f32.mrb[37].mxu1 }
 0x141   :  { %v5848_v53 = vadd.f32 %v1125_v8, %v5758_v19  ;;  %v3968_v42 = vpop.f32.mrb[38].mxu0  ;;  %3908 = vmatpush3.bf16.msra.mxu0 %v4392_v33  ;;  %4032 = vmatpush3.bf16.msra.mxu1 %v4391_v61  ;;  %v3453_v17 = vadd.f32 %v3452_v40, %v3451_v9  ;;  %v3454_v43 = vpop.f32.mrb[38].mxu1 }
 0x142   :  { %v5859_v24 = vadd.f32 %v3968_v42, %v1072_v39  ;;  %v1128_v19 = vpop.f32.mrb[39].mxu0  ;;  %v3455_v54 = vpop.f32.mrb[39].mxu1 }
 0x143   :  { %v5862_v47 = vadd.f32 %v1128_v19, %v5761_v21  ;;  %v3456_v29 = vadd.f32 %v3455_v54, %v3454_v43  ;;  %v4313_v21 = vld [vmem:[%s6014_s0 + $0x40c] ss:$36 sps:$4 sm:$0xff]  }
 0x144   :  { %2709 = vmatmul.mubr.bf16.vlgmr.msra.gmra.mrb[128].mxu0 %v4305_v13  ;;  %4034 = vmatmul.mubr.bf16.vlgmr.msra.gmra.mrb[136].mxu1 %v4309_v15 }
 0x145   :  { %2716 = vmatprep.mubr.bf16.mxu0 %v4310_v37  ;;  %4037 = vmatprep.mubr.bf16.mxu1 %v4316_v25 }
 0x147   :  { %v3457_v27 = vpop.f32.mrb[40].mxu1 }
 0x148   :  { %v3458_v55 = vpop.f32.mrb[41].mxu1 }
 0x149   :  { %v3459_v36 = vadd.f32 %v3458_v55, %v3457_v27  ;;  %v3460_v38 = vpop.f32.mrb[42].mxu1 }
 0x14a   :  { %v3461_v63 = vpop.f32.mrb[43].mxu1 }
 0x14b   :  { %v3462_v57 = vadd.f32 %v3461_v63, %v3460_v38 }
 0x14c   :  { %2717 = vmatmul.mubr.bf16.gmra.mrb[132].mxu0 %v4312_v28  ;;  %4038 = vmatmul.mubr.bf16.gmra.mrb[140].mxu1 %v4317_v16 }
 0x14d   :  { %2724 = vmatprep.mubr.bf16.mxu0 %v4313_v21 }
 0x14f   :  { %v3463_v35 = vpop.f32.mrb[44].mxu1 }
 0x150   :  { %v3464_v0 = vpop.f32.mrb[45].mxu1 }
 0x151   :  { %v5876_v62 = vadd.f32 %v3464_v0, %v3463_v35  ;;  %v3466_v20 = vpop.f32.mrb[46].mxu1 }
 0x152   :  { %v3467_v49 = vpop.f32.mrb[47].mxu1 }
 0x153   :  { %v5881_v60 = vadd.f32 %v3467_v49, %v3466_v20 }
 0x154   :  { %2725 = vmatmul.mubr.bf16.gmra.mrb[136].mxu0 %v4315_v2 }
 0x155   :  { %2732 = vmatprep.mubr.bf16.mxu0 %v4318_v56 }
 0x157   :  { %v3485_v59 = vpop.f32.mrb[40].mxu0  ;;  %v3525_v39 = vpop.f32.mrb[48].mxu1 }
 0x158   :  { %v3486_v32 = vpop.f32.mrb[41].mxu0  ;;  %v3526_v6 = vpop.f32.mrb[49].mxu1 }
 0x159   :  { %v3487_v50 = vadd.f32 %v3486_v32, %v3485_v59  ;;  %v3488_v11 = vpop.f32.mrb[42].mxu0  ;;  %v3527_v22 = vadd.f32 %v3526_v6, %v3525_v39  ;;  %v3528_v52 = vpop.f32.mrb[50].mxu1 }
 0x15a   :  { %v3489_v14 = vpop.f32.mrb[43].mxu0  ;;  %v3529_v48 = vpop.f32.mrb[51].mxu1 }
 0x15b   :  { %v1465_v4 = vadd.f32 %v3487_v50, %v5808_v34  ;;  %v3490_v12 = vadd.f32 %v3489_v14, %v3488_v11  ;;  %v3530_v7 = vadd.f32 %v3529_v48, %v3528_v52 }
 0x15c   :  { %2733 = vmatmul.mubr.bf16.gmra.mrb[140].mxu0 %v4320_v30 }
 0x15d   :  { %v1468_v58 = vadd.f32 %v3490_v12, %v5828_v45  ;;  %v1530_v51 = vadd.f32 %v3527_v22, %v1465_v4 }
 0x15f   :  { %v1533_v44 = vadd.f32 %v3530_v7, %v1468_v58  ;;  %v3491_v26 = vpop.f32.mrb[44].mxu0  ;;  %v3531_v31 = vpop.f32.mrb[52].mxu1 }
 0x160   :  { %v3492_v46 = vpop.f32.mrb[45].mxu0  ;;  %v3532_v5 = vpop.f32.mrb[53].mxu1 }
 0x161   :  { %v3493_v23 = vadd.f32 %v3492_v46, %v3491_v26  ;;  %v3494_v61 = vpop.f32.mrb[46].mxu0  ;;  %v3533_v9 = vadd.f32 %v3532_v5, %v3531_v31  ;;  %v3534_v8 = vpop.f32.mrb[54].mxu1 }
 0x162   :  { %v3495_v13 = vpop.f32.mrb[47].mxu0  ;;  %v3535_v15 = vpop.f32.mrb[55].mxu1 }
 0x163   :  { %v1473_v40 = vadd.f32 %v3493_v23, %v3453_v17  ;;  %v3496_v42 = vadd.f32 %v3495_v13, %v3494_v61  ;;  %v3536_v34 = vadd.f32 %v3535_v15, %v3534_v8 }
 0x165   :  { %v1476_v33 = vadd.f32 %v3496_v42, %v3456_v29  ;;  %v1538_v37 = vadd.f32 %v3533_v9, %v1473_v40 }
 0x167   :  { %v1541_v43 = vadd.f32 %v3536_v34, %v1476_v33  ;;  %v3497_v25 = vpop.f32.mrb[48].mxu0  ;;  %v3537_v45 = vpop.f32.mrb[56].mxu1 }
 0x168   :  { %v3498_v19 = vpop.f32.mrb[49].mxu0  ;;  %v3538_v54 = vpop.f32.mrb[57].mxu1 }
 0x169   :  { %v3499_v27 = vadd.f32 %v3498_v19, %v3497_v25  ;;  %v3500_v28 = vpop.f32.mrb[50].mxu0  ;;  %v3539_v55 = vadd.f32 %v3538_v54, %v3537_v45  ;;  %v3540_v16 = vpop.f32.mrb[58].mxu1 }
 0x16a   :  { %v3501_v38 = vpop.f32.mrb[51].mxu0  ;;  %v3541_v21 = vpop.f32.mrb[59].mxu1 }
 0x16b   :  { %v1481_v63 = vadd.f32 %v3499_v27, %v3459_v36  ;;  %v3502_v35 = vadd.f32 %v3501_v38, %v3500_v28  ;;  %v3542_v2 = vadd.f32 %v3541_v21, %v3540_v16 }
 0x16d   :  { %v1484_v0 = vadd.f32 %v3502_v35, %v3462_v57  ;;  %v1546_v17 = vadd.f32 %v3539_v55, %v1481_v63 }
 0x16f   :  { %v1549_v20 = vadd.f32 %v3542_v2, %v1484_v0  ;;  %v3503_v56 = vpop.f32.mrb[52].mxu0  ;;  %v3543_v29 = vpop.f32.mrb[60].mxu1 }
 0x170   :  { %v3504_v49 = vpop.f32.mrb[53].mxu0  ;;  %v3544_v59 = vpop.f32.mrb[61].mxu1 }
 0x171   :  { %v3505_v39 = vadd.f32 %v3504_v49, %v3503_v56  ;;  %v3506_v32 = vpop.f32.mrb[54].mxu0  ;;  %v3545_v6 = vadd.f32 %v3544_v59, %v3543_v29  ;;  %v3546_v30 = vpop.f32.mrb[62].mxu1 }
 0x172   :  { %v3507_v50 = vpop.f32.mrb[55].mxu0  ;;  %v3547_v11 = vpop.f32.mrb[63].mxu1 }
 0x173   :  { %v1489_v22 = vadd.f32 %v3505_v39, %v5876_v62  ;;  %v3508_v52 = vadd.f32 %v3507_v50, %v3506_v32  ;;  %v3548_v14 = vadd.f32 %v3547_v11, %v3546_v30 }
 0x175   :  { %v1492_v36 = vadd.f32 %v3508_v52, %v5881_v60  ;;  %v1554_v48 = vadd.f32 %v3545_v6, %v1489_v22 }
 0x177   :  { %v1557_v57 = vadd.f32 %v3548_v14, %v1492_v36  ;;  %v3565_v4 = vpop.f32.mrb[56].mxu0  ;;  %v3987_v12 = vpop.f32.mrb[64].mxu1 }
 0x178   :  { %v3566_v7 = vpop.f32.mrb[57].mxu0  ;;  %v1659_v58 = vpop.f32.mrb[65].mxu1 }
 0x179   :  { %v3567_v26 = vadd.f32 %v3566_v7, %v3565_v4  ;;  %v3568_v31 = vpop.f32.mrb[58].mxu0  ;;  %v3988_v46 = vpop.f32.mrb[66].mxu1 }
 0x17a   :  { %v3569_v5 = vpop.f32.mrb[59].mxu0  ;;  %v1662_v23 = vpop.f32.mrb[67].mxu1 }
 0x17b   :  { %v3570_v61 = vadd.f32 %v3569_v5, %v3568_v31  ;;  %v1595_v9 = vadd.f32 %v3567_v26, %v1530_v51 }
 0x17d   :  { %v5890_v8 = vadd.f32 %v1659_v58, %v1595_v9  ;;  %v1598_v62 = vadd.f32 %v3570_v61, %v1533_v44 }
 0x17f   :  { %v1690_v13 = vmax.f32 %v5803_v18, %v5890_v8  ;;  %v5894_v60 = vadd.f32 %v1662_v23, %v1598_v62  ;;  %v3571_v15 = vpop.f32.mrb[60].mxu0  ;;  %v3991_v40 = vpop.f32.mrb[68].mxu1 }
 0x180   :  { %v3572_v42 = vpop.f32.mrb[61].mxu0  ;;  %v1675_v34 = vpop.f32.mrb[69].mxu1 }
 0x181   :  { %v1691_v33 = vmax.f32 %v5823_v1, %v5894_v60  ;;  %v3573_v25 = vadd.f32 %v3572_v42, %v3571_v15  ;;  %v3574_v45 = vpop.f32.mrb[62].mxu0  ;;  %v3992_v19 = vpop.f32.mrb[70].mxu1 }
 0x182   :  { %v3575_v54 = vpop.f32.mrb[63].mxu0  ;;  %v1678_v51 = vpop.f32.mrb[71].mxu1 }
 0x183   :  { %v1603_v27 = vadd.f32 %v3573_v25, %v1538_v37  ;;  %v3576_v28 = vadd.f32 %v3575_v54, %v3574_v45 }
 0x185   :  { %v5898_v44 = vadd.f32 %v3987_v12, %v1603_v27  ;;  %v1606_v55 = vadd.f32 %v3576_v28, %v1541_v43 }
 0x187   :  { %v5900_v16 = vadd.f32 %v3988_v46, %v1606_v55  ;;  %v3577_v38 = vpop.f32.mrb[64].mxu0  ;;  %v1692_v21 = vmax.f32 %v5794_v10, %v5898_v44 }
 0x188   :  { %v3578_v63 = vpop.f32.mrb[65].mxu0 }
 0x189   :  { %v3579_v35 = vadd.f32 %v3578_v63, %v3577_v38  ;;  %v3580_v2 = vpop.f32.mrb[66].mxu0  ;;  %v1693_v0 = vmax.f32 %v5811_v3, %v5900_v16 }
 0x18a   :  { %v3581_v56 = vpop.f32.mrb[67].mxu0 }
 0x18b   :  { %v3582_v29 = vadd.f32 %v3581_v56, %v3580_v2  ;;  %v1611_v49 = vadd.f32 %v3579_v35, %v1546_v17 }
 0x18d   :  { %v5906_v37 = vadd.f32 %v1675_v34, %v1611_v49  ;;  %v1614_v59 = vadd.f32 %v3582_v29, %v1549_v20 }
 0x18f   :  { %v1694_v43 = vmax.f32 %v5848_v53, %v5906_v37  ;;  %v5910_v39 = vadd.f32 %v1678_v51, %v1614_v59  ;;  %v3583_v32 = vpop.f32.mrb[68].mxu0 }
 0x190   :  { %v3584_v6 = vpop.f32.mrb[69].mxu0 }
 0x191   :  { %v1695_v30 = vmax.f32 %v5862_v47, %v5910_v39  ;;  %v3585_v50 = vadd.f32 %v3584_v6, %v3583_v32  ;;  %v3586_v11 = vpop.f32.mrb[70].mxu0 }
 0x192   :  { %v3587_v22 = vpop.f32.mrb[71].mxu0 }
 0x193   :  { %v1619_v52 = vadd.f32 %v3585_v50, %v1554_v48  ;;  %v3588_v14 = vadd.f32 %v3587_v22, %v3586_v11 }
 0x195   :  { %v5914_v36 = vadd.f32 %v3991_v40, %v1619_v52  ;;  %v1622_v17 = vadd.f32 %v3588_v14, %v1557_v57 }
 0x197   :  { %v5916_v4 = vadd.f32 %v3992_v19, %v1622_v17  ;;  %v3617_v20 = vpop.f32.mrb[72].mxu0  ;;  %v3657_v12 = vpop.f32.mrb[72].mxu1  ;;  %v1696_v7 = vmax.f32 %v5839_v41, %v5914_v36 }
 0x198   :  { %v3618_v58 = vpop.f32.mrb[73].mxu0  ;;  %v3658_v26 = vpop.f32.mrb[73].mxu1 }
 0x199   :  { %v3619_v31 = vadd.f32 %v3618_v58, %v3617_v20  ;;  %v3659_v46 = vadd.f32 %v3658_v26, %v3657_v12  ;;  %v3620_v5 = vpop.f32.mrb[74].mxu0  ;;  %v3660_v23 = vpop.f32.mrb[74].mxu1  ;;  %v1697_v48 = vmax.f32 %v5859_v24, %v5916_v4 }
 0x19a   :  { %v3621_v61 = vpop.f32.mrb[75].mxu0  ;;  %v3661_v9 = vpop.f32.mrb[75].mxu1 }
 0x19b   :  { %v2023_v62 = vadd.f32 %v3659_v46, %v3619_v31  ;;  %v3622_v57 = vadd.f32 %v3621_v61, %v3620_v5  ;;  %v3662_v15 = vadd.f32 %v3661_v9, %v3660_v23 }
 0x19d   :  { %v2026_v40 = vadd.f32 %v3662_v15, %v3622_v57 }
 0x19f   :  { %v3623_v42 = vpop.f32.mrb[76].mxu0  ;;  %v3663_v34 = vpop.f32.mrb[76].mxu1 }
 0x1a0   :  { %v3624_v25 = vpop.f32.mrb[77].mxu0  ;;  %v3664_v45 = vpop.f32.mrb[77].mxu1 }
 0x1a1   :  { %v3625_v19 = vadd.f32 %v3624_v25, %v3623_v42  ;;  %v3665_v54 = vadd.f32 %v3664_v45, %v3663_v34  ;;  %v3626_v51 = vpop.f32.mrb[78].mxu0  ;;  %v3666_v27 = vpop.f32.mrb[78].mxu1 }
 0x1a2   :  { %v3627_v28 = vpop.f32.mrb[79].mxu0  ;;  %v3667_v55 = vpop.f32.mrb[79].mxu1 }
 0x1a3   :  { %v2031_v38 = vadd.f32 %v3665_v54, %v3625_v19  ;;  %v3628_v63 = vadd.f32 %v3627_v28, %v3626_v51  ;;  %v3668_v35 = vadd.f32 %v3667_v55, %v3666_v27 }
 0x1a5   :  { %v2034_v2 = vadd.f32 %v3668_v35, %v3628_v63 }
 0x1a7   :  { %v3629_v56 = vpop.f32.mrb[80].mxu0  ;;  %v3669_v29 = vpop.f32.mrb[80].mxu1 }
 0x1a8   :  { %v3630_v49 = vpop.f32.mrb[81].mxu0  ;;  %v3670_v59 = vpop.f32.mrb[81].mxu1 }
 0x1a9   :  { %v3631_v32 = vadd.f32 %v3630_v49, %v3629_v56  ;;  %v3671_v6 = vadd.f32 %v3670_v59, %v3669_v29  ;;  %v3632_v50 = vpop.f32.mrb[82].mxu0  ;;  %v3672_v11 = vpop.f32.mrb[82].mxu1 }
 0x1aa   :  { %v3633_v22 = vpop.f32.mrb[83].mxu0  ;;  %v3673_v52 = vpop.f32.mrb[83].mxu1 }
 0x1ab   :  { %v2039_v14 = vadd.f32 %v3671_v6, %v3631_v32  ;;  %v3634_v17 = vadd.f32 %v3633_v22, %v3632_v50  ;;  %v3674_v20 = vadd.f32 %v3673_v52, %v3672_v11 }
 0x1ad   :  { %v2042_v12 = vadd.f32 %v3674_v20, %v3634_v17 }
 0x1af   :  { %v3635_v58 = vpop.f32.mrb[84].mxu0  ;;  %v3675_v26 = vpop.f32.mrb[84].mxu1 }
 0x1b0   :  { %v3636_v31 = vpop.f32.mrb[85].mxu0  ;;  %v3676_v46 = vpop.f32.mrb[85].mxu1 }
 0x1b1   :  { %v3637_v5 = vadd.f32 %v3636_v31, %v3635_v58  ;;  %v3677_v23 = vadd.f32 %v3676_v46, %v3675_v26  ;;  %v3638_v61 = vpop.f32.mrb[86].mxu0  ;;  %v3678_v9 = vpop.f32.mrb[86].mxu1 }
 0x1b2   :  { %v3639_v57 = vpop.f32.mrb[87].mxu0  ;;  %v3679_v15 = vpop.f32.mrb[87].mxu1 }
 0x1b3   :  { %v2047_v42 = vadd.f32 %v3677_v23, %v3637_v5  ;;  %v3640_v34 = vadd.f32 %v3639_v57, %v3638_v61  ;;  %v3680_v25 = vadd.f32 %v3679_v15, %v3678_v9 }
 0x1b5   :  { %v2050_v45 = vadd.f32 %v3680_v25, %v3640_v34 }
 0x1b7   :  { %v3697_v19 = vpop.f32.mrb[88].mxu0  ;;  %v3737_v54 = vpop.f32.mrb[88].mxu1 }
 0x1b8   :  { %v3698_v51 = vpop.f32.mrb[89].mxu0  ;;  %v3738_v27 = vpop.f32.mrb[89].mxu1 }
 0x1b9   :  { %v3699_v28 = vadd.f32 %v3698_v51, %v3697_v19  ;;  %v3700_v55 = vpop.f32.mrb[90].mxu0  ;;  %v3739_v63 = vadd.f32 %v3738_v27, %v3737_v54  ;;  %v3740_v35 = vpop.f32.mrb[90].mxu1 }
 0x1ba   :  { %v3701_v56 = vpop.f32.mrb[91].mxu0  ;;  %v3741_v29 = vpop.f32.mrb[91].mxu1 }
 0x1bb   :  { %v2088_v49 = vadd.f32 %v3699_v28, %v2023_v62  ;;  %v3702_v59 = vadd.f32 %v3701_v56, %v3700_v55  ;;  %v3742_v32 = vadd.f32 %v3741_v29, %v3740_v35 }
 0x1bd   :  { %v2091_v6 = vadd.f32 %v3702_v59, %v2026_v40  ;;  %v2153_v50 = vadd.f32 %v3739_v63, %v2088_v49 }
 0x1bf   :  { %v3703_v11 = vpop.f32.mrb[92].mxu0  ;;  %v3743_v22 = vpop.f32.mrb[92].mxu1  ;;  %v2156_v52 = vadd.f32 %v3742_v32, %v2091_v6 }
 0x1c0   :  { %v3704_v17 = vpop.f32.mrb[93].mxu0  ;;  %v3744_v20 = vpop.f32.mrb[93].mxu1 }
 0x1c1   :  { %v3705_v58 = vadd.f32 %v3704_v17, %v3703_v11  ;;  %v3706_v26 = vpop.f32.mrb[94].mxu0  ;;  %v3745_v31 = vadd.f32 %v3744_v20, %v3743_v22  ;;  %v3746_v46 = vpop.f32.mrb[94].mxu1 }
 0x1c2   :  { %v3707_v5 = vpop.f32.mrb[95].mxu0  ;;  %v3747_v23 = vpop.f32.mrb[95].mxu1 }
 0x1c3   :  { %v2096_v61 = vadd.f32 %v3705_v58, %v2031_v38  ;;  %v3708_v9 = vadd.f32 %v3707_v5, %v3706_v26  ;;  %v3748_v57 = vadd.f32 %v3747_v23, %v3746_v46 }
 0x1c5   :  { %v2099_v15 = vadd.f32 %v3708_v9, %v2034_v2  ;;  %v2161_v62 = vadd.f32 %v3745_v31, %v2096_v61 }
 0x1c7   :  { %v3709_v34 = vpop.f32.mrb[96].mxu0  ;;  %v3749_v25 = vpop.f32.mrb[96].mxu1  ;;  %v2164_v40 = vadd.f32 %v3748_v57, %v2099_v15 }
 0x1c8   :  { %v3710_v19 = vpop.f32.mrb[97].mxu0  ;;  %v3750_v54 = vpop.f32.mrb[97].mxu1 }
 0x1c9   :  { %v3711_v51 = vadd.f32 %v3710_v19, %v3709_v34  ;;  %v3712_v27 = vpop.f32.mrb[98].mxu0  ;;  %v3751_v28 = vadd.f32 %v3750_v54, %v3749_v25  ;;  %v3752_v55 = vpop.f32.mrb[98].mxu1 }
 0x1ca   :  { %v3713_v63 = vpop.f32.mrb[99].mxu0  ;;  %v3753_v35 = vpop.f32.mrb[99].mxu1 }
 0x1cb   :  { %v2104_v56 = vadd.f32 %v3711_v51, %v2039_v14  ;;  %v3714_v29 = vadd.f32 %v3713_v63, %v3712_v27  ;;  %v3754_v49 = vadd.f32 %v3753_v35, %v3752_v55 }
 0x1cd   :  { %v2107_v59 = vadd.f32 %v3714_v29, %v2042_v12  ;;  %v2169_v38 = vadd.f32 %v3751_v28, %v2104_v56 }
 0x1cf   :  { %v3715_v32 = vpop.f32.mrb[100].mxu0  ;;  %v3755_v6 = vpop.f32.mrb[100].mxu1  ;;  %v2172_v2 = vadd.f32 %v3754_v49, %v2107_v59 }
 0x1d0   :  { %v3716_v11 = vpop.f32.mrb[101].mxu0  ;;  %v3756_v22 = vpop.f32.mrb[101].mxu1 }
 0x1d1   :  { %v3717_v17 = vadd.f32 %v3716_v11, %v3715_v32  ;;  %v3718_v20 = vpop.f32.mrb[102].mxu0  ;;  %v3757_v58 = vadd.f32 %v3756_v22, %v3755_v6  ;;  %v3758_v26 = vpop.f32.mrb[102].mxu1 }
 0x1d2   :  { %v3719_v31 = vpop.f32.mrb[103].mxu0  ;;  %v3759_v46 = vpop.f32.mrb[103].mxu1 }
 0x1d3   :  { %v2112_v5 = vadd.f32 %v3717_v17, %v2047_v42  ;;  %v3720_v23 = vadd.f32 %v3719_v31, %v3718_v20  ;;  %v3760_v61 = vadd.f32 %v3759_v46, %v3758_v26 }
 0x1d5   :  { %v2115_v9 = vadd.f32 %v3720_v23, %v2050_v45  ;;  %v2177_v14 = vadd.f32 %v3757_v58, %v2112_v5 }
 0x1d7   :  { %v4011_v57 = vpop.f32.mrb[104].mxu0  ;;  %v2180_v15 = vadd.f32 %v3760_v61, %v2115_v9  ;;  %v3789_v12 = vpop.f32.mrb[104].mxu1 }
 0x1d8   :  { %v2226_v34 = vadd.f32 %v4011_v57, %v2161_v62  ;;  %v2217_v25 = vpop.f32.mrb[105].mxu0  ;;  %v3790_v19 = vpop.f32.mrb[105].mxu1 }
 0x1d9   :  { %v2218_v54 = vadd.f32 %v2217_v25, %v2153_v50  ;;  %v4012_v51 = vpop.f32.mrb[106].mxu0  ;;  %v3791_v27 = vadd.f32 %v3790_v19, %v3789_v12  ;;  %v3792_v28 = vpop.f32.mrb[106].mxu1 }
 0x1da   :  { %v5925_v55 = vmax.f32 %v1692_v21, %v2226_v34  ;;  %v2229_v42 = vadd.f32 %v4012_v51, %v2164_v40  ;;  %v2220_v63 = vpop.f32.mrb[107].mxu0  ;;  %v3793_v35 = vpop.f32.mrb[107].mxu1 }
 0x1db   :  { %v5930_v45 = vmax.f32 %v1690_v13, %v2218_v54  ;;  %v2221_v62 = vadd.f32 %v2220_v63, %v2156_v52  ;;  %v3794_v56 = vadd.f32 %v3793_v35, %v3792_v28 }
 0x1dc   :  { %v5935_v50 = vmax.f32 %v1693_v0, %v2229_v42 }
 0x1dd   :  { %v5940_v10 = vmax.f32 %v1691_v33, %v2221_v62 }
 0x1df   :  { %v4015_v44 = vpop.f32.mrb[108].mxu0  ;;  %v3795_v21 = vpop.f32.mrb[108].mxu1 }
 0x1e0   :  { %v2242_v40 = vadd.f32 %v4015_v44, %v2177_v14  ;;  %v2233_v29 = vpop.f32.mrb[109].mxu0  ;;  %v3796_v49 = vpop.f32.mrb[109].mxu1 }
 0x1e1   :  { %v2234_v18 = vadd.f32 %v2233_v29, %v2169_v38  ;;  %v4016_v8 = vpop.f32.mrb[110].mxu0  ;;  %v3797_v13 = vadd.f32 %v3796_v49, %v3795_v21  ;;  %v3798_v52 = vpop.f32.mrb[110].mxu1 }
 0x1e2   :  { %v5945_v3 = vmax.f32 %v1696_v7, %v2242_v40  ;;  %v2245_v16 = vadd.f32 %v4016_v8, %v2180_v15  ;;  %v2236_v0 = vpop.f32.mrb[111].mxu0  ;;  %v3799_v59 = vpop.f32.mrb[111].mxu1 }
 0x1e3   :  { %v5950_v1 = vmax.f32 %v1694_v43, %v2234_v18  ;;  %v2237_v60 = vadd.f32 %v2236_v0, %v2172_v2  ;;  %v3800_v33 = vadd.f32 %v3799_v59, %v3798_v52 }
 0x1e4   :  { %v5955_v38 = vmax.f32 %v1697_v48, %v2245_v16 }
 0x1e5   :  { %v5960_v41 = vmax.f32 %v1695_v30, %v2237_v60 }
 0x1e7   :  { %v3801_v36 = vpop.f32.mrb[112].mxu1 }
 0x1e8   :  { %v3802_v7 = vpop.f32.mrb[113].mxu1 }
 0x1e9   :  { %v3803_v32 = vadd.f32 %v3802_v7, %v3801_v36  ;;  %v3804_v6 = vpop.f32.mrb[114].mxu1 }
 0x1ea   :  { %v3805_v11 = vpop.f32.mrb[115].mxu1 }
 0x1eb   :  { %v3806_v53 = vadd.f32 %v3805_v11, %v3804_v6 }
 0x1ef   :  { %v3807_v37 = vpop.f32.mrb[116].mxu1 }
 0x1f0   :  { %v3808_v43 = vpop.f32.mrb[117].mxu1 }
 0x1f1   :  { %v3809_v2 = vadd.f32 %v3808_v43, %v3807_v37  ;;  %v3810_v22 = vpop.f32.mrb[118].mxu1 }
 0x1f2   :  { %v3811_v17 = vpop.f32.mrb[119].mxu1 }
 0x1f3   :  { %v3812_v20 = vadd.f32 %v3811_v17, %v3810_v22 }
 0x1f7   :  { %v3829_v24 = vpop.f32.mrb[112].mxu0  ;;  %v3869_v4 = vpop.f32.mrb[120].mxu1 }
 0x1f8   :  { %v3830_v48 = vpop.f32.mrb[113].mxu0  ;;  %v3870_v58 = vpop.f32.mrb[121].mxu1 }
 0x1f9   :  { %v3831_v26 = vadd.f32 %v3830_v48, %v3829_v24  ;;  %v3832_v47 = vpop.f32.mrb[114].mxu0  ;;  %v3871_v39 = vadd.f32 %v3870_v58, %v3869_v4  ;;  %v3872_v30 = vpop.f32.mrb[122].mxu1 }
 0x1fa   :  { %v3833_v31 = vpop.f32.mrb[115].mxu0  ;;  %v3873_v46 = vpop.f32.mrb[123].mxu1 }
 0x1fb   :  { %v2581_v5 = vadd.f32 %v3831_v26, %v3791_v27  ;;  %v3834_v23 = vadd.f32 %v3833_v31, %v3832_v47  ;;  %v3874_v61 = vadd.f32 %v3873_v46, %v3872_v30 }
 0x1fd   :  { %v2584_v9 = vadd.f32 %v3834_v23, %v3794_v56  ;;  %v2646_v14 = vadd.f32 %v3871_v39, %v2581_v5 }
 0x1ff   :  { %v2649_v57 = vadd.f32 %v3874_v61, %v2584_v9  ;;  %v3835_v15 = vpop.f32.mrb[116].mxu0  ;;  %v3875_v12 = vpop.f32.mrb[124].mxu1 }
 0x200   :  { %v3836_v34 = vpop.f32.mrb[117].mxu0  ;;  %v3876_v25 = vpop.f32.mrb[125].mxu1 }
 0x201   :  { %v3837_v19 = vadd.f32 %v3836_v34, %v3835_v15  ;;  %v3838_v54 = vpop.f32.mrb[118].mxu0  ;;  %v3877_v51 = vadd.f32 %v3876_v25, %v3875_v12  ;;  %v3878_v28 = vpop.f32.mrb[126].mxu1 }
 0x202   :  { %v3839_v42 = vpop.f32.mrb[119].mxu0  ;;  %v3879_v63 = vpop.f32.mrb[127].mxu1 }
 0x203   :  { %v2589_v35 = vadd.f32 %v3837_v19, %v3797_v13  ;;  %v3840_v62 = vadd.f32 %v3839_v42, %v3838_v54  ;;  %v3880_v44 = vadd.f32 %v3879_v63, %v3878_v28 }
 0x205   :  { %v2592_v21 = vadd.f32 %v3840_v62, %v3800_v33  ;;  %v5962_v27 = vadd.f32 %v3877_v51, %v2589_v35 }
 0x207   :  { %v5964_v40 = vadd.f32 %v3880_v44, %v2592_v21  ;;  %v3841_v56 = vpop.f32.mrb[120].mxu0  ;;  %v3881_v29 = vpop.f32.mrb[128].mxu1 }
 0x208   :  { %v3842_v49 = vpop.f32.mrb[121].mxu0  ;;  %v3882_v18 = vpop.f32.mrb[129].mxu1 }
 0x209   :  { %v3843_v8 = vadd.f32 %v3842_v49, %v3841_v56  ;;  %v3844_v52 = vpop.f32.mrb[122].mxu0  ;;  %v3883_v16 = vadd.f32 %v3882_v18, %v3881_v29  ;;  %v3884_v0 = vpop.f32.mrb[130].mxu1 }
 0x20a   :  { %v3845_v59 = vpop.f32.mrb[123].mxu0  ;;  %v3885_v60 = vpop.f32.mrb[131].mxu1 }
 0x20b   :  { %v2597_v36 = vadd.f32 %v3843_v8, %v3803_v32  ;;  %v3846_v7 = vadd.f32 %v3845_v59, %v3844_v52  ;;  %v3886_v13 = vadd.f32 %v3885_v60, %v3884_v0 }
 0x20d   :  { %v2600_v6 = vadd.f32 %v3846_v7, %v3806_v53  ;;  %v5966_v11 = vadd.f32 %v3883_v16, %v2597_v36 }
 0x20f   :  { %v5968_v33 = vadd.f32 %v3886_v13, %v2600_v6  ;;  %v3847_v37 = vpop.f32.mrb[124].mxu0  ;;  %v3887_v43 = vpop.f32.mrb[132].mxu1 }
 0x210   :  { %v3848_v22 = vpop.f32.mrb[125].mxu0  ;;  %v3888_v17 = vpop.f32.mrb[133].mxu1 }
 0x211   :  { %v3849_v24 = vadd.f32 %v3848_v22, %v3847_v37  ;;  %v3850_v4 = vpop.f32.mrb[126].mxu0  ;;  %v3889_v48 = vadd.f32 %v3888_v17, %v3887_v43  ;;  %v3890_v58 = vpop.f32.mrb[134].mxu1 }
 0x212   :  { %v3851_v26 = vpop.f32.mrb[127].mxu0  ;;  %v3891_v47 = vpop.f32.mrb[135].mxu1 }
 0x213   :  { %v2605_v39 = vadd.f32 %v3849_v24, %v3809_v2  ;;  %v3852_v30 = vadd.f32 %v3851_v26, %v3850_v4  ;;  %v3892_v32 = vadd.f32 %v3891_v47, %v3890_v58 }
 0x215   :  { %v2608_v31 = vadd.f32 %v3852_v30, %v3812_v20  ;;  %v5970_v46 = vadd.f32 %v3889_v48, %v2605_v39  ;;  %v5977_v20 = vld [vmem:[%s6015_s2] ss:$0 sm:$0xff] }
 0x217   :  { %v5972_v53 = vadd.f32 %v3892_v32, %v2608_v31  ;;  %v3909_v5 = vpop.f32.mrb[128].mxu0  ;;  %v4035_v23 = vpop.f32.mrb[136].mxu1 }
 0x218   :  { %v3910_v61 = vpop.f32.mrb[129].mxu0  ;;  %v2775_v9 = vpop.f32.mrb[137].mxu1 }
 0x219   :  { %v3911_v15 = vadd.f32 %v3910_v61, %v3909_v5  ;;  %v3912_v12 = vpop.f32.mrb[130].mxu0  ;;  %v4036_v34 = vpop.f32.mrb[138].mxu1 }
 0x21a   :  { %v3913_v25 = vpop.f32.mrb[131].mxu0  ;;  %v2778_v19 = vpop.f32.mrb[139].mxu1 }
 0x21b   :  { %v3914_v54 = vadd.f32 %v3913_v25, %v3912_v12  ;;  %v2711_v51 = vadd.f32 %v3911_v15, %v2646_v14 }
 0x21d   :  { %v2776_v28 = vadd.f32 %v2775_v9, %v2711_v51  ;;  %v2714_v2 = vadd.f32 %v3914_v54, %v2649_v57 }
 0x21f   :  { %v2806_v42 = vmax.f32 %v5930_v45, %v2776_v28  ;;  %v2779_v63 = vadd.f32 %v2778_v19, %v2714_v2  ;;  %v3915_v35 = vpop.f32.mrb[132].mxu0  ;;  %v4039_v62 = vpop.f32.mrb[140].mxu1 }
 0x220   :  { %v3916_v44 = vpop.f32.mrb[133].mxu0  ;;  %v2791_v21 = vpop.f32.mrb[141].mxu1 }
 0x221   :  { %v2821_v56 = vadd.f32 %v5977_v20, %v2806_v42  ;;  %v2807_v29 = vmax.f32 %v5940_v10, %v2779_v63  ;;  %v3917_v49 = vadd.f32 %v3916_v44, %v3915_v35  ;;  %v3918_v14 = vpop.f32.mrb[134].mxu0  ;;  %v4040_v18 = vpop.f32.mrb[142].mxu1 }
 0x222   :  { %v3919_v57 = vpop.f32.mrb[135].mxu0  ;;  %v2794_v8 = vpop.f32.mrb[143].mxu1 }
 0x223   :  { %v2822_v52 = vadd.f32 %v5977_v20, %v2807_v29  ;;  %v2719_v16 = vadd.f32 %v3917_v49, %v5962_v27  ;;  %v3920_v0 = vadd.f32 %v3919_v57, %v3918_v14  ;;  %v2829_v45 = vmax.f32 %v2821_v56, 0.0 }
 0x225   :  { %v2830_v59 = vmax.f32 %v2822_v52, 0.0  ;;  %v2784_v60 = vadd.f32 %v4035_v23, %v2719_v16  ;;  %v2722_v36 = vadd.f32 %v3920_v0, %v5964_v40 }
 0x227   :  { %v3237_v7 = vpack.c.bf16 %v2830_v59, %v2829_v45  ;;  %v2808_v13 = vmax.f32 %v5925_v55, %v2784_v60  ;;  %v2787_v6 = vadd.f32 %v4036_v34, %v2722_v36  ;;  %v3921_v10 = vpop.f32.mrb[136].mxu0 }
 0x228   :  { %v3922_v37 = vpop.f32.mrb[137].mxu0 }
 0x229   :  { %3238 = vst [vmem:[%s6016_s3] sm:$0xff] %v3237_v7   ;;  %v2823_v43 = vadd.f32 %v5977_v20, %v2808_v13  ;;  %v2809_v27 = vmax.f32 %v5935_v50, %v2787_v6  ;;  %v3923_v22 = vadd.f32 %v3922_v37, %v3921_v10  ;;  %v3924_v17 = vpop.f32.mrb[138].mxu0 }
 0x22a   :  { %v3925_v24 = vpop.f32.mrb[139].mxu0 }
 0x22b   :  { %v2824_v4 = vadd.f32 %v5977_v20, %v2809_v27  ;;  %v3926_v40 = vadd.f32 %v3925_v24, %v3924_v17  ;;  %v2727_v48 = vadd.f32 %v3923_v22, %v5966_v11  ;;  %v2831_v55 = vmax.f32 %v2823_v43, 0.0 }
 0x22d   :  { %v2832_v58 = vmax.f32 %v2824_v4, 0.0  ;;  %v2792_v26 = vadd.f32 %v2791_v21, %v2727_v48  ;;  %v2730_v47 = vadd.f32 %v3926_v40, %v5968_v33 }
 0x22f   :  { %v3242_v39 = vpack.c.bf16 %v2832_v58, %v2831_v55  ;;  %v2810_v30 = vmax.f32 %v5950_v1, %v2792_v26  ;;  %v2795_v32 = vadd.f32 %v2794_v8, %v2730_v47  ;;  %v3927_v31 = vpop.f32.mrb[140].mxu0 }
 0x230   :  { %v3928_v5 = vpop.f32.mrb[141].mxu0 }
 0x231   :  { %3254 = vst [vmem:[%s6016_s3 + $0x8] sm:$0xff] %v3242_v39   ;;  %v2825_v50 = vadd.f32 %v5977_v20, %v2810_v30  ;;  %v2811_v23 = vmax.f32 %v5960_v41, %v2795_v32  ;;  %v3929_v11 = vadd.f32 %v3928_v5, %v3927_v31  ;;  %v3930_v61 = vpop.f32.mrb[142].mxu0 }
 0x232   :  { %v3931_v9 = vpop.f32.mrb[143].mxu0 }
 0x233   :  { %v2826_v15 = vadd.f32 %v5977_v20, %v2811_v23  ;;  %v2735_v33 = vadd.f32 %v3929_v11, %v5970_v46  ;;  %v3932_v12 = vadd.f32 %v3931_v9, %v3930_v61  ;;  %v2833_v1 = vmax.f32 %v2825_v50, 0.0 }
 0x235   :  { %v2834_v34 = vmax.f32 %v2826_v15, 0.0  ;;  %v2800_v25 = vadd.f32 %v4039_v62, %v2735_v33  ;;  %v2738_v19 = vadd.f32 %v3932_v12, %v5972_v53 }
 0x237   :  { %v3247_v54 = vpack.c.bf16 %v2834_v34, %v2833_v1  ;;  %v2812_v51 = vmax.f32 %v5945_v3, %v2800_v25  ;;  %v2803_v28 = vadd.f32 %v4040_v18, %v2738_v19 }
 0x239   :  { %3255 = vst [vmem:[%s6016_s3 + $0x10] sm:$0xff] %v3247_v54   ;;  %v2827_v41 = vadd.f32 %v5977_v20, %v2812_v51  ;;  %v2813_v2 = vmax.f32 %v5955_v38, %v2803_v28 }
 0x23b   :  { %v2828_v46 = vadd.f32 %v5977_v20, %v2813_v2  ;;  %v2835_v42 = vmax.f32 %v2827_v41, 0.0 }
 0x23d   :  { %v2836_v63 = vmax.f32 %v2828_v46, 0.0 }
 0x23f   :  { %v3252_v35 = vpack.c.bf16 %v2836_v63, %v2835_v42 }
 0x241   :  { %3256 = vst [vmem:[%s6016_s3 + $0x18] sm:$0xff] %v3252_v35  }

// kernel: vgg_feature_extractor.14
= control target key start
LH: loop header
LB: loop body
LE: loop exit
PB: predicated region body
PF: predicated region fallthrough
CT: control target
= control target key end

     0   :  { %s140_s0 = inlined_call_operand.vmem [shape: bf16[1,32,128], index: 0, kind: input, shape index: {}]   ;;  %s141_s1 = inlined_call_operand.vmem [shape: f32[1,128], index: 1, kind: input, shape index: {}]   ;;  %s142_s2 = inlined_call_operand.vmem [shape: f32[1,128], index: 2, kind: input, shape index: {}]   ;;  %s143_s3 = inlined_call_operand.vmem [shape: bf16[32,128], index: 3, kind: output, shape index: {}]  }
   0x1   :  { %v72_v0 = vld [vmem:[%s141_s1] ss:$0 sm:$0xff]  ;;  %v100_v4 = vld [vmem:[%s140_s0 + $0x8] sm:$0xff]  }
   0x2   :  { %v83_v1 = vld [vmem:[%s140_s0] sm:$0xff]   ;;  %v88_v6 = vunpack.c.l.bf16 %v100_v4  ;;  %v89_v7 = vunpack.c.h.bf16 %v100_v4 }
   0x3   :  { %v84_v2 = vunpack.c.l.bf16 %v83_v1  ;;  %v85_v3 = vunpack.c.h.bf16 %v83_v1  ;;  %v73_v5 = vld [vmem:[%s142_s2] ss:$0 sm:$0xff] }
   0x4   :  { %v32_v10 = vmul.f32 %v88_v6, %v72_v0  ;;  %v33_v11 = vmul.f32 %v89_v7, %v72_v0 }
   0x5   :  { %v30_v8 = vmul.f32 %v84_v2, %v72_v0  ;;  %v31_v9 = vmul.f32 %v85_v3, %v72_v0 }
   0x6   :  { %v42_v14 = vadd.f32 %v73_v5, %v32_v10  ;;  %v43_v15 = vadd.f32 %v73_v5, %v33_v11 }
   0x7   :  { %v40_v12 = vadd.f32 %v73_v5, %v30_v8  ;;  %v41_v13 = vadd.f32 %v73_v5, %v31_v9 }
   0x8   :  { %v46_v18 = vmax.f32 %v42_v14, 0.0  ;;  %v47_v19 = vmax.f32 %v43_v15, 0.0 }
   0x9   :  { %v44_v16 = vmax.f32 %v40_v12, 0.0  ;;  %v45_v17 = vmax.f32 %v41_v13, 0.0 }
   0xa   :  { %v98_v21 = vpack.c.bf16 %v47_v19, %v46_v18 }
   0xb   :  { %v93_v20 = vpack.c.bf16 %v45_v17, %v44_v16 }
   0xc   :  { %101 = vst [vmem:[%s143_s3 + $0x8] sm:$0xff] %v98_v21  }
   0xd   :  { %94 = vst [vmem:[%s143_s3] sm:$0xff] %v93_v20  }

// kernel: vgg_feature_extractor.12
= control target key start
LH: loop header
LB: loop body
LE: loop exit
PB: predicated region body
PF: predicated region fallthrough
CT: control target
= control target key end

     0   :  { %s2574_s1 = inlined_call_operand.vmem [shape: bf16[1152,128], index: 1, kind: input, shape index: {}]   ;;  %s2575_s0 = inlined_call_operand.vmem [shape: bf16[2,32,1152], index: 0, kind: input, shape index: {}]   ;;  %s2576_s2 = inlined_call_operand.vmem [shape: f32[1,128], index: 2, kind: input, shape index: {}]   ;;  %s2577_s3 = inlined_call_operand.vmem [shape: bf16[32,128], index: 3, kind: output, shape index: {}]  }
   0x1   :  { %v1928_v0 = vld [vmem:[%s2574_s1 + $0x40] sm:$0xff]   ;;  %v1951_v4 = vld [vmem:[%s2574_s1 + $0x48] sm:$0xff]   ;;  %v1975_v8 = vld [vmem:[%s2574_s1 + $0x50] sm:$0xff]  }
   0x2   :  { %v1933_v1 = vld [vmem:[%s2574_s1 + $0xc0] sm:$0xff]   ;;  %1497 = vmatprep.subr.bf16.mxu0 %v1928_v0  ;;  %v1957_v5 = vld [vmem:[%s2574_s1 + $0xc8] sm:$0xff]   ;;  %v1981_v9 = vld [vmem:[%s2574_s1 + $0xd0] sm:$0xff]  }
   0x3   :  { %v1939_v2 = vld [vmem:[%s2574_s1] sm:$0xff]   ;;  %1525 = vmatprep.subr.bf16.mxu1 %v1933_v1  ;;  %v1963_v6 = vld [vmem:[%s2574_s1 + $0x8] sm:$0xff]   ;;  %v1987_v10 = vld [vmem:[%s2574_s1 + $0x10] sm:$0xff]  }
   0x4   :  { %v1945_v3 = vld [vmem:[%s2574_s1 + $0x80] sm:$0xff]   ;;  %1498 = vmatpush3.bf16.msra.mxu0 %v1939_v2  ;;  %v1969_v7 = vld [vmem:[%s2574_s1 + $0x88] sm:$0xff]   ;;  %v1993_v11 = vld [vmem:[%s2574_s1 + $0x90] sm:$0xff]  }
   0x5   :  { %1526 = vmatpush3.bf16.msra.mxu1 %v1945_v3  ;;  %1499 = vmatprep.subr.bf16.mxu0 %v1951_v4  ;;  %v1999_v12 = vld [vmem:[%s2574_s1 + $0x58] sm:$0xff]   ;;  %v2023_v16 = vld [vmem:[%s2574_s1 + $0x60] sm:$0xff]   ;;  %v2047_v20 = vld [vmem:[%s2574_s1 + $0x68] sm:$0xff]  }
   0x6   :  { %1527 = vmatprep.subr.bf16.mxu1 %v1957_v5  ;;  %v2005_v13 = vld [vmem:[%s2574_s1 + $0xd8] sm:$0xff]   ;;  %v2029_v17 = vld [vmem:[%s2574_s1 + $0xe0] sm:$0xff]   ;;  %v2053_v21 = vld [vmem:[%s2574_s1 + $0xe8] sm:$0xff]  }
   0x7   :  { %v2011_v14 = vld [vmem:[%s2574_s1 + $0x18] sm:$0xff]   ;;  %v2035_v18 = vld [vmem:[%s2574_s1 + $0x20] sm:$0xff]   ;;  %v2059_v22 = vld [vmem:[%s2574_s1 + $0x28] sm:$0xff]  }
   0x8   :  { %1500 = vmatpush3.bf16.msra.mxu0 %v1963_v6  ;;  %v2017_v15 = vld [vmem:[%s2574_s1 + $0x98] sm:$0xff]   ;;  %v2041_v19 = vld [vmem:[%s2574_s1 + $0xa0] sm:$0xff]   ;;  %v2065_v23 = vld [vmem:[%s2574_s1 + $0xa8] sm:$0xff]  }
   0x9   :  { %1528 = vmatpush3.bf16.msra.mxu1 %v1969_v7  ;;  %1501 = vmatprep.subr.bf16.mxu0 %v1975_v8  ;;  %v2071_v24 = vld [vmem:[%s2574_s1 + $0x70] sm:$0xff]   ;;  %v2095_v28 = vld [vmem:[%s2574_s1 + $0x78] sm:$0xff]   ;;  %v1813_v32 = vld [vmem:[%s2575_s0] ss:$36 sps:$4 sm:$0xff]  }
   0xa   :  { %1529 = vmatprep.subr.bf16.mxu1 %v1981_v9  ;;  %v2077_v25 = vld [vmem:[%s2574_s1 + $0xf0] sm:$0xff]   ;;  %v2101_v29 = vld [vmem:[%s2574_s1 + $0xf8] sm:$0xff]   ;;  %v1815_v33 = vld [vmem:[%s2575_s0 + $0x4] ss:$36 sps:$4 sm:$0xff]  }
   0xb   :  { %v2083_v26 = vld [vmem:[%s2574_s1 + $0x30] sm:$0xff]   ;;  %v2107_v30 = vld [vmem:[%s2574_s1 + $0x38] sm:$0xff]   ;;  %v1816_v34 = vld [vmem:[%s2575_s0 + $0x8] ss:$36 sps:$4 sm:$0xff]   ;;  %735 = vmatprep.mubr.bf16.mxu0 %v1815_v33 }
   0xc   :  { %1502 = vmatpush3.bf16.msra.mxu0 %v1987_v10  ;;  %v2089_v27 = vld [vmem:[%s2574_s1 + $0xb0] sm:$0xff]   ;;  %v2113_v31 = vld [vmem:[%s2574_s1 + $0xb8] sm:$0xff]   ;;  %v2132_v36 = vld [vmem:[%s2574_s1 + $0x140] sm:$0xff]  }
   0xd   :  { %1530 = vmatpush3.bf16.msra.mxu1 %v1993_v11  ;;  %1503 = vmatprep.subr.bf16.mxu0 %v1999_v12  ;;  %v1818_v35 = vld [vmem:[%s2575_s0 + $0xc] ss:$36 sps:$4 sm:$0xff]   ;;  %v2137_v37 = vld [vmem:[%s2574_s1 + $0x100] sm:$0xff]   ;;  %v2203_v48 = vld [vmem:[%s2574_s1 + $0x158] sm:$0xff]  }
   0xe   :  { %1531 = vmatprep.subr.bf16.mxu1 %v2005_v13  ;;  %784 = vmatprep.mubr.bf16.mxu1 %v1818_v35  ;;  %v2143_v38 = vld [vmem:[%s2574_s1 + $0x1c0] sm:$0xff]   ;;  %v2155_v40 = vld [vmem:[%s2574_s1 + $0x148] sm:$0xff]   ;;  %v2179_v44 = vld [vmem:[%s2574_s1 + $0x150] sm:$0xff]  }
   0xf   :  { %v2149_v39 = vld [vmem:[%s2574_s1 + $0x180] sm:$0xff]   ;;  %v2161_v41 = vld [vmem:[%s2574_s1 + $0x108] sm:$0xff]   ;;  %v2185_v45 = vld [vmem:[%s2574_s1 + $0x110] sm:$0xff]  }
  0x10   :  { %1504 = vmatpush3.bf16.msra.mxu0 %v2011_v14  ;;  %v2167_v42 = vld [vmem:[%s2574_s1 + $0x1c8] sm:$0xff]   ;;  %v2191_v46 = vld [vmem:[%s2574_s1 + $0x1d0] sm:$0xff]   ;;  %v2209_v49 = vld [vmem:[%s2574_s1 + $0x118] sm:$0xff]  }
  0x11   :  { %1532 = vmatpush3.bf16.msra.mxu1 %v2017_v15  ;;  %1505 = vmatprep.subr.bf16.mxu0 %v2023_v16  ;;  %v2173_v43 = vld [vmem:[%s2574_s1 + $0x188] sm:$0xff]   ;;  %v2197_v47 = vld [vmem:[%s2574_s1 + $0x190] sm:$0xff]   ;;  %v2215_v50 = vld [vmem:[%s2574_s1 + $0x1d8] sm:$0xff]  }
  0x12   :  { %1533 = vmatprep.subr.bf16.mxu1 %v2029_v17  ;;  %v2221_v51 = vld [vmem:[%s2574_s1 + $0x198] sm:$0xff]   ;;  %v2227_v52 = vld [vmem:[%s2574_s1 + $0x160] sm:$0xff]   ;;  %v2251_v56 = vld [vmem:[%s2574_s1 + $0x168] sm:$0xff]  }
  0x13   :  { %v2233_v53 = vld [vmem:[%s2574_s1 + $0x120] sm:$0xff]   ;;  %v1840_v57 = vld [vmem:[%s2575_s0 + $0x4c] ss:$36 sps:$4 sm:$0xff]   ;;  %v1842_v58 = vld [vmem:[%s2575_s0 + $0x54] ss:$36 sps:$4 sm:$0xff]  }
  0x14   :  { %1506 = vmatpush3.bf16.msra.mxu0 %v2035_v18  ;;  %v2239_v54 = vld [vmem:[%s2574_s1 + $0x1e0] sm:$0xff]   ;;  %v2264_v59 = vld [vmem:[%s2574_s1 + $0x128] sm:$0xff]   ;;  %v1846_v61 = vld [vmem:[%s2575_s0 + $0x50] ss:$36 sps:$4 sm:$0xff]  }
  0x15   :  { %1534 = vmatpush3.bf16.msra.mxu1 %v2041_v19  ;;  %1507 = vmatprep.subr.bf16.mxu0 %v2047_v20  ;;  %v2245_v55 = vld [vmem:[%s2574_s1 + $0x1a0] sm:$0xff]   ;;  %v1845_v60 = vld [vmem:[%s2575_s0 + $0x48] ss:$36 sps:$4 sm:$0xff]   ;;  %v2293_v33 = vld [vmem:[%s2574_s1 + $0x130] sm:$0xff]  }
  0x16   :  { %1535 = vmatprep.subr.bf16.mxu1 %v2053_v21  ;;  %v2276_v62 = vld [vmem:[%s2574_s1 + $0x1e8] sm:$0xff]   ;;  %v2305_v35 = vld [vmem:[%s2574_s1 + $0x1b0] sm:$0xff]  }
  0x17   :  { %2584 = vst [vmem:[#allocation2_spill] sm:$0xff] %v2276_v62  ;;  %v2281_v63 = vld [vmem:[%s2574_s1 + $0x1a8] sm:$0xff]   ;;  %2587 = vst [vmem:[#allocation5_spill] sm:$0xff] %v2305_v35 }
  0x18   :  { %1508 = vmatpush3.bf16.msra.mxu0 %v2059_v22  ;;  %2585 = vst [vmem:[#allocation3_spill] sm:$0xff] %v2281_v63 }
  0x19   :  { %1536 = vmatpush3.bf16.msra.mxu1 %v2065_v23  ;;  %1509 = vmatprep.subr.bf16.mxu0 %v2071_v24 }
  0x1a   :  { %1537 = vmatprep.subr.bf16.mxu1 %v2077_v25 }
  0x1c   :  { %1510 = vmatpush3.bf16.msra.mxu0 %v2083_v26 }
  0x1d   :  { %1538 = vmatpush3.bf16.msra.mxu1 %v2089_v27  ;;  %1511 = vmatprep.subr.bf16.mxu0 %v2095_v28 }
  0x1e   :  { %1539 = vmatprep.subr.bf16.mxu1 %v2101_v29 }
  0x20   :  { %1512 = vmatpush3.bf16.msra.mxu0 %v2107_v30 }
  0x21   :  { %1540 = vmatpush3.bf16.msra.mxu1 %v2113_v31  ;;  %1553 = vmatprep.subr.bf16.mxu0 %v2132_v36 }
  0x22   :  { %1581 = vmatprep.subr.bf16.mxu1 %v2143_v38 }
  0x23   :  { %736 = vmatmul.mubr.bf16.vlgmr.msra.gmra.mrb[0].mxu0 %v1813_v32  ;;  %v2287_v32 = vld [vmem:[%s2574_s1 + $0x170] sm:$0xff]  }
  0x24   :  { %785 = vmatmul.mubr.bf16.vlgmr.msra.gmra.mrb[0].mxu1 %v1816_v34  ;;  %1554 = vmatpush3.bf16.msra.mxu0 %v2137_v37  ;;  %v2299_v34 = vld [vmem:[%s2574_s1 + $0x1f0] sm:$0xff]  }
  0x25   :  { %1582 = vmatpush3.bf16.msra.mxu1 %v2149_v39  ;;  %1555 = vmatprep.subr.bf16.mxu0 %v2155_v40  ;;  %2586 = vst [vmem:[#allocation4_spill] sm:$0xff] %v2299_v34 }
  0x26   :  { %1583 = vmatprep.subr.bf16.mxu1 %v2167_v42  ;;  %743 = vmatprep.mubr.bf16.mxu0 %v1840_v57  ;;  %v2311_v57 = vld [vmem:[%s2574_s1 + $0x178] sm:$0xff]  }
  0x27   :  { %792 = vmatprep.mubr.bf16.mxu1 %v1842_v58  ;;  %v2317_v58 = vld [vmem:[%s2574_s1 + $0x138] sm:$0xff]  }
  0x28   :  { %1556 = vmatpush3.bf16.msra.mxu0 %v2161_v41 }
  0x29   :  { %1584 = vmatpush3.bf16.msra.mxu1 %v2173_v43  ;;  %1557 = vmatprep.subr.bf16.mxu0 %v2179_v44 }
  0x2a   :  { %1585 = vmatprep.subr.bf16.mxu1 %v2191_v46 }
  0x2b   :  { %744 = vmatmul.mubr.bf16.gmra.mrb[4].mxu0 %v1845_v60  ;;  %v2323_v60 = vld [vmem:[%s2574_s1 + $0x1f8] sm:$0xff]  }
  0x2c   :  { %1558 = vmatpush3.bf16.msra.mxu0 %v2185_v45  ;;  %793 = vmatmul.mubr.bf16.gmra.mrb[4].mxu1 %v1846_v61  ;;  %2588 = vst [vmem:[#allocation6_spill] sm:$0xff] %v2323_v60  ;;  %v1856_v61 = vld [vmem:[%s2575_s0 + $0x10] ss:$36 sps:$4 sm:$0xff]  }
  0x2d   :  { %1586 = vmatpush3.bf16.msra.mxu1 %v2197_v47  ;;  %1559 = vmatprep.subr.bf16.mxu0 %v2203_v48 }
  0x2e   :  { %1587 = vmatprep.subr.bf16.mxu1 %v2215_v50 }
  0x30   :  { %1560 = vmatpush3.bf16.msra.mxu0 %v2209_v49 }
  0x31   :  { %1588 = vmatpush3.bf16.msra.mxu1 %v2221_v51  ;;  %1561 = vmatprep.subr.bf16.mxu0 %v2227_v52 }
  0x32   :  { %1589 = vmatprep.subr.bf16.mxu1 %v2239_v54 }
  0x34   :  { %1562 = vmatpush3.bf16.msra.mxu0 %v2233_v53 }
  0x35   :  { %1590 = vmatpush3.bf16.msra.mxu1 %v2245_v55  ;;  %1563 = vmatprep.subr.bf16.mxu0 %v2251_v56 }
  0x36   :  { %1591 = vmatprep.subr.bf16.mxu1 %v2276_v62  ;;  %v1861_v62 = vld [vmem:[%s2575_s0 + $0x18] ss:$36 sps:$4 sm:$0xff]  }
  0x38   :  { %1564 = vmatpush3.bf16.msra.mxu0 %v2264_v59 }
  0x39   :  { %1592 = vmatpush3.bf16.msra.mxu1 %v2281_v63  ;;  %1565 = vmatprep.subr.bf16.mxu0 %v2287_v32  ;;  %v2341_v63 = vld [vmem:[%s2574_s1 + $0x200] sm:$0xff]  }
  0x3a   :  { %1593 = vmatprep.subr.bf16.mxu1 %v2299_v34  ;;  %v2336_v34 = vld [vmem:[%s2574_s1 + $0x1b8] sm:$0xff]  }
  0x3b   :  { %2589 = vst [vmem:[#allocation7_spill] sm:$0xff] %v2336_v34 }
  0x3c   :  { %1566 = vmatpush3.bf16.msra.mxu0 %v2293_v33 }
  0x3d   :  { %1594 = vmatpush3.bf16.msra.mxu1 %v2305_v35  ;;  %1567 = vmatprep.subr.bf16.mxu0 %v2311_v57  ;;  %v1858_v35 = vld [vmem:[%s2575_s0 + $0x14] ss:$36 sps:$4 sm:$0xff]  }
  0x3e   :  { %1595 = vmatprep.subr.bf16.mxu1 %v2323_v60  ;;  %833 = vmatprep.mubr.bf16.mxu0 %v1858_v35  ;;  %v1863_v60 = vld [vmem:[%s2575_s0 + $0x1c] ss:$36 sps:$4 sm:$0xff]   ;;  %v2355_v35 = vld [vmem:[%s2574_s1 + $0x208] sm:$0xff]  }
  0x3f   :  { %882 = vmatprep.mubr.bf16.mxu1 %v1863_v60  ;;  %v1871_v60 = vld [vmem:[%s2575_s0 + $0x60] ss:$36 sps:$4 sm:$0xff]  }
  0x40   :  { %1568 = vmatpush3.bf16.msra.mxu0 %v2317_v58 }
  0x41   :  { %1596 = vmatpush3.bf16.msra.mxu1 %v2336_v34  ;;  %1741 = vmatprep.subr.bf16.mxu0 %v2341_v63  ;;  %v1867_v34 = vld [vmem:[%s2575_s0 + $0x58] ss:$36 sps:$4 sm:$0xff]  }
  0x42   :  { %1619 = vmatprep.subr.bf16.mxu1 %v1928_v0  ;;  %v2369_v0 = vld [vmem:[%s2574_s1 + $0x210] sm:$0xff]  }
  0x43   :  { %834 = vmatmul.mubr.bf16.vlgmr.msra.gmra.mrb[8].mxu0 %v1856_v61  ;;  %v1865_v61 = vld [vmem:[%s2575_s0 + $0x5c] ss:$36 sps:$4 sm:$0xff]  }
  0x44   :  { %1742 = vmatpush3.bf16.msra.mxu0 %v2341_v63  ;;  %883 = vmatmul.mubr.bf16.vlgmr.msra.gmra.mrb[8].mxu1 %v1861_v62  ;;  %v1869_v62 = vld [vmem:[%s2575_s0 + $0x64] ss:$36 sps:$4 sm:$0xff]  }
  0x45   :  { %1743 = vmatprep.subr.bf16.mxu0 %v2355_v35  ;;  %1620 = vmatpush3.bf16.msra.mxu1 %v1939_v2  ;;  %v2383_v2 = vld [vmem:[%s2574_s1 + $0x218] sm:$0xff]  }
  0x46   :  { %841 = vmatprep.mubr.bf16.mxu0 %v1865_v61  ;;  %1621 = vmatprep.subr.bf16.mxu1 %v1951_v4  ;;  %v2391_v4 = vld [vmem:[%s2574_s1 + $0x220] sm:$0xff]  }
  0x47   :  { %890 = vmatprep.mubr.bf16.mxu1 %v1869_v62  ;;  %v1877_v61 = vld [vmem:[%s2575_s0 + $0x20] ss:$36 sps:$4 sm:$0xff]  }
  0x48   :  { %1744 = vmatpush3.bf16.msra.mxu0 %v2355_v35 }
  0x49   :  { %1745 = vmatprep.subr.bf16.mxu0 %v2369_v0  ;;  %1622 = vmatpush3.bf16.msra.mxu1 %v1963_v6  ;;  %v1881_v6 = vld [vmem:[%s2575_s0 + $0x94] ss:$36 sps:$4 sm:$0xff]  }
  0x4a   :  { %1623 = vmatprep.subr.bf16.mxu1 %v1975_v8  ;;  %v2407_v8 = vld [vmem:[%s2574_s1 + $0x228] sm:$0xff]  }
  0x4b   :  { %842 = vmatmul.mubr.bf16.gmra.mrb[12].mxu0 %v1867_v34 }
  0x4c   :  { %1746 = vmatpush3.bf16.msra.mxu0 %v2369_v0  ;;  %891 = vmatmul.mubr.bf16.gmra.mrb[12].mxu1 %v1871_v60 }
  0x4d   :  { %1747 = vmatprep.subr.bf16.mxu0 %v2383_v2  ;;  %1624 = vmatpush3.bf16.msra.mxu1 %v1987_v10  ;;  %v2416_v10 = vld [vmem:[%s2574_s1 + $0x230] sm:$0xff]  }
  0x4e   :  { %1625 = vmatprep.subr.bf16.mxu1 %v1999_v12  ;;  %1757 = vmatprep.mubr.bf16.mxu0 %v1877_v61  ;;  %v2425_v12 = vld [vmem:[%s2574_s1 + $0x238] sm:$0xff]  }
  0x4f   :  { %1093 = vmatprep.mubr.bf16.mxu1 %v1881_v6 }
  0x50   :  { %1748 = vmatpush3.bf16.msra.mxu0 %v2383_v2 }
  0x51   :  { %1749 = vmatprep.subr.bf16.mxu0 %v2391_v4  ;;  %1626 = vmatpush3.bf16.msra.mxu1 %v2011_v14  ;;  %v1878_v14 = vld [vmem:[%s2575_s0 + $0x68] ss:$36 sps:$4 sm:$0xff]  }
  0x52   :  { %1627 = vmatprep.subr.bf16.mxu1 %v2023_v16  ;;  %v1887_v16 = vld [vmem:[%s2575_s0 + $0x9c] ss:$36 sps:$4 sm:$0xff]  }
  0x54   :  { %1750 = vmatpush3.bf16.msra.mxu0 %v2391_v4 }
  0x55   :  { %1751 = vmatprep.subr.bf16.mxu0 %v2407_v8  ;;  %1628 = vmatpush3.bf16.msra.mxu1 %v2035_v18  ;;  %v1879_v18 = vld [vmem:[%s2575_s0 + $0x90] ss:$36 sps:$4 sm:$0xff]  }
  0x56   :  { %1629 = vmatprep.subr.bf16.mxu1 %v2047_v20  ;;  %v1882_v20 = vld [vmem:[%s2575_s0 + $0xdc] ss:$36 sps:$4 sm:$0xff]  }
  0x58   :  { %1752 = vmatpush3.bf16.msra.mxu0 %v2407_v8 }
  0x59   :  { %1753 = vmatprep.subr.bf16.mxu0 %v2416_v10  ;;  %1630 = vmatpush3.bf16.msra.mxu1 %v2059_v22  ;;  %v2591_v22 = vld [vmem:[#allocation3_spill] sm:$0xff] }
  0x5a   :  { %1631 = vmatprep.subr.bf16.mxu1 %v2071_v24  ;;  %v2593_v24 = vld [vmem:[#allocation5_spill] sm:$0xff] }
  0x5c   :  { %1754 = vmatpush3.bf16.msra.mxu0 %v2416_v10 }
  0x5d   :  { %1755 = vmatprep.subr.bf16.mxu0 %v2425_v12  ;;  %1632 = vmatpush3.bf16.msra.mxu1 %v2083_v26  ;;  %v1897_v26 = vld [vmem:[%s2575_s0 + $0xa8] ss:$36 sps:$4 sm:$0xff]  }
  0x5e   :  { %1633 = vmatprep.subr.bf16.mxu1 %v2095_v28  ;;  %v1902_v28 = vld [vmem:[%s2575_s0 + $0xf4] ss:$36 sps:$4 sm:$0xff]  }
  0x60   :  { %1756 = vmatpush3.bf16.msra.mxu0 %v2425_v12 }
  0x61   :  { %1647 = vmatprep.subr.bf16.mxu0 %v1933_v1  ;;  %1634 = vmatpush3.bf16.msra.mxu1 %v2107_v30  ;;  %v1884_v1 = vld [vmem:[%s2575_s0 + $0xd8] ss:$36 sps:$4 sm:$0xff]   ;;  %v1904_v30 = vld [vmem:[%s2575_s0 + $0xf0] ss:$36 sps:$4 sm:$0xff]  }
  0x62   :  { %1675 = vmatprep.subr.bf16.mxu1 %v2132_v36 }
  0x63   :  { %1758 = vmatmul.mubr.bf16.vlgmr.msra.gmra.mrb[16].mxu0 %v1878_v14 }
  0x64   :  { %1648 = vmatpush3.bf16.msra.mxu0 %v1945_v3  ;;  %1142 = vmatprep.mubr.bf16.mxu0 %v1887_v16  ;;  %v1890_v3 = vld [vmem:[%s2575_s0 + $0xa4] ss:$36 sps:$4 sm:$0xff]  }
  0x65   :  { %1094 = vmatmul.mubr.bf16.vlgmr.msra.gmra.mrb[16].mxu1 %v1879_v18  ;;  %1649 = vmatprep.subr.bf16.mxu0 %v1957_v5  ;;  %v1885_v5 = vld [vmem:[%s2575_s0 + $0x98] ss:$36 sps:$4 sm:$0xff]  }
  0x66   :  { %1676 = vmatpush3.bf16.msra.mxu1 %v2137_v37  ;;  %1101 = vmatprep.mubr.bf16.mxu1 %v1882_v20 }
  0x67   :  { %1677 = vmatprep.subr.bf16.mxu1 %v2155_v40 }
  0x68   :  { %1650 = vmatpush3.bf16.msra.mxu0 %v1969_v7  ;;  %v1891_v7 = vld [vmem:[%s2575_s0 + $0xe4] ss:$36 sps:$4 sm:$0xff]  }
  0x69   :  { %1651 = vmatprep.subr.bf16.mxu0 %v1981_v9  ;;  %v1888_v9 = vld [vmem:[%s2575_s0 + $0xa0] ss:$36 sps:$4 sm:$0xff]  }
  0x6a   :  { %1678 = vmatpush3.bf16.msra.mxu1 %v2161_v41 }
  0x6b   :  { %1679 = vmatprep.subr.bf16.mxu1 %v2179_v44 }
  0x6c   :  { %1652 = vmatpush3.bf16.msra.mxu0 %v1993_v11  ;;  %v1894_v11 = vld [vmem:[%s2575_s0 + $0xec] ss:$36 sps:$4 sm:$0xff]  }
  0x6d   :  { %1653 = vmatprep.subr.bf16.mxu0 %v2005_v13  ;;  %1102 = vmatmul.mubr.bf16.gmra.mrb[20].mxu1 %v1884_v1  ;;  %v1893_v13 = vld [vmem:[%s2575_s0 + $0xe0] ss:$36 sps:$4 sm:$0xff]  }
  0x6e   :  { %1680 = vmatpush3.bf16.msra.mxu1 %v2185_v45  ;;  %1191 = vmatprep.mubr.bf16.mxu1 %v1890_v3 }
  0x6f   :  { %1681 = vmatprep.subr.bf16.mxu1 %v2203_v48 }
  0x70   :  { %1654 = vmatpush3.bf16.msra.mxu0 %v2017_v15  ;;  %v1899_v15 = vld [vmem:[%s2575_s0 + $0xac] ss:$36 sps:$4 sm:$0xff]  }
  0x71   :  { %1655 = vmatprep.subr.bf16.mxu0 %v2029_v17  ;;  %v1896_v17 = vld [vmem:[%s2575_s0 + $0xe8] ss:$36 sps:$4 sm:$0xff]  }
  0x72   :  { %1682 = vmatpush3.bf16.msra.mxu1 %v2209_v49 }
  0x73   :  { %1683 = vmatprep.subr.bf16.mxu1 %v2227_v52 }
  0x74   :  { %1656 = vmatpush3.bf16.msra.mxu0 %v2041_v19  ;;  %v1900_v19 = vld [vmem:[%s2575_s0 + $0xb0] ss:$36 sps:$4 sm:$0xff]  }
  0x75   :  { %1657 = vmatprep.subr.bf16.mxu0 %v2053_v21  ;;  %v2590_v21 = vld [vmem:[#allocation2_spill] sm:$0xff] }
  0x76   :  { %1684 = vmatpush3.bf16.msra.mxu1 %v2233_v53 }
  0x77   :  { %1685 = vmatprep.subr.bf16.mxu1 %v2251_v56 }
  0x78   :  { %1658 = vmatpush3.bf16.msra.mxu0 %v2065_v23  ;;  %v2592_v23 = vld [vmem:[#allocation4_spill] sm:$0xff] }
  0x79   :  { %1659 = vmatprep.subr.bf16.mxu0 %v2077_v25  ;;  %v2594_v25 = vld [vmem:[#allocation6_spill] sm:$0xff] }
  0x7a   :  { %1686 = vmatpush3.bf16.msra.mxu1 %v2264_v59 }
  0x7b   :  { %1687 = vmatprep.subr.bf16.mxu1 %v2287_v32 }
  0x7c   :  { %1660 = vmatpush3.bf16.msra.mxu0 %v2089_v27  ;;  %v2595_v27 = vld [vmem:[#allocation7_spill] sm:$0xff] }
  0x7d   :  { %1661 = vmatprep.subr.bf16.mxu0 %v2101_v29  ;;  %v1901_v29 = vld [vmem:[%s2575_s0 + $0xf8] ss:$36 sps:$4 sm:$0xff]  }
  0x7e   :  { %1688 = vmatpush3.bf16.msra.mxu1 %v2293_v33 }
  0x7f   :  { %1689 = vmatprep.subr.bf16.mxu1 %v2311_v57 }
  0x80   :  { %1662 = vmatpush3.bf16.msra.mxu0 %v2113_v31 }
  0x81   :  { %1703 = vmatprep.subr.bf16.mxu0 %v2143_v38 }
  0x82   :  { %1690 = vmatpush3.bf16.msra.mxu1 %v2317_v58 }
  0x83   :  { %1143 = vmatmul.mubr.bf16.vlgmr.msra.gmra.mrb[20].mxu0 %v1885_v5  ;;  %1761 = vmatprep.subr.bf16.mxu1 %v2341_v63 }
  0x84   :  { %1704 = vmatpush3.bf16.msra.mxu0 %v2149_v39  ;;  %1150 = vmatprep.mubr.bf16.mxu0 %v1891_v7 }
  0x85   :  { %1192 = vmatmul.mubr.bf16.vlgmr.msra.gmra.mrb[24].mxu1 %v1888_v9  ;;  %1705 = vmatprep.subr.bf16.mxu0 %v2167_v42 }
  0x86   :  { %1762 = vmatpush3.bf16.msra.mxu1 %v2341_v63  ;;  %1199 = vmatprep.mubr.bf16.mxu1 %v1894_v11 }
  0x87   :  { %1763 = vmatprep.subr.bf16.mxu1 %v2355_v35 }
  0x88   :  { %1706 = vmatpush3.bf16.msra.mxu0 %v2173_v43 }
  0x89   :  { %1707 = vmatprep.subr.bf16.mxu0 %v2191_v46 }
  0x8a   :  { %1764 = vmatpush3.bf16.msra.mxu1 %v2355_v35 }
  0x8b   :  { %1151 = vmatmul.mubr.bf16.gmra.mrb[24].mxu0 %v1893_v13  ;;  %1765 = vmatprep.subr.bf16.mxu1 %v2369_v0 }
  0x8c   :  { %1708 = vmatpush3.bf16.msra.mxu0 %v2197_v47  ;;  %1240 = vmatprep.mubr.bf16.mxu0 %v1899_v15 }
  0x8d   :  { %1200 = vmatmul.mubr.bf16.gmra.mrb[28].mxu1 %v1896_v17  ;;  %1709 = vmatprep.subr.bf16.mxu0 %v2215_v50 }
  0x8e   :  { %1766 = vmatpush3.bf16.msra.mxu1 %v2369_v0  ;;  %1777 = vmatprep.mubr.bf16.mxu1 %v1900_v19 }
  0x8f   :  { %1767 = vmatprep.subr.bf16.mxu1 %v2383_v2 }
  0x90   :  { %1710 = vmatpush3.bf16.msra.mxu0 %v2221_v51 }
  0x91   :  { %1711 = vmatprep.subr.bf16.mxu0 %v2239_v54 }
  0x92   :  { %1768 = vmatpush3.bf16.msra.mxu1 %v2383_v2 }
  0x93   :  { %1769 = vmatprep.subr.bf16.mxu1 %v2391_v4 }
  0x94   :  { %1712 = vmatpush3.bf16.msra.mxu0 %v2245_v55 }
  0x95   :  { %1713 = vmatprep.subr.bf16.mxu0 %v2590_v21 }
  0x96   :  { %1770 = vmatpush3.bf16.msra.mxu1 %v2391_v4 }
  0x97   :  { %1771 = vmatprep.subr.bf16.mxu1 %v2407_v8 }
  0x98   :  { %1714 = vmatpush3.bf16.msra.mxu0 %v2591_v22 }
  0x99   :  { %1715 = vmatprep.subr.bf16.mxu0 %v2592_v23 }
  0x9a   :  { %1772 = vmatpush3.bf16.msra.mxu1 %v2407_v8 }
  0x9b   :  { %1773 = vmatprep.subr.bf16.mxu1 %v2416_v10 }
  0x9c   :  { %1716 = vmatpush3.bf16.msra.mxu0 %v2593_v24 }
  0x9d   :  { %1717 = vmatprep.subr.bf16.mxu0 %v2594_v25 }
  0x9e   :  { %1774 = vmatpush3.bf16.msra.mxu1 %v2416_v10 }
  0x9f   :  { %1775 = vmatprep.subr.bf16.mxu1 %v2425_v12 }
  0xa0   :  { %1718 = vmatpush3.bf16.msra.mxu0 %v2595_v27 }
  0xa2   :  { %1776 = vmatpush3.bf16.msra.mxu1 %v2425_v12 }
  0xa3   :  { %1241 = vmatmul.mubr.bf16.vlgmr.msra.gmra.mrb[28].mxu0 %v1897_v26 }
  0xa4   :  { %1248 = vmatprep.mubr.bf16.mxu0 %v1902_v28 }
  0xa5   :  { %1778 = vmatmul.mubr.bf16.vlgmr.msra.gmra.mrb[32].mxu1 %v1901_v29 }
  0xab   :  { %1249 = vmatmul.mubr.bf16.gmra.mrb[32].mxu0 %v1904_v30 }
  0xf6   :  { %v1513_v31 = vpop.f32.mrb[0].mxu0 }
  0xf7   :  { %v1541_v36 = vpop.f32.mrb[0].mxu1  ;;  %v1514_v37 = vpop.f32.mrb[1].mxu0 }
  0xf8   :  { %v1515_v38 = vadd.f32 %v1514_v37, %v1513_v31  ;;  %v1542_v39 = vpop.f32.mrb[1].mxu1  ;;  %v1516_v40 = vpop.f32.mrb[2].mxu0 }
  0xf9   :  { %v1543_v41 = vadd.f32 %v1542_v39, %v1541_v36  ;;  %v1544_v42 = vpop.f32.mrb[2].mxu1  ;;  %v1517_v43 = vpop.f32.mrb[3].mxu0 }
  0xfa   :  { %v1518_v44 = vadd.f32 %v1517_v43, %v1516_v40  ;;  %v1545_v45 = vpop.f32.mrb[3].mxu1 }
  0xfb   :  { %v787_v46 = vadd.f32 %v1543_v41, %v1515_v38  ;;  %v1546_v47 = vadd.f32 %v1545_v45, %v1544_v42 }
  0xfd   :  { %v790_v48 = vadd.f32 %v1546_v47, %v1518_v44 }
  0xfe   :  { %v1519_v49 = vpop.f32.mrb[4].mxu0 }
  0xff   :  { %v1547_v50 = vpop.f32.mrb[4].mxu1  ;;  %v1520_v51 = vpop.f32.mrb[5].mxu0 }
 0x100   :  { %v1548_v52 = vpop.f32.mrb[5].mxu1  ;;  %v1521_v53 = vadd.f32 %v1520_v51, %v1519_v49  ;;  %v1522_v55 = vpop.f32.mrb[6].mxu0 }
 0x101   :  { %v1549_v54 = vadd.f32 %v1548_v52, %v1547_v50  ;;  %v1550_v56 = vpop.f32.mrb[6].mxu1  ;;  %v1523_v59 = vpop.f32.mrb[7].mxu0 }
 0x102   :  { %v1551_v63 = vpop.f32.mrb[7].mxu1  ;;  %v1524_v33 = vadd.f32 %v1523_v59, %v1522_v55 }
 0x103   :  { %v795_v32 = vadd.f32 %v1549_v54, %v1521_v53  ;;  %v1552_v34 = vadd.f32 %v1551_v63, %v1550_v56 }
 0x105   :  { %v798_v57 = vadd.f32 %v1552_v34, %v1524_v33 }
 0x116   :  { %v1569_v58 = vpop.f32.mrb[8].mxu0 }
 0x117   :  { %v1570_v35 = vpop.f32.mrb[9].mxu0  ;;  %v1597_v60 = vpop.f32.mrb[8].mxu1 }
 0x118   :  { %v1571_v0 = vadd.f32 %v1570_v35, %v1569_v58  ;;  %v1572_v62 = vpop.f32.mrb[10].mxu0  ;;  %v1598_v6 = vpop.f32.mrb[9].mxu1 }
 0x119   :  { %v1573_v2 = vpop.f32.mrb[11].mxu0  ;;  %v1599_v8 = vadd.f32 %v1598_v6, %v1597_v60  ;;  %v1600_v10 = vpop.f32.mrb[10].mxu1 }
 0x11a   :  { %v836_v4 = vadd.f32 %v1571_v0, %v787_v46  ;;  %v1574_v61 = vadd.f32 %v1573_v2, %v1572_v62  ;;  %v1601_v14 = vpop.f32.mrb[11].mxu1 }
 0x11b   :  { %v1602_v16 = vadd.f32 %v1601_v14, %v1600_v10 }
 0x11c   :  { %v839_v12 = vadd.f32 %v1574_v61, %v790_v48  ;;  %v885_v18 = vadd.f32 %v1599_v8, %v836_v4 }
 0x11e   :  { %v1575_v20 = vpop.f32.mrb[12].mxu0  ;;  %v888_v3 = vadd.f32 %v1602_v16, %v839_v12 }
 0x11f   :  { %v1576_v1 = vpop.f32.mrb[13].mxu0  ;;  %v1603_v9 = vpop.f32.mrb[12].mxu1 }
 0x120   :  { %v1577_v5 = vadd.f32 %v1576_v1, %v1575_v20  ;;  %v1578_v7 = vpop.f32.mrb[14].mxu0  ;;  %v1604_v17 = vpop.f32.mrb[13].mxu1 }
 0x121   :  { %v1579_v11 = vpop.f32.mrb[15].mxu0  ;;  %v1605_v19 = vadd.f32 %v1604_v17, %v1603_v9  ;;  %v1606_v21 = vpop.f32.mrb[14].mxu1 }
 0x122   :  { %v844_v13 = vadd.f32 %v1577_v5, %v795_v32  ;;  %v1580_v15 = vadd.f32 %v1579_v11, %v1578_v7  ;;  %v1607_v23 = vpop.f32.mrb[15].mxu1 }
 0x123   :  { %v1608_v24 = vadd.f32 %v1607_v23, %v1606_v21 }
 0x124   :  { %v847_v22 = vadd.f32 %v1580_v15, %v798_v57  ;;  %v893_v25 = vadd.f32 %v1605_v19, %v844_v13 }
 0x126   :  { %v896_v26 = vadd.f32 %v1608_v24, %v847_v22 }
 0x136   :  { %v1759_v27 = vpop.f32.mrb[16].mxu0 }
 0x137   :  { %v2553_v28 = vadd.f32 %v1759_v27, %v893_v25  ;;  %v933_v29 = vpop.f32.mrb[17].mxu0 }
 0x138   :  { %v2555_v30 = vadd.f32 %v933_v29, %v885_v18  ;;  %v1760_v31 = vpop.f32.mrb[18].mxu0  ;;  %v1635_v36 = vpop.f32.mrb[16].mxu1  ;;  %v1477_v29 = vld [vmem:[%s2576_s2] ss:$0 sm:$0xff] }
 0x139   :  { %v2557_v37 = vadd.f32 %v1760_v31, %v896_v26  ;;  %v936_v38 = vpop.f32.mrb[19].mxu0  ;;  %v1636_v39 = vpop.f32.mrb[17].mxu1 }
 0x13a   :  { %v2559_v40 = vadd.f32 %v936_v38, %v888_v3  ;;  %v1637_v41 = vadd.f32 %v1636_v39, %v1635_v36  ;;  %v1638_v42 = vpop.f32.mrb[18].mxu1 }
 0x13b   :  { %v1639_v43 = vpop.f32.mrb[19].mxu1 }
 0x13c   :  { %v1640_v44 = vadd.f32 %v1639_v43, %v1638_v42 }
 0x140   :  { %v1641_v45 = vpop.f32.mrb[20].mxu1 }
 0x141   :  { %v1642_v46 = vpop.f32.mrb[21].mxu1 }
 0x142   :  { %v1643_v47 = vadd.f32 %v1642_v46, %v1641_v45  ;;  %v1644_v48 = vpop.f32.mrb[22].mxu1 }
 0x143   :  { %v1645_v49 = vpop.f32.mrb[23].mxu1 }
 0x144   :  { %v1646_v50 = vadd.f32 %v1645_v49, %v1644_v48 }
 0x156   :  { %v1663_v51 = vpop.f32.mrb[20].mxu0 }
 0x157   :  { %v1664_v52 = vpop.f32.mrb[21].mxu0 }
 0x158   :  { %v1665_v53 = vadd.f32 %v1664_v52, %v1663_v51  ;;  %v1666_v54 = vpop.f32.mrb[22].mxu0  ;;  %v1691_v55 = vpop.f32.mrb[24].mxu1 }
 0x159   :  { %v1667_v56 = vpop.f32.mrb[23].mxu0  ;;  %v1692_v59 = vpop.f32.mrb[25].mxu1 }
 0x15a   :  { %v1145_v63 = vadd.f32 %v1665_v53, %v1637_v41  ;;  %v1668_v32 = vadd.f32 %v1667_v56, %v1666_v54  ;;  %v1693_v33 = vadd.f32 %v1692_v59, %v1691_v55  ;;  %v1694_v34 = vpop.f32.mrb[26].mxu1 }
 0x15b   :  { %v1695_v57 = vpop.f32.mrb[27].mxu1 }
 0x15c   :  { %v1148_v58 = vadd.f32 %v1668_v32, %v1640_v44  ;;  %v1194_v35 = vadd.f32 %v1693_v33, %v1145_v63  ;;  %v1696_v0 = vadd.f32 %v1695_v57, %v1694_v34 }
 0x15e   :  { %v1197_v62 = vadd.f32 %v1696_v0, %v1148_v58  ;;  %v1669_v60 = vpop.f32.mrb[24].mxu0 }
 0x15f   :  { %v1670_v2 = vpop.f32.mrb[25].mxu0 }
 0x160   :  { %v1671_v4 = vadd.f32 %v1670_v2, %v1669_v60  ;;  %v1672_v61 = vpop.f32.mrb[26].mxu0  ;;  %v1697_v6 = vpop.f32.mrb[28].mxu1 }
 0x161   :  { %v1673_v8 = vpop.f32.mrb[27].mxu0  ;;  %v1698_v10 = vpop.f32.mrb[29].mxu1 }
 0x162   :  { %v1153_v12 = vadd.f32 %v1671_v4, %v1643_v47  ;;  %v1674_v14 = vadd.f32 %v1673_v8, %v1672_v61  ;;  %v1699_v16 = vadd.f32 %v1698_v10, %v1697_v6  ;;  %v1700_v18 = vpop.f32.mrb[30].mxu1 }
 0x163   :  { %v1701_v20 = vpop.f32.mrb[31].mxu1 }
 0x164   :  { %v1156_v1 = vadd.f32 %v1674_v14, %v1646_v50  ;;  %v1202_v3 = vadd.f32 %v1699_v16, %v1153_v12  ;;  %v1702_v5 = vadd.f32 %v1701_v20, %v1700_v18 }
 0x166   :  { %v1205_v7 = vadd.f32 %v1702_v5, %v1156_v1 }
 0x176   :  { %v1719_v9 = vpop.f32.mrb[28].mxu0 }
 0x177   :  { %v1720_v11 = vpop.f32.mrb[29].mxu0 }
 0x178   :  { %v1721_v13 = vadd.f32 %v1720_v11, %v1719_v9  ;;  %v1722_v15 = vpop.f32.mrb[30].mxu0  ;;  %v1779_v17 = vpop.f32.mrb[32].mxu1 }
 0x179   :  { %v1723_v19 = vpop.f32.mrb[31].mxu0  ;;  %v1291_v21 = vpop.f32.mrb[33].mxu1 }
 0x17a   :  { %v1724_v22 = vadd.f32 %v1723_v19, %v1722_v15  ;;  %v1243_v23 = vadd.f32 %v1721_v13, %v1194_v35  ;;  %v1780_v24 = vpop.f32.mrb[34].mxu1 }
 0x17b   :  { %v1294_v25 = vpop.f32.mrb[35].mxu1 }
 0x17c   :  { %v1292_v26 = vadd.f32 %v1291_v21, %v1243_v23  ;;  %v1246_v27 = vadd.f32 %v1724_v22, %v1197_v62 }
 0x17e   :  { %v1306_v31 = vmax.f32 %v2555_v30, %v1292_v26  ;;  %v1295_v36 = vadd.f32 %v1294_v25, %v1246_v27  ;;  %v1725_v38 = vpop.f32.mrb[32].mxu0 }
 0x17f   :  { %v1726_v39 = vpop.f32.mrb[33].mxu0 }
 0x180   :  { %v1317_v41 = vadd.f32 %v1477_v29, %v1306_v31  ;;  %v1307_v42 = vmax.f32 %v2559_v40, %v1295_v36  ;;  %v1727_v43 = vadd.f32 %v1726_v39, %v1725_v38  ;;  %v1728_v44 = vpop.f32.mrb[34].mxu0 }
 0x181   :  { %v1729_v45 = vpop.f32.mrb[35].mxu0 }
 0x182   :  { %v1318_v46 = vadd.f32 %v1477_v29, %v1307_v42  ;;  %v1251_v47 = vadd.f32 %v1727_v43, %v1202_v3  ;;  %v1730_v48 = vadd.f32 %v1729_v45, %v1728_v44  ;;  %v1321_v49 = vmax.f32 %v1317_v41, 0.0 }
 0x184   :  { %v1322_v50 = vmax.f32 %v1318_v46, 0.0  ;;  %v1300_v51 = vadd.f32 %v1779_v17, %v1251_v47  ;;  %v1254_v52 = vadd.f32 %v1730_v48, %v1205_v7 }
 0x186   :  { %v1489_v53 = vpack.c.bf16 %v1322_v50, %v1321_v49  ;;  %v1308_v54 = vmax.f32 %v2553_v28, %v1300_v51  ;;  %v1303_v30 = vadd.f32 %v1780_v24, %v1254_v52 }
 0x188   :  { %1490 = vst [vmem:[%s2577_s3] sm:$0xff] %v1489_v53   ;;  %v1319_v55 = vadd.f32 %v1477_v29, %v1308_v54  ;;  %v1309_v40 = vmax.f32 %v2557_v37, %v1303_v30 }
 0x18a   :  { %v1320_v56 = vadd.f32 %v1477_v29, %v1309_v40  ;;  %v1323_v59 = vmax.f32 %v1319_v55, 0.0 }
 0x18c   :  { %v1324_v63 = vmax.f32 %v1320_v56, 0.0 }
 0x18e   :  { %v1494_v32 = vpack.c.bf16 %v1324_v63, %v1323_v59 }
 0x190   :  { %1496 = vst [vmem:[%s2577_s3 + $0x8] sm:$0xff] %v1494_v32  }

// kernel: vgg_feature_extractor.13
= control target key start
LH: loop header
LB: loop body
LE: loop exit
PB: predicated region body
PF: predicated region fallthrough
CT: control target
= control target key end

     0   :  { %vm989_vm0 = vcmask 1040384   ;;  %s1648_s1 = inlined_call_operand.vmem [shape: bf16[1152,128], index: 1, kind: input, shape index: {}]   ;;  %s1649_s0 = inlined_call_operand.vmem [shape: bf16[32,1152], index: 0, kind: input, shape index: {}]   ;;  %s1650_s2 = inlined_call_operand.vmem [shape: bf16[32,128], index: 2, kind: output, shape index: {0}]   ;;  %s1651_s3 = inlined_call_operand.vmem [shape: f32[1,2,128], index: 3, kind: output, shape index: {1}]  }
   0x1   :  { %v1251_v0 = vld [vmem:[%s1648_s1 + $0x40] sm:$0xff]   ;;  %v1255_v4 = vld [vmem:[%s1648_s1 + $0x48] sm:$0xff]   ;;  %v1259_v8 = vld [vmem:[%s1648_s1 + $0x50] sm:$0xff]  }
   0x2   :  { %v1252_v1 = vld [vmem:[%s1648_s1 + $0xc0] sm:$0xff]   ;;  %1109 = vmatprep.subr.bf16.mxu0 %v1251_v0  ;;  %v1256_v5 = vld [vmem:[%s1648_s1 + $0xc8] sm:$0xff]   ;;  %v1260_v9 = vld [vmem:[%s1648_s1 + $0xd0] sm:$0xff]  }
   0x3   :  { %v1253_v2 = vld [vmem:[%s1648_s1] sm:$0xff]   ;;  %1137 = vmatprep.subr.bf16.mxu1 %v1252_v1  ;;  %v1257_v6 = vld [vmem:[%s1648_s1 + $0x8] sm:$0xff]   ;;  %v1261_v10 = vld [vmem:[%s1648_s1 + $0x10] sm:$0xff]  }
   0x4   :  { %v1254_v3 = vld [vmem:[%s1648_s1 + $0x80] sm:$0xff]   ;;  %1110 = vmatpush3.bf16.msra.mxu0 %v1253_v2  ;;  %v1258_v7 = vld [vmem:[%s1648_s1 + $0x88] sm:$0xff]   ;;  %v1262_v11 = vld [vmem:[%s1648_s1 + $0x90] sm:$0xff]  }
   0x5   :  { %1138 = vmatpush3.bf16.msra.mxu1 %v1254_v3  ;;  %1111 = vmatprep.subr.bf16.mxu0 %v1255_v4  ;;  %v1263_v12 = vld [vmem:[%s1648_s1 + $0x58] sm:$0xff]   ;;  %v1267_v16 = vld [vmem:[%s1648_s1 + $0x60] sm:$0xff]   ;;  %v1271_v20 = vld [vmem:[%s1648_s1 + $0x68] sm:$0xff]  }
   0x6   :  { %1139 = vmatprep.subr.bf16.mxu1 %v1256_v5  ;;  %v1264_v13 = vld [vmem:[%s1648_s1 + $0xd8] sm:$0xff]   ;;  %v1268_v17 = vld [vmem:[%s1648_s1 + $0xe0] sm:$0xff]   ;;  %v1272_v21 = vld [vmem:[%s1648_s1 + $0xe8] sm:$0xff]  }
   0x7   :  { %v1265_v14 = vld [vmem:[%s1648_s1 + $0x18] sm:$0xff]   ;;  %v1269_v18 = vld [vmem:[%s1648_s1 + $0x20] sm:$0xff]   ;;  %v1273_v22 = vld [vmem:[%s1648_s1 + $0x28] sm:$0xff]  }
   0x8   :  { %1112 = vmatpush3.bf16.msra.mxu0 %v1257_v6  ;;  %v1266_v15 = vld [vmem:[%s1648_s1 + $0x98] sm:$0xff]   ;;  %v1270_v19 = vld [vmem:[%s1648_s1 + $0xa0] sm:$0xff]   ;;  %v1274_v23 = vld [vmem:[%s1648_s1 + $0xa8] sm:$0xff]  }
   0x9   :  { %1140 = vmatpush3.bf16.msra.mxu1 %v1258_v7  ;;  %1113 = vmatprep.subr.bf16.mxu0 %v1259_v8  ;;  %v1275_v24 = vld [vmem:[%s1648_s1 + $0x70] sm:$0xff]   ;;  %v1279_v28 = vld [vmem:[%s1648_s1 + $0x78] sm:$0xff]   ;;  %v1283_v32 = vld [vmem:[%s1649_s0] ss:$36 sps:$4 sm:$0xff]  }
   0xa   :  { %1141 = vmatprep.subr.bf16.mxu1 %v1260_v9  ;;  %v1276_v25 = vld [vmem:[%s1648_s1 + $0xf0] sm:$0xff]   ;;  %v1280_v29 = vld [vmem:[%s1648_s1 + $0xf8] sm:$0xff]   ;;  %v1285_v33 = vld [vmem:[%s1649_s0 + $0x4] ss:$36 sps:$4 sm:$0xff]  }
   0xb   :  { %v1277_v26 = vld [vmem:[%s1648_s1 + $0x30] sm:$0xff]   ;;  %v1281_v30 = vld [vmem:[%s1648_s1 + $0x38] sm:$0xff]   ;;  %v1286_v34 = vld [vmem:[%s1649_s0 + $0x8] ss:$36 sps:$4 sm:$0xff]   ;;  %734 = vmatprep.mubr.bf16.mxu0 %v1285_v33 }
   0xc   :  { %1114 = vmatpush3.bf16.msra.mxu0 %v1261_v10  ;;  %v1278_v27 = vld [vmem:[%s1648_s1 + $0xb0] sm:$0xff]   ;;  %v1282_v31 = vld [vmem:[%s1648_s1 + $0xb8] sm:$0xff]   ;;  %v1289_v36 = vld [vmem:[%s1648_s1 + $0x140] sm:$0xff]  }
   0xd   :  { %1142 = vmatpush3.bf16.msra.mxu1 %v1262_v11  ;;  %1115 = vmatprep.subr.bf16.mxu0 %v1263_v12  ;;  %v1288_v35 = vld [vmem:[%s1649_s0 + $0xc] ss:$36 sps:$4 sm:$0xff]   ;;  %v1290_v37 = vld [vmem:[%s1648_s1 + $0x100] sm:$0xff]   ;;  %v1301_v48 = vld [vmem:[%s1648_s1 + $0x158] sm:$0xff]  }
   0xe   :  { %1143 = vmatprep.subr.bf16.mxu1 %v1264_v13  ;;  %783 = vmatprep.mubr.bf16.mxu1 %v1288_v35  ;;  %v1291_v38 = vld [vmem:[%s1648_s1 + $0x1c0] sm:$0xff]   ;;  %v1293_v40 = vld [vmem:[%s1648_s1 + $0x148] sm:$0xff]   ;;  %v1297_v44 = vld [vmem:[%s1648_s1 + $0x150] sm:$0xff]  }
   0xf   :  { %v1292_v39 = vld [vmem:[%s1648_s1 + $0x180] sm:$0xff]   ;;  %v1294_v41 = vld [vmem:[%s1648_s1 + $0x108] sm:$0xff]   ;;  %v1298_v45 = vld [vmem:[%s1648_s1 + $0x110] sm:$0xff]  }
  0x10   :  { %1116 = vmatpush3.bf16.msra.mxu0 %v1265_v14  ;;  %v1295_v42 = vld [vmem:[%s1648_s1 + $0x1c8] sm:$0xff]   ;;  %v1299_v46 = vld [vmem:[%s1648_s1 + $0x1d0] sm:$0xff]   ;;  %v1302_v49 = vld [vmem:[%s1648_s1 + $0x118] sm:$0xff]  }
  0x11   :  { %1144 = vmatpush3.bf16.msra.mxu1 %v1266_v15  ;;  %1117 = vmatprep.subr.bf16.mxu0 %v1267_v16  ;;  %v1296_v43 = vld [vmem:[%s1648_s1 + $0x188] sm:$0xff]   ;;  %v1300_v47 = vld [vmem:[%s1648_s1 + $0x190] sm:$0xff]   ;;  %v1303_v50 = vld [vmem:[%s1648_s1 + $0x1d8] sm:$0xff]  }
  0x12   :  { %1145 = vmatprep.subr.bf16.mxu1 %v1268_v17  ;;  %v1304_v51 = vld [vmem:[%s1648_s1 + $0x198] sm:$0xff]   ;;  %v1305_v52 = vld [vmem:[%s1648_s1 + $0x160] sm:$0xff]   ;;  %v1309_v56 = vld [vmem:[%s1648_s1 + $0x168] sm:$0xff]  }
  0x13   :  { %v1306_v53 = vld [vmem:[%s1648_s1 + $0x120] sm:$0xff]   ;;  %v1310_v57 = vld [vmem:[%s1649_s0 + $0x4c] ss:$36 sps:$4 sm:$0xff]   ;;  %v1312_v58 = vld [vmem:[%s1649_s0 + $0x54] ss:$36 sps:$4 sm:$0xff]  }
  0x14   :  { %1118 = vmatpush3.bf16.msra.mxu0 %v1269_v18  ;;  %v1307_v54 = vld [vmem:[%s1648_s1 + $0x1e0] sm:$0xff]   ;;  %v1314_v59 = vld [vmem:[%s1648_s1 + $0x128] sm:$0xff]   ;;  %v1316_v61 = vld [vmem:[%s1649_s0 + $0x50] ss:$36 sps:$4 sm:$0xff]  }
  0x15   :  { %1146 = vmatpush3.bf16.msra.mxu1 %v1270_v19  ;;  %1119 = vmatprep.subr.bf16.mxu0 %v1271_v20  ;;  %v1308_v55 = vld [vmem:[%s1648_s1 + $0x1a0] sm:$0xff]   ;;  %v1315_v60 = vld [vmem:[%s1649_s0 + $0x48] ss:$36 sps:$4 sm:$0xff]   ;;  %v1319_v0 = vld [vmem:[%s1648_s1 + $0x170] sm:$0xff]  }
  0x16   :  { %1147 = vmatprep.subr.bf16.mxu1 %v1272_v21  ;;  %v1317_v62 = vld [vmem:[%s1648_s1 + $0x1e8] sm:$0xff]   ;;  %v1320_v1 = vld [vmem:[%s1648_s1 + $0x130] sm:$0xff]   ;;  %v1323_v4 = vld [vmem:[%s1648_s1 + $0x178] sm:$0xff]  }
  0x17   :  { %v1318_v63 = vld [vmem:[%s1648_s1 + $0x1a8] sm:$0xff]   ;;  %v1321_v2 = vld [vmem:[%s1648_s1 + $0x1f0] sm:$0xff]   ;;  %v1324_v5 = vld [vmem:[%s1648_s1 + $0x138] sm:$0xff]  }
  0x18   :  { %1120 = vmatpush3.bf16.msra.mxu0 %v1273_v22  ;;  %v1322_v3 = vld [vmem:[%s1648_s1 + $0x1b0] sm:$0xff]   ;;  %v1325_v6 = vld [vmem:[%s1648_s1 + $0x1f8] sm:$0xff]   ;;  %v1330_v10 = vld [vmem:[%s1648_s1 + $0x200] sm:$0xff]  }
  0x19   :  { %1148 = vmatpush3.bf16.msra.mxu1 %v1274_v23  ;;  %1121 = vmatprep.subr.bf16.mxu0 %v1275_v24  ;;  %v1326_v7 = vld [vmem:[%s1649_s0 + $0x10] ss:$36 sps:$4 sm:$0xff]   ;;  %v1329_v9 = vld [vmem:[%s1648_s1 + $0x1b8] sm:$0xff]   ;;  %v1334_v13 = vld [vmem:[%s1648_s1 + $0x208] sm:$0xff]  }
  0x1a   :  { %1149 = vmatprep.subr.bf16.mxu1 %v1276_v25  ;;  %v1328_v8 = vld [vmem:[%s1649_s0 + $0x14] ss:$36 sps:$4 sm:$0xff]   ;;  %v1333_v12 = vld [vmem:[%s1649_s0 + $0x1c] ss:$36 sps:$4 sm:$0xff]   ;;  %v1339_v17 = vld [vmem:[%s1649_s0 + $0x64] ss:$36 sps:$4 sm:$0xff]  }
  0x1b   :  { %v1331_v11 = vld [vmem:[%s1649_s0 + $0x18] ss:$36 sps:$4 sm:$0xff]   ;;  %v1338_v16 = vld [vmem:[%s1648_s1 + $0x210] sm:$0xff]   ;;  %v1341_v18 = vld [vmem:[%s1649_s0 + $0x60] ss:$36 sps:$4 sm:$0xff]  }
  0x1c   :  { %1122 = vmatpush3.bf16.msra.mxu0 %v1277_v26  ;;  %v1335_v14 = vld [vmem:[%s1649_s0 + $0x5c] ss:$36 sps:$4 sm:$0xff]   ;;  %v1344_v22 = vld [vmem:[%s1648_s1 + $0x228] sm:$0xff]   ;;  %v1345_v23 = vld [vmem:[%s1648_s1 + $0x230] sm:$0xff]  }
  0x1d   :  { %1150 = vmatpush3.bf16.msra.mxu1 %v1278_v27  ;;  %1123 = vmatprep.subr.bf16.mxu0 %v1279_v28  ;;  %v1337_v15 = vld [vmem:[%s1649_s0 + $0x58] ss:$36 sps:$4 sm:$0xff]   ;;  %v1343_v20 = vld [vmem:[%s1648_s1 + $0x220] sm:$0xff]   ;;  %v1348_v25 = vld [vmem:[%s1649_s0 + $0x68] ss:$36 sps:$4 sm:$0xff]  }
  0x1e   :  { %1151 = vmatprep.subr.bf16.mxu1 %v1280_v29  ;;  %v1342_v19 = vld [vmem:[%s1648_s1 + $0x218] sm:$0xff]   ;;  %v1347_v21 = vld [vmem:[%s1649_s0 + $0x20] ss:$36 sps:$4 sm:$0xff]  }
  0x1f   :  { %v1346_v24 = vld [vmem:[%s1648_s1 + $0x238] sm:$0xff]  }
  0x20   :  { %1124 = vmatpush3.bf16.msra.mxu0 %v1281_v30 }
  0x21   :  { %1152 = vmatpush3.bf16.msra.mxu1 %v1282_v31  ;;  %1165 = vmatprep.subr.bf16.mxu0 %v1289_v36 }
  0x22   :  { %1193 = vmatprep.subr.bf16.mxu1 %v1291_v38 }
  0x23   :  { %735 = vmatmul.mubr.bf16.vlgmr.msra.gmra.mrb[0].mxu0 %v1283_v32 }
  0x24   :  { %784 = vmatmul.mubr.bf16.vlgmr.msra.gmra.mrb[0].mxu1 %v1286_v34  ;;  %1166 = vmatpush3.bf16.msra.mxu0 %v1290_v37 }
  0x25   :  { %1194 = vmatpush3.bf16.msra.mxu1 %v1292_v39  ;;  %1167 = vmatprep.subr.bf16.mxu0 %v1293_v40 }
  0x26   :  { %1195 = vmatprep.subr.bf16.mxu1 %v1295_v42  ;;  %742 = vmatprep.mubr.bf16.mxu0 %v1310_v57 }
  0x27   :  { %791 = vmatprep.mubr.bf16.mxu1 %v1312_v58 }
  0x28   :  { %1168 = vmatpush3.bf16.msra.mxu0 %v1294_v41 }
  0x29   :  { %1196 = vmatpush3.bf16.msra.mxu1 %v1296_v43  ;;  %1169 = vmatprep.subr.bf16.mxu0 %v1297_v44 }
  0x2a   :  { %1197 = vmatprep.subr.bf16.mxu1 %v1299_v46 }
  0x2b   :  { %743 = vmatmul.mubr.bf16.gmra.mrb[4].mxu0 %v1315_v60 }
  0x2c   :  { %1170 = vmatpush3.bf16.msra.mxu0 %v1298_v45  ;;  %792 = vmatmul.mubr.bf16.gmra.mrb[4].mxu1 %v1316_v61 }
  0x2d   :  { %1198 = vmatpush3.bf16.msra.mxu1 %v1300_v47  ;;  %1171 = vmatprep.subr.bf16.mxu0 %v1301_v48 }
  0x2e   :  { %1199 = vmatprep.subr.bf16.mxu1 %v1303_v50  ;;  %832 = vmatprep.mubr.bf16.mxu0 %v1328_v8 }
  0x2f   :  { %881 = vmatprep.mubr.bf16.mxu1 %v1333_v12 }
  0x30   :  { %1172 = vmatpush3.bf16.msra.mxu0 %v1302_v49 }
  0x31   :  { %1200 = vmatpush3.bf16.msra.mxu1 %v1304_v51  ;;  %1173 = vmatprep.subr.bf16.mxu0 %v1305_v52 }
  0x32   :  { %1201 = vmatprep.subr.bf16.mxu1 %v1307_v54 }
  0x34   :  { %1174 = vmatpush3.bf16.msra.mxu0 %v1306_v53 }
  0x35   :  { %1202 = vmatpush3.bf16.msra.mxu1 %v1308_v55  ;;  %1175 = vmatprep.subr.bf16.mxu0 %v1309_v56 }
  0x36   :  { %1203 = vmatprep.subr.bf16.mxu1 %v1317_v62 }
  0x38   :  { %1176 = vmatpush3.bf16.msra.mxu0 %v1314_v59 }
  0x39   :  { %1204 = vmatpush3.bf16.msra.mxu1 %v1318_v63  ;;  %1177 = vmatprep.subr.bf16.mxu0 %v1319_v0 }
  0x3a   :  { %1205 = vmatprep.subr.bf16.mxu1 %v1321_v2 }
  0x3c   :  { %1178 = vmatpush3.bf16.msra.mxu0 %v1320_v1 }
  0x3d   :  { %1206 = vmatpush3.bf16.msra.mxu1 %v1322_v3  ;;  %1179 = vmatprep.subr.bf16.mxu0 %v1323_v4 }
  0x3e   :  { %1207 = vmatprep.subr.bf16.mxu1 %v1325_v6 }
  0x40   :  { %1180 = vmatpush3.bf16.msra.mxu0 %v1324_v5 }
  0x41   :  { %1208 = vmatpush3.bf16.msra.mxu1 %v1329_v9  ;;  %1231 = vmatprep.subr.bf16.mxu0 %v1330_v10 }
  0x43   :  { %833 = vmatmul.mubr.bf16.vlgmr.msra.gmra.mrb[8].mxu0 %v1326_v7 }
  0x44   :  { %1232 = vmatpush3.bf16.msra.mxu0 %v1330_v10  ;;  %882 = vmatmul.mubr.bf16.vlgmr.msra.gmra.mrb[8].mxu1 %v1331_v11 }
  0x45   :  { %1233 = vmatprep.subr.bf16.mxu0 %v1334_v13  ;;  %840 = vmatprep.mubr.bf16.mxu0 %v1335_v14 }
  0x46   :  { %889 = vmatprep.mubr.bf16.mxu1 %v1339_v17 }
  0x48   :  { %1234 = vmatpush3.bf16.msra.mxu0 %v1334_v13 }
  0x49   :  { %1235 = vmatprep.subr.bf16.mxu0 %v1338_v16 }
  0x4b   :  { %841 = vmatmul.mubr.bf16.gmra.mrb[12].mxu0 %v1337_v15 }
  0x4c   :  { %1236 = vmatpush3.bf16.msra.mxu0 %v1338_v16  ;;  %890 = vmatmul.mubr.bf16.gmra.mrb[12].mxu1 %v1341_v18 }
  0x4d   :  { %1237 = vmatprep.subr.bf16.mxu0 %v1342_v19  ;;  %1247 = vmatprep.mubr.bf16.mxu0 %v1347_v21 }
  0x50   :  { %1238 = vmatpush3.bf16.msra.mxu0 %v1342_v19 }
  0x51   :  { %1239 = vmatprep.subr.bf16.mxu0 %v1343_v20 }
  0x54   :  { %1240 = vmatpush3.bf16.msra.mxu0 %v1343_v20 }
  0x55   :  { %1241 = vmatprep.subr.bf16.mxu0 %v1344_v22 }
  0x58   :  { %1242 = vmatpush3.bf16.msra.mxu0 %v1344_v22 }
  0x59   :  { %1243 = vmatprep.subr.bf16.mxu0 %v1345_v23 }
  0x5c   :  { %1244 = vmatpush3.bf16.msra.mxu0 %v1345_v23 }
  0x5d   :  { %1245 = vmatprep.subr.bf16.mxu0 %v1346_v24 }
  0x60   :  { %1246 = vmatpush3.bf16.msra.mxu0 %v1346_v24 }
  0x63   :  { %1248 = vmatmul.mubr.bf16.vlgmr.msra.gmra.mrb[16].mxu0 %v1348_v25 }
  0xf6   :  { %v1125_v26 = vpop.f32.mrb[0].mxu0 }
  0xf7   :  { %v1153_v27 = vpop.f32.mrb[0].mxu1  ;;  %v1126_v28 = vpop.f32.mrb[1].mxu0 }
  0xf8   :  { %v1127_v29 = vadd.f32 %v1126_v28, %v1125_v26  ;;  %v1154_v30 = vpop.f32.mrb[1].mxu1  ;;  %v1128_v31 = vpop.f32.mrb[2].mxu0 }
  0xf9   :  { %v1155_v32 = vadd.f32 %v1154_v30, %v1153_v27  ;;  %v1156_v33 = vpop.f32.mrb[2].mxu1  ;;  %v1129_v34 = vpop.f32.mrb[3].mxu0 }
  0xfa   :  { %v1130_v35 = vadd.f32 %v1129_v34, %v1128_v31  ;;  %v1157_v36 = vpop.f32.mrb[3].mxu1 }
  0xfb   :  { %v786_v37 = vadd.f32 %v1155_v32, %v1127_v29  ;;  %v1158_v38 = vadd.f32 %v1157_v36, %v1156_v33 }
  0xfd   :  { %v789_v39 = vadd.f32 %v1158_v38, %v1130_v35 }
  0xfe   :  { %v1131_v40 = vpop.f32.mrb[4].mxu0 }
  0xff   :  { %v1159_v41 = vpop.f32.mrb[4].mxu1  ;;  %v1132_v42 = vpop.f32.mrb[5].mxu0 }
 0x100   :  { %v1160_v43 = vpop.f32.mrb[5].mxu1  ;;  %v1133_v44 = vadd.f32 %v1132_v42, %v1131_v40  ;;  %v1134_v46 = vpop.f32.mrb[6].mxu0 }
 0x101   :  { %v1161_v45 = vadd.f32 %v1160_v43, %v1159_v41  ;;  %v1162_v47 = vpop.f32.mrb[6].mxu1  ;;  %v1135_v48 = vpop.f32.mrb[7].mxu0 }
 0x102   :  { %v1163_v49 = vpop.f32.mrb[7].mxu1  ;;  %v1136_v51 = vadd.f32 %v1135_v48, %v1134_v46 }
 0x103   :  { %v794_v50 = vadd.f32 %v1161_v45, %v1133_v44  ;;  %v1164_v52 = vadd.f32 %v1163_v49, %v1162_v47 }
 0x105   :  { %v797_v53 = vadd.f32 %v1164_v52, %v1136_v51 }
 0x116   :  { %v1181_v54 = vpop.f32.mrb[8].mxu0 }
 0x117   :  { %v1182_v55 = vpop.f32.mrb[9].mxu0  ;;  %v1209_v58 = vpop.f32.mrb[8].mxu1 }
 0x118   :  { %v1183_v56 = vadd.f32 %v1182_v55, %v1181_v54  ;;  %v1184_v57 = vpop.f32.mrb[10].mxu0  ;;  %v1210_v62 = vpop.f32.mrb[9].mxu1 }
 0x119   :  { %v1185_v59 = vpop.f32.mrb[11].mxu0  ;;  %v1211_v63 = vadd.f32 %v1210_v62, %v1209_v58  ;;  %v1212_v0 = vpop.f32.mrb[10].mxu1 }
 0x11a   :  { %v835_v60 = vadd.f32 %v1183_v56, %v786_v37  ;;  %v1186_v61 = vadd.f32 %v1185_v59, %v1184_v57  ;;  %v1213_v2 = vpop.f32.mrb[11].mxu1 }
 0x11b   :  { %v1214_v3 = vadd.f32 %v1213_v2, %v1212_v0 }
 0x11c   :  { %v838_v1 = vadd.f32 %v1186_v61, %v789_v39  ;;  %v884_v4 = vadd.f32 %v1211_v63, %v835_v60 }
 0x11e   :  { %v1187_v5 = vpop.f32.mrb[12].mxu0  ;;  %v887_v7 = vadd.f32 %v1214_v3, %v838_v1 }
 0x11f   :  { %v1188_v6 = vpop.f32.mrb[13].mxu0  ;;  %v1215_v10 = vpop.f32.mrb[12].mxu1 }
 0x120   :  { %v1189_v8 = vadd.f32 %v1188_v6, %v1187_v5  ;;  %v1190_v9 = vpop.f32.mrb[14].mxu0  ;;  %v1216_v14 = vpop.f32.mrb[13].mxu1 }
 0x121   :  { %v1191_v11 = vpop.f32.mrb[15].mxu0  ;;  %v1217_v15 = vadd.f32 %v1216_v14, %v1215_v10  ;;  %v1218_v16 = vpop.f32.mrb[14].mxu1 }
 0x122   :  { %v843_v12 = vadd.f32 %v1189_v8, %v794_v50  ;;  %v1192_v13 = vadd.f32 %v1191_v11, %v1190_v9  ;;  %v1219_v18 = vpop.f32.mrb[15].mxu1 }
 0x123   :  { %v1220_v19 = vadd.f32 %v1219_v18, %v1218_v16 }
 0x124   :  { %v846_v17 = vadd.f32 %v1192_v13, %v797_v53  ;;  %v892_v20 = vadd.f32 %v1217_v15, %v843_v12 }
 0x126   :  { %v895_v21 = vadd.f32 %v1220_v19, %v846_v17 }
 0x136   :  { %v1249_v22 = vpop.f32.mrb[16].mxu0 }
 0x137   :  { %v941_v23 = vadd.f32 %v1249_v22, %v892_v20  ;;  %v932_v24 = vpop.f32.mrb[17].mxu0 }
 0x138   :  { %v933_v25 = vadd.f32 %v932_v24, %v884_v4  ;;  %v1250_v26 = vpop.f32.mrb[18].mxu0 }
 0x139   :  { %v944_v27 = vadd.f32 %v1250_v26, %v895_v21  ;;  %v935_v28 = vpop.f32.mrb[19].mxu0  ;;  %v978_v35 = vmul.f32 %v941_v23, %v941_v23 }
 0x13a   :  { %v936_v29 = vadd.f32 %v935_v28, %v887_v7  ;;  %v976_v31 = vmul.f32 %v933_v25, %v933_v25 }
 0x13b   :  { %v1106_v30 = vpack.c.bf16 %v944_v27, %v941_v23  ;;  %v979_v38 = vmul.f32 %v944_v27, %v944_v27 }
 0x13c   :  { %v1101_v32 = vpack.c.bf16 %v936_v29, %v933_v25  ;;  %v967_v33 = vadd.f32 %v936_v29, %v933_v25  ;;  %v977_v34 = vmul.f32 %v936_v29, %v936_v29 }
 0x13d   :  { %1108 = vst [vmem:[%s1650_s2 + $0x8] sm:$0xff] %v1106_v30  }
 0x13e   :  { %1102 = vst [vmem:[%s1650_s2] sm:$0xff] %v1101_v32   ;;  %v968_v36 = vadd.f32 %v967_v33, %v941_v23  ;;  %v980_v37 = vadd.f32 %v977_v34, %v976_v31 }
 0x140   :  { %v969_v39 = vadd.f32 %v968_v36, %v944_v27  ;;  %v981_v40 = vadd.f32 %v980_v37, %v978_v35 }
 0x142   :  { %v970_v41 = vrot.slane %v969_v39, 4  ;;  %v982_v42 = vadd.f32 %v981_v40, %v979_v38 }
 0x144   :  { %v971_v43 = vadd.f32 %v970_v41, %v969_v39  ;;  %v983_v44 = vrot.slane %v982_v42, 4 }
 0x146   :  { %v972_v45 = vrot.slane %v971_v43, 2  ;;  %v984_v46 = vadd.f32 %v983_v44, %v982_v42 }
 0x148   :  { %v973_v47 = vadd.f32 %v972_v45, %v971_v43  ;;  %v985_v48 = vrot.slane %v984_v46, 2 }
 0x14a   :  { %v974_v49 = vrot.slane %v973_v47, 1  ;;  %v986_v50 = vadd.f32 %v985_v48, %v984_v46 }
 0x14c   :  { %v987_v51 = vrot.slane %v986_v50, 1  ;;  %v975_v52 = vadd.f32 %v974_v49, %v973_v47 }
 0x14e   :  { %v988_v53 = vadd.f32 %v987_v51, %v986_v50 }
 0x150   :  { %v990_v54 = vsel %vm989_vm0, %v975_v52, %v988_v53 }
 0x151   :  { %991 = vst [vmem:[%s1651_s3] sm:$0x3] %v990_v54 }

// kernel: vgg_feature_extractor.16
= control target key start
LH: loop header
LB: loop body
LE: loop exit
PB: predicated region body
PF: predicated region fallthrough
CT: control target
= control target key end

     0   :  { %s120_s0 = inlined_call_operand.vmem [shape: bf16[2,16,128], index: 0, kind: input, shape index: {}]   ;;  %s121_s1 = inlined_call_operand.vmem [shape: f32[1,128], index: 1, kind: input, shape index: {}]   ;;  %s122_s2 = inlined_call_operand.vmem [shape: f32[1,128], index: 2, kind: input, shape index: {}]   ;;  %s123_s3 = inlined_call_operand.vmem [shape: bf16[16,128], index: 3, kind: output, shape index: {}]  }
   0x1   :  { %v63_v0 = vld [vmem:[%s121_s1] ss:$0 sm:$0xff]  ;;  %v84_v4 = vld [vmem:[%s120_s0 + $0x8] sm:$0xff]  }
   0x2   :  { %v72_v1 = vld [vmem:[%s120_s0] sm:$0xff]   ;;  %v77_v6 = vunpack.c.l.bf16 %v84_v4  ;;  %v78_v7 = vunpack.c.h.bf16 %v84_v4 }
   0x3   :  { %v73_v2 = vunpack.c.l.bf16 %v72_v1  ;;  %v74_v3 = vunpack.c.h.bf16 %v72_v1  ;;  %v64_v5 = vld [vmem:[%s122_s2] ss:$0 sm:$0xff] }
   0x4   :  { %v41_v10 = vmul.f32 %v77_v6, %v63_v0  ;;  %v42_v11 = vmul.f32 %v78_v7, %v63_v0 }
   0x5   :  { %v26_v8 = vmul.f32 %v73_v2, %v63_v0  ;;  %v27_v9 = vmul.f32 %v74_v3, %v63_v0 }
   0x6   :  { %v43_v14 = vadd.f32 %v64_v5, %v41_v10  ;;  %v44_v15 = vadd.f32 %v64_v5, %v42_v11 }
   0x7   :  { %v34_v12 = vadd.f32 %v64_v5, %v26_v8  ;;  %v35_v13 = vadd.f32 %v64_v5, %v27_v9 }
   0x9   :  { %v45_v16 = vmax.f32 %v34_v12, %v43_v14  ;;  %v46_v17 = vmax.f32 %v35_v13, %v44_v15 }
   0xb   :  { %v47_v18 = vmax.f32 %v45_v16, 0.0  ;;  %v48_v19 = vmax.f32 %v46_v17, 0.0 }
   0xd   :  { %v82_v20 = vpack.c.bf16 %v48_v19, %v47_v18 }
   0xf   :  { %83 = vst [vmem:[%s123_s3] sm:$0xff] %v82_v20  }

// kernel: vgg_feature_extractor.17
= control target key start
LH: loop header
LB: loop body
LE: loop exit
PB: predicated region body
PF: predicated region fallthrough
CT: control target
= control target key end

     0   :  { %s662_s1 = inlined_call_operand.vmem [shape: bf16[512,128], index: 1, kind: input, shape index: {}]   ;;  %s663_s0 = inlined_call_operand.vmem [shape: bf16[1,16,512], index: 0, kind: input, shape index: {}]   ;;  %s664_s2 = inlined_call_operand.vmem [shape: f32[1,128], index: 2, kind: input, shape index: {}]   ;;  %s665_s3 = inlined_call_operand.vmem [shape: bf16[16,128], index: 3, kind: output, shape index: {}]  }
   0x1   :  { %v490_v0 = vld [vmem:[%s662_s1 + $0x40] sm:$0xff]   ;;  %v494_v4 = vld [vmem:[%s662_s1 + $0x48] sm:$0xff]   ;;  %v498_v8 = vld [vmem:[%s662_s1 + $0x50] sm:$0xff]  }
   0x2   :  { %v491_v1 = vld [vmem:[%s662_s1 + $0xc0] sm:$0xff]   ;;  %446 = vmatprep.subr.bf16.mxu0 %v490_v0  ;;  %v495_v5 = vld [vmem:[%s662_s1 + $0xc8] sm:$0xff]   ;;  %v499_v9 = vld [vmem:[%s662_s1 + $0xd0] sm:$0xff]  }
   0x3   :  { %v492_v2 = vld [vmem:[%s662_s1] sm:$0xff]   ;;  %468 = vmatprep.subr.bf16.mxu1 %v491_v1  ;;  %v496_v6 = vld [vmem:[%s662_s1 + $0x8] sm:$0xff]   ;;  %v500_v10 = vld [vmem:[%s662_s1 + $0x10] sm:$0xff]  }
   0x4   :  { %v493_v3 = vld [vmem:[%s662_s1 + $0x80] sm:$0xff]   ;;  %447 = vmatpush3.bf16.msra.mxu0 %v492_v2  ;;  %v497_v7 = vld [vmem:[%s662_s1 + $0x88] sm:$0xff]   ;;  %v501_v11 = vld [vmem:[%s662_s1 + $0x90] sm:$0xff]  }
   0x5   :  { %469 = vmatpush3.bf16.msra.mxu1 %v493_v3  ;;  %448 = vmatprep.subr.bf16.mxu0 %v494_v4  ;;  %v502_v12 = vld [vmem:[%s662_s1 + $0x58] sm:$0xff]   ;;  %v506_v16 = vld [vmem:[%s662_s1 + $0x60] sm:$0xff]   ;;  %v510_v20 = vld [vmem:[%s662_s1 + $0x68] sm:$0xff]  }
   0x6   :  { %470 = vmatprep.subr.bf16.mxu1 %v495_v5  ;;  %v503_v13 = vld [vmem:[%s662_s1 + $0xd8] sm:$0xff]   ;;  %v507_v17 = vld [vmem:[%s662_s1 + $0xe0] sm:$0xff]   ;;  %v511_v21 = vld [vmem:[%s662_s1 + $0xe8] sm:$0xff]  }
   0x7   :  { %v504_v14 = vld [vmem:[%s662_s1 + $0x18] sm:$0xff]   ;;  %v508_v18 = vld [vmem:[%s662_s1 + $0x20] sm:$0xff]   ;;  %v512_v22 = vld [vmem:[%s662_s1 + $0x28] sm:$0xff]  }
   0x8   :  { %449 = vmatpush3.bf16.msra.mxu0 %v496_v6  ;;  %v505_v15 = vld [vmem:[%s662_s1 + $0x98] sm:$0xff]   ;;  %v509_v19 = vld [vmem:[%s662_s1 + $0xa0] sm:$0xff]   ;;  %v513_v23 = vld [vmem:[%s662_s1 + $0xa8] sm:$0xff]  }
   0x9   :  { %471 = vmatpush3.bf16.msra.mxu1 %v497_v7  ;;  %450 = vmatprep.subr.bf16.mxu0 %v498_v8  ;;  %v514_v24 = vld [vmem:[%s662_s1 + $0x70] sm:$0xff]   ;;  %v518_v28 = vld [vmem:[%s662_s1 + $0x78] sm:$0xff]   ;;  %v400_v38 = vld [vmem:[%s664_s2] ss:$0 sm:$0xff] }
   0xa   :  { %472 = vmatprep.subr.bf16.mxu1 %v499_v9  ;;  %v515_v25 = vld [vmem:[%s662_s1 + $0xf0] sm:$0xff]   ;;  %v519_v29 = vld [vmem:[%s662_s1 + $0xf8] sm:$0xff]  }
   0xb   :  { %v516_v26 = vld [vmem:[%s662_s1 + $0x30] sm:$0xff]   ;;  %v520_v30 = vld [vmem:[%s662_s1 + $0x38] sm:$0xff]  }
   0xc   :  { %451 = vmatpush3.bf16.msra.mxu0 %v500_v10  ;;  %v517_v27 = vld [vmem:[%s662_s1 + $0xb0] sm:$0xff]   ;;  %v521_v31 = vld [vmem:[%s662_s1 + $0xb8] sm:$0xff]  }
   0xd   :  { %473 = vmatpush3.bf16.msra.mxu1 %v501_v11  ;;  %452 = vmatprep.subr.bf16.mxu0 %v502_v12  ;;  %v522_v32 = vld [vmem:[%s663_s0] ss:$16 sps:$4 sm:$0xff]   ;;  %v524_v33 = vld [vmem:[%s663_s0 + $0x4] ss:$16 sps:$4 sm:$0xff]   ;;  %v525_v34 = vld [vmem:[%s663_s0 + $0x8] ss:$16 sps:$4 sm:$0xff]  }
   0xe   :  { %474 = vmatprep.subr.bf16.mxu1 %v503_v13  ;;  %v527_v35 = vld [vmem:[%s663_s0 + $0xc] ss:$16 sps:$4 sm:$0xff]   ;;  %334 = vmatprep.mubr.bf16.mxu0 %v524_v33 }
   0xf   :  { %375 = vmatprep.mubr.bf16.mxu1 %v527_v35 }
  0x10   :  { %453 = vmatpush3.bf16.msra.mxu0 %v504_v14 }
  0x11   :  { %475 = vmatpush3.bf16.msra.mxu1 %v505_v15  ;;  %454 = vmatprep.subr.bf16.mxu0 %v506_v16 }
  0x12   :  { %476 = vmatprep.subr.bf16.mxu1 %v507_v17 }
  0x14   :  { %455 = vmatpush3.bf16.msra.mxu0 %v508_v18 }
  0x15   :  { %477 = vmatpush3.bf16.msra.mxu1 %v509_v19  ;;  %456 = vmatprep.subr.bf16.mxu0 %v510_v20 }
  0x16   :  { %478 = vmatprep.subr.bf16.mxu1 %v511_v21 }
  0x18   :  { %457 = vmatpush3.bf16.msra.mxu0 %v512_v22 }
  0x19   :  { %479 = vmatpush3.bf16.msra.mxu1 %v513_v23  ;;  %458 = vmatprep.subr.bf16.mxu0 %v514_v24 }
  0x1a   :  { %480 = vmatprep.subr.bf16.mxu1 %v515_v25 }
  0x1c   :  { %459 = vmatpush3.bf16.msra.mxu0 %v516_v26 }
  0x1d   :  { %481 = vmatpush3.bf16.msra.mxu1 %v517_v27  ;;  %460 = vmatprep.subr.bf16.mxu0 %v518_v28 }
  0x1e   :  { %482 = vmatprep.subr.bf16.mxu1 %v519_v29 }
  0x20   :  { %461 = vmatpush3.bf16.msra.mxu0 %v520_v30 }
  0x21   :  { %483 = vmatpush3.bf16.msra.mxu1 %v521_v31 }
  0x23   :  { %335 = vmatmul.mubr.bf16.vlgmr.msra.gmra.mrb[0].mxu0 %v522_v32 }
  0x24   :  { %376 = vmatmul.mubr.bf16.vlgmr.msra.gmra.mrb[0].mxu1 %v525_v34 }
  0xf6   :  { %v462_v36 = vpop.f32.mrb[0].mxu0 }
  0xf7   :  { %v484_v37 = vpop.f32.mrb[0].mxu1  ;;  %v463_v39 = vpop.f32.mrb[1].mxu0 }
  0xf8   :  { %v464_v40 = vadd.f32 %v463_v39, %v462_v36  ;;  %v485_v41 = vpop.f32.mrb[1].mxu1  ;;  %v465_v42 = vpop.f32.mrb[2].mxu0 }
  0xf9   :  { %v486_v43 = vadd.f32 %v485_v41, %v484_v37  ;;  %v487_v44 = vpop.f32.mrb[2].mxu1  ;;  %v466_v45 = vpop.f32.mrb[3].mxu0 }
  0xfa   :  { %v337_v46 = vadd.f32 %v464_v40, %v400_v38  ;;  %v467_v47 = vadd.f32 %v466_v45, %v465_v42  ;;  %v488_v48 = vpop.f32.mrb[3].mxu1 }
  0xfb   :  { %v489_v49 = vadd.f32 %v488_v48, %v487_v44 }
  0xfc   :  { %v378_v50 = vadd.f32 %v486_v43, %v337_v46  ;;  %v340_v51 = vadd.f32 %v467_v47, %v400_v38 }
  0xfe   :  { %v381_v52 = vadd.f32 %v489_v49, %v340_v51  ;;  %v384_v53 = vmax.f32 %v378_v50, 0.0 }
 0x100   :  { %v385_v54 = vmax.f32 %v381_v52, 0.0 }
 0x102   :  { %v444_v55 = vpack.c.bf16 %v385_v54, %v384_v53 }
 0x104   :  { %445 = vst [vmem:[%s665_s3] sm:$0xff] %v444_v55  }

</bundles_post_ra>
